<compile_context>
chip_gen: v6e
topology: v6e:2x2x1
jax: 0.10.0
libtpu: 0.0.40
codegen_flags: <defaults>
</compile_context>

<pallas_src>
import functools

import jax
import jax.numpy as jnp
from jax import lax
from jax.experimental import pallas as pl
from jax.experimental.pallas import tpu as pltpu

NEG_SLOPE = 0.1   # nn.LeakyReLU(negative_slope=0.1)
EPS = 1e-5        # BatchNorm2d / InstanceNorm2d default eps
LANE = 128


def _round_up(x, m):
    return (x + m - 1) // m * m


def _leaky(v):
    return jnp.where(v >= 0.0, v, NEG_SLOPE * v)


# ----------------------------------------------------------------------------
# Layout helper (pure data rearrangement, one pass over the input, done in XLA)
# ----------------------------------------------------------------------------
def _pad_and_phase(x, s):
    """Zero-pad spatially by 1 and split H/W into `s` phases so every 3x3 tap of a
    stride-`s` conv becomes a contiguous static slice in the kernel (no 9x im2col)."""
    N, H, W, C = x.shape
    Ho = (H - 1) // s + 1
    Wo = (W - 1) // s + 1
    Hph = 2 // s + Ho
    Wph = 2 // s + Wo
    xp = jnp.pad(x, ((0, 0), (1, s * Hph - H - 1), (1, s * Wph - W - 1), (0, 0)))
    x_ph = xp.reshape(N, Hph, s, Wph, s, C).transpose(0, 1, 3, 2, 4, 5)
    x_ph = x_ph.reshape(N, Hph, Wph, s * s * C)   # channel index = (ph_h*s+ph_w)*C + c
    return x_ph, Ho, Wo


# ----------------------------------------------------------------------------
# Kernel 1: bn1 + LeakyReLU -> conv1 (3x3, stride s) -> IBN -> LeakyReLU
# ----------------------------------------------------------------------------
def _conv1_ibn_kernel(x_ref, sc_ref, bs_ref, w_ref,
                      ing_ref, inb_ref, bns_ref, bnb_ref, o_ref,
                      *, stride, H, W, Ho, Wo, cin, apply_prologue):
    s = stride
    x = x_ref[0]                                       # (Hph, Wph, s*s*cin) f32
    Hph, Wph = x.shape[0], x.shape[1]

    # bn1 + LeakyReLU prologue applied per phase slab (lane-aligned channel slices).
    # The padding-ring validity mask is computed in-kernel from iotas (no HBM mask):
    # a position is a real pixel iff 1 <= r*s + ph_h <= H  and  1 <= c*s + ph_w <= W.
    if apply_prologue:
        sc = sc_ref[...].reshape(1, 1, cin)
        bs = bs_ref[...].reshape(1, 1, cin)
        r3 = lax.broadcasted_iota(jnp.int32, (Hph, Wph, cin), 0)
        c3 = lax.broadcasted_iota(jnp.int32, (Hph, Wph, cin), 1)

    slabs = []
    for ph_h in range(s):
        for ph_w in range(s):
            p = ph_h * s + ph_w
            slab = x[:, :, p * cin:(p + 1) * cin]      # (Hph, Wph, cin) f32
            if apply_prologue:
                slab = _leaky(slab * sc + bs)          # relu1(bn1(x))
                rlo = 1 if ph_h == 0 else 0
                rhi = (H - ph_h) // s
                clo = 1 if ph_w == 0 else 0
                chi = (W - ph_w) // s
                if rlo > 0 or rhi < Hph - 1 or clo > 0 or chi < Wph - 1:
                    valid = ((r3 >= rlo) & (r3 <= rhi) &
                             (c3 >= clo) & (c3 <= chi))
                    slab = jnp.where(valid, slab, 0.0)  # keep conv zero-pad ring at 0
            slabs.append(slab)                          # conv1 sees raw x otherwise

    # conv1: 9 accumulated (M, cin) @ (cin, t_co) MXU dots (bf16 in, f32 acc).
    m = Ho * Wo
    t_co = o_ref.shape[-1]
    acc = jnp.zeros((m, t_co), jnp.float32)
    for kh in range(3):
        for kw in range(3):
            ph = (kh % s) * s + (kw % s)
            win = slabs[ph][kh // s:kh // s + Ho, kw // s:kw // s + Wo, :]
            acc = acc + jnp.dot(win.reshape(m, cin).astype(jnp.bfloat16),
                                w_ref[kh * 3 + kw],
                                preferred_element_type=jnp.float32)

    # IBN epilogue: first half of the channels = InstanceNorm (per-sample spatial
    # stats, single-pass variance), second half = eval-mode BatchNorm folded to
    # scale/bias.  Params are zero-padded on the "other" half (and the lane padding),
    # so the two affine paths simply add -- no iota / channel select needed.
    mean = jnp.mean(acc, axis=0, keepdims=True)
    var = jnp.maximum(jnp.mean(acc * acc, axis=0, keepdims=True) - mean * mean, 0.0)
    out = ((acc - mean) * lax.rsqrt(var + EPS) * ing_ref[...] + inb_ref[...]
           + acc * bns_ref[...] + bnb_ref[...])
    o_ref[0] = _leaky(out).astype(o_ref.dtype)          # relu2; bf16 feeds conv2's MXU


def conv1_ibn_fused(x_ph, sc1, bs1, w1, ing, inb, bns, bnb, *,
                    stride, H, W, Ho, Wo, apply_prologue, t_co):
    N, Hph, Wph, ssC = x_ph.shape
    cin = ssC // (stride * stride)
    Co = w1.shape[-1]
    n_co = Co // t_co
    M = Ho * Wo
    kern = functools.partial(_conv1_ibn_kernel, stride=stride, H=H, W=W,
                             Ho=Ho, Wo=Wo, cin=cin, apply_prologue=apply_prologue)
    return pl.pallas_call(
        kern,
        out_shape=jax.ShapeDtypeStruct((N, M, Co), jnp.bfloat16),
        grid=(N, n_co),
        in_specs=[
            pl.BlockSpec((1, Hph, Wph, ssC), lambda n, co: (n, 0, 0, 0)),
            pl.BlockSpec((1, cin), lambda n, co: (0, 0)),
            pl.BlockSpec((1, cin), lambda n, co: (0, 0)),
            pl.BlockSpec((9, cin, t_co), lambda n, co: (0, 0, co)),
            pl.BlockSpec((1, t_co), lambda n, co: (0, co)),
            pl.BlockSpec((1, t_co), lambda n, co: (0, co)),
            pl.BlockSpec((1, t_co), lambda n, co: (0, co)),
            pl.BlockSpec((1, t_co), lambda n, co: (0, co)),
        ],
        out_specs=pl.BlockSpec((1, M, t_co), lambda n, co: (n, 0, co)),
        compiler_params=pltpu.CompilerParams(
            dimension_semantics=("parallel", "parallel")),
    )(x_ph, sc1, bs1, w1, ing, inb, bns, bnb)


# ----------------------------------------------------------------------------
# Kernel 2: conv2 (3x3, stride 1) + fused residual (identity or 1x1 shortcut conv)
# ----------------------------------------------------------------------------
def conv2_residual_fused(h_pad, w2, res, *, Ho, Wo, t_co,
                         wsc=None, sc1=None, bs1=None):
    """`res` is the identity residual (channels == Cout, added directly) or, when
    `wsc` is given, the strided 1x1-shortcut input (channels == Cin) -- the 1x1 conv
    runs as an extra MXU dot in the same kernel.  If sc1/bs1 are given, bn1+LeakyReLU
    is applied to the shortcut input in-kernel (activate_before_residual=True)."""
    N, Hp, Wp, C2 = h_pad.shape
    M = Ho * Wo
    Co = w2.shape[-1]
    Cr = res.shape[-1]
    n_co = Co // t_co
    use_shortcut = wsc is not None
    activate_res = sc1 is not None

    def kernel(h_ref, w2_ref, res_ref, *rest):
        o_ref = rest[-1]
        h = h_ref[0].astype(jnp.float32)               # (Ho+2, Wo+2, C2)
        acc = jnp.zeros((M, t_co), jnp.float32)
        for kh in range(3):
            for kw in range(3):
                win = h[kh:kh + Ho, kw:kw + Wo, :]
                acc = acc + jnp.dot(win.reshape(M, C2).astype(jnp.bfloat16),
                                    w2_ref[kh * 3 + kw],
                                    preferred_element_type=jnp.float32)
        r = res_ref[0]                                  # f32
        if use_shortcut:
            wsc_ref = rest[0]
            if activate_res:
                sc_ref, bs_ref = rest[1], rest[2]
                r = _leaky(r * sc_ref[...] + bs_ref[...])
            acc = acc + jnp.dot(r.astype(jnp.bfloat16), wsc_ref[...],
                                preferred_element_type=jnp.float32)
        else:
            acc = acc + r
        o_ref[0] = acc

    in_specs = [
        pl.BlockSpec((1, Hp, Wp, C2), lambda n, co: (n, 0, 0, 0)),
        pl.BlockSpec((9, C2, t_co), lambda n, co: (0, 0, co)),
    ]
    if use_shortcut:
        in_specs.append(pl.BlockSpec((1, M, Cr), lambda n, co: (n, 0, 0)))
    else:
        in_specs.append(pl.BlockSpec((1, M, t_co), lambda n, co: (n, 0, co)))
    args = [h_pad, w2, res]
    if use_shortcut:
        in_specs.append(pl.BlockSpec((Cr, t_co), lambda n, co: (0, co)))
        args.append(wsc)
        if activate_res:
            in_specs += [pl.BlockSpec((1, Cr), lambda n, co: (0, 0))] * 2
            args += [sc1, bs1]

    return pl.pallas_call(
        kernel,
        out_shape=jax.ShapeDtypeStruct((N, M, Co), jnp.float32),
        grid=(N, n_co),
        in_specs=in_specs,
        out_specs=pl.BlockSpec((1, M, t_co), lambda n, co: (n, 0, co)),
        compiler_params=pltpu.CompilerParams(
            dimension_semantics=("parallel", "parallel")),
    )(*args)


# ----------------------------------------------------------------------------
# BasicBlock forward
# ----------------------------------------------------------------------------
def basic_block_forward(params, x_nchw, *, stride, in_planes, out_planes,
                        activate_before_residual=False, dropout=0.0):
    equal_in_out = in_planes == out_planes
    cin_p = _round_up(in_planes, LANE)
    cout_p = _round_up(out_planes, LANE)
    t_co = 256 if cout_p % 256 == 0 else LANE          # lane-dense Cout tile

    x = jnp.transpose(x_nchw, (0, 2, 3, 1)).astype(jnp.float32)  # NCHW -> NHWC
    N, H, W, _ = x.shape
    x_c = jnp.pad(x, ((0, 0), (0, 0), (0, 0), (0, cin_p - in_planes)))  # lane-pad C

    # eval-mode bn1 folded to scale/bias (zero on the padded lanes)
    scale1 = params["bn1_gamma"] / jnp.sqrt(params["bn1_var"] + EPS)
    bias1 = params["bn1_beta"] - params["bn1_mean"] * scale1
    sc1 = jnp.pad(scale1, (0, cin_p - in_planes)).reshape(1, cin_p)
    bs1 = jnp.pad(bias1, (0, cin_p - in_planes)).reshape(1, cin_p)

    # conv1 weights (3,3,Cin,Cout) HWIO -> (9, Cin_p, Cout_p) bf16
    w1 = params["conv1_w"].reshape(9, in_planes, out_planes)
    w1 = jnp.pad(w1, ((0, 0), (0, cin_p - in_planes), (0, cout_p - out_planes)))
    w1 = w1.astype(jnp.bfloat16)

    # IBN params, zero-padded so the IN half and BN half simply add in-kernel
    half = out_planes // 2
    in_g = jnp.concatenate([params["ibn_in_gamma"], jnp.zeros(cout_p - half)])
    in_b = jnp.concatenate([params["ibn_in_beta"], jnp.zeros(cout_p - half)])
    bns_h = params["ibn_bn_gamma"] / jnp.sqrt(params["ibn_bn_var"] + EPS)
    bnb_h = params["ibn_bn_beta"] - params["ibn_bn_mean"] * bns_h
    bn_s = jnp.concatenate([jnp.zeros(half), bns_h, jnp.zeros(cout_p - out_planes)])
    bn_b = jnp.concatenate([jnp.zeros(half), bnb_h, jnp.zeros(cout_p - out_planes)])
    ing, inb, bns, bnb = (v.reshape(1, cout_p).astype(jnp.float32)
                          for v in (in_g, in_b, bn_s, bn_b))

    # spatially zero-padded + phase-decomposed conv1 input (1x data, no 9x im2col)
    x_ph, Ho, Wo = _pad_and_phase(x_c, stride)

    # PyTorch branch semantics: conv1 sees the activated input, except in the
    # (not equal_in_out, activate_before_residual=False) case where it sees raw x.
    apply_prologue = equal_in_out or activate_before_residual

    out_act = conv1_ibn_fused(x_ph, sc1, bs1, w1, ing, inb, bns, bnb,
                              stride=stride, H=H, W=W, Ho=Ho, Wo=Wo,
                              apply_prologue=apply_prologue, t_co=t_co)
    # out_act: (N, Ho*Wo, Cout_p) bf16, already through IBN + relu2.
    # TODO(synk): dropout only exercised with p=0.0 (module default); no RNG path emitted.

    # conv2 input: spatial zero-pad of the activated tensor (stride 1 -> no phases)
    h_pad = jnp.pad(out_act.reshape(N, Ho, Wo, cout_p),
                    ((0, 0), (1, 1), (1, 1), (0, 0)))

    w2 = params["conv2_w"].reshape(9, out_planes, out_planes)
    w2 = jnp.pad(w2, ((0, 0), (0, cout_p - out_planes), (0, cout_p - out_planes)))
    w2 = w2.astype(jnp.bfloat16)

    if equal_in_out:
        # identity residual (PyTorch requires stride==1 here; the strided view keeps
        # shapes consistent if a caller ever passes stride>1)
        res = x_c[:, ::stride, ::stride, :].reshape(N, Ho * Wo, cout_p)
        y = conv2_residual_fused(h_pad, w2, res, Ho=Ho, Wo=Wo, t_co=t_co)
    else:
        xs = x_c[:, ::stride, ::stride, :].reshape(N, Ho * Wo, cin_p)
        wsc = params["shortcut_w"].reshape(in_planes, out_planes)
        wsc = jnp.pad(wsc, ((0, cin_p - in_planes), (0, cout_p - out_planes)))
        wsc = wsc.astype(jnp.bfloat16)
        if activate_before_residual:
            # shortcut consumes relu1(bn1(x)); the 1x1/stride-s conv commutes with the
            # elementwise activation, so it is applied to the strided tile in-kernel.
            y = conv2_residual_fused(h_pad, w2, xs, Ho=Ho, Wo=Wo, t_co=t_co,
                                     wsc=wsc, sc1=sc1, bs1=bs1)
        else:
            y = conv2_residual_fused(h_pad, w2, xs, Ho=Ho, Wo=Wo, t_co=t_co, wsc=wsc)

    y = y.reshape(N, Ho, Wo, cout_p)[..., :out_planes]
    return jnp.transpose(y, (0, 3, 1, 2))  # back to NCHW


# ----------------------------------------------------------------------------
# Pure-JAX (f32, XLA conv) reference for validation
# ----------------------------------------------------------------------------
def basic_block_reference(params, x_nchw, *, stride, in_planes, out_planes,
                          activate_before_residual=False):
    equal = in_planes == out_planes
    x = x_nchw.astype(jnp.float32)
    scale1 = params["bn1_gamma"] / jnp.sqrt(params["bn1_var"] + EPS)
    bias1 = params["bn1_beta"] - params["bn1_mean"] * scale1

    def bn_relu(v):
        y = v * scale1[None, :, None, None] + bias1[None, :, None, None]
        return jnp.where(y >= 0, y, NEG_SLOPE * y)

    def conv(v, w_hwio, s, p):
        return lax.conv_general_dilated(v, w_hwio, (s, s), [(p, p), (p, p)],
                                        dimension_numbers=("NCHW", "HWIO", "NCHW"))

    if (not equal) and activate_before_residual:
        x = bn_relu(x)
        conv1_in, res_src = x, x
    else:
        act = bn_relu(x)
        conv1_in, res_src = (act, x) if equal else (x, x)
    out = conv(conv1_in, params["conv1_w"], stride, 1)

    half = out_planes // 2
    o_in, o_bn = out[:, :half], out[:, half:]
    mu = jnp.mean(o_in, axis=(2, 3), keepdims=True)
    var = jnp.mean((o_in - mu) ** 2, axis=(2, 3), keepdims=True)
    y_in = ((o_in - mu) * lax.rsqrt(var + EPS)
            * params["ibn_in_gamma"][None, :, None, None]
            + params["ibn_in_beta"][None, :, None, None])
    bscale = params["ibn_bn_gamma"] / jnp.sqrt(params["ibn_bn_var"] + EPS)
    bbias = params["ibn_bn_beta"] - params["ibn_bn_mean"] * bscale
    y_bn = o_bn * bscale[None, :, None, None] + bbias[None, :, None, None]
    out = jnp.concatenate([y_in, y_bn], axis=1)
    out = jnp.where(out >= 0, out, NEG_SLOPE * out)
    out = conv(out, params["conv2_w"], 1, 1)

    res = x if equal else conv(res_src, params["shortcut_w"], stride, 0)
    return out + res


# ----------------------------------------------------------------------------
# Deterministic synthetic parameters (shapes as in the PyTorch __init__)
# ----------------------------------------------------------------------------
def init_params(key, in_planes, out_planes):
    half = out_planes // 2
    ks = jax.random.split(key, 9)
    return {
        "bn1_gamma": 1.0 + 0.1 * jax.random.normal(ks[0], (in_planes,)),
        "bn1_beta": 0.1 * jax.random.normal(ks[1], (in_planes,)),
        "bn1_mean": jnp.zeros((in_planes,)),
        "bn1_var": jnp.ones((in_planes,)),
        "conv1_w": 0.1 * jax.random.normal(ks[2], (3, 3, in_planes, out_planes)),  # HWIO
        "ibn_in_gamma": 1.0 + 0.1 * jax.random.normal(ks[3], (half,)),
        "ibn_in_beta": 0.1 * jax.random.normal(ks[4], (half,)),
        "ibn_bn_gamma": 1.0 + 0.1 * jax.random.normal(ks[5], (out_planes - half,)),
        "ibn_bn_beta": 0.1 * jax.random.normal(ks[6], (out_planes - half,)),
        "ibn_bn_mean": jnp.zeros((out_planes - half,)),
        "ibn_bn_var": jnp.ones((out_planes - half,)),
        "conv2_w": 0.1 * jax.random.normal(ks[7], (3, 3, out_planes, out_planes)),  # HWIO
        "shortcut_w": 0.1 * jax.random.normal(ks[8], (1, 1, in_planes, out_planes)),
    }


if __name__ == "__main__":
    key = jax.random.PRNGKey(0)
    kx, kp1, kp2, kp3 = jax.random.split(key, 4)

    def run_and_check(params, x, *, stride, in_p, out_p, abr):
        fwd = jax.jit(functools.partial(
            basic_block_forward, stride=stride, in_planes=in_p, out_planes=out_p,
            activate_before_residual=abr, dropout=0.0))
        y = fwd(params, x)
        jax.block_until_ready(y)
        ref = basic_block_reference(params, x, stride=stride, in_planes=in_p,
                                    out_planes=out_p, activate_before_residual=abr)
        assert y.shape == ref.shape
        # loose tolerance: bf16 MXU operands with f32 accumulation
        assert jnp.allclose(y, ref, atol=1e-1, rtol=1e-1), \
            float(jnp.max(jnp.abs(y - ref)))
        return y

    # Config A: downsampling block (in != out, stride 2, shortcut conv, pre-activated residual)
    x_a = jax.random.normal(kx, (2, 4, 16, 16), dtype=jnp.float32)
    y_a = run_and_check(init_params(kp1, 4, 8), x_a, stride=2, in_p=4, out_p=8, abr=True)
    assert y_a.shape == (2, 8, 8, 8)

    # Config B: identity-shortcut block (in == out, stride 1)
    y_b = run_and_check(init_params(kp2, 8, 8), y_a, stride=1, in_p=8, out_p=8, abr=False)
    assert y_b.shape == (2, 8, 8, 8)

    # Config C: downsampling block without pre-activated residual (raw-x conv1 path)
    y_c = run_and_check(init_params(kp3, 4, 8), x_a, stride=2, in_p=4, out_p=8, abr=False)
    assert y_c.shape == (2, 8, 8, 8)

    print("KERNEL_OK")
</pallas_src>

<mosaic_0001>
module attributes {stable_mosaic.version = 11 : i64} {
  func.func @_conv1_ibn_kernel(%arg0: i32, %arg1: i32, %arg2: memref<1x9x9x512xf32, #tpu.memory_space<vmem>>, %arg3: memref<1x128xf32, #tpu.memory_space<vmem>>, %arg4: memref<1x128xf32, #tpu.memory_space<vmem>>, %arg5: memref<9x128x128xbf16, #tpu.memory_space<vmem>>, %arg6: memref<1x128xf32, #tpu.memory_space<vmem>>, %arg7: memref<1x128xf32, #tpu.memory_space<vmem>>, %arg8: memref<1x128xf32, #tpu.memory_space<vmem>>, %arg9: memref<1x128xf32, #tpu.memory_space<vmem>>, %arg10: memref<1x64x128xbf16, #tpu.memory_space<vmem>>) attributes {dimension_semantics = [#tpu.dimension_semantics<parallel>, #tpu.dimension_semantics<parallel>], iteration_bounds = array<i64: 2, 1>, scalar_prefetch = 0 : i64, scratch_operands = 0 : i64, tpu.core_type = #tpu.core_type<tc>, window_params = [{transform_indices = @transform_0, window_bounds = array<i64: 1, 9, 9, 512>}, {pipeline_mode = #tpu.pipeline_mode<synchronous>, transform_indices = @transform_1, window_bounds = array<i64: 1, 128>}, {pipeline_mode = #tpu.pipeline_mode<synchronous>, transform_indices = @transform_2, window_bounds = array<i64: 1, 128>}, {transform_indices = @transform_3, window_bounds = array<i64: 9, 128, 128>}, {transform_indices = @transform_4, window_bounds = array<i64: 1, 128>}, {transform_indices = @transform_5, window_bounds = array<i64: 1, 128>}, {transform_indices = @transform_6, window_bounds = array<i64: 1, 128>}, {transform_indices = @transform_7, window_bounds = array<i64: 1, 128>}, {transform_indices = @transform_8, window_bounds = array<i64: 1, 64, 128>}]} {
    %c0 = arith.constant 0 : index
    %c0_0 = arith.constant 0 : index
    %c0_1 = arith.constant 0 : index
    %c0_2 = arith.constant 0 : index
    %0 = vector.load %arg2[%c0, %c0_0, %c0_1, %c0_2] : memref<1x9x9x512xf32, #tpu.memory_space<vmem>>, vector<1x9x9x512xf32>
    %1 = vector.shape_cast %0 : vector<1x9x9x512xf32> to vector<9x9x512xf32>
    %c0_3 = arith.constant 0 : index
    %c0_4 = arith.constant 0 : index
    %2 = vector.load %arg3[%c0_3, %c0_4] : memref<1x128xf32, #tpu.memory_space<vmem>>, vector<1x128xf32>
    %3 = vector.shape_cast %2 : vector<1x128xf32> to vector<1x1x128xf32>
    %c0_5 = arith.constant 0 : index
    %c0_6 = arith.constant 0 : index
    %4 = vector.load %arg4[%c0_5, %c0_6] : memref<1x128xf32, #tpu.memory_space<vmem>>, vector<1x128xf32>
    %5 = vector.shape_cast %4 : vector<1x128xf32> to vector<1x1x128xf32>
    %6 = tpu.iota {dimensions = array<i32: 0>} : vector<9x9x128xi32>
    %7 = tpu.iota {dimensions = array<i32: 1>} : vector<9x9x128xi32>
    %8 = vector.extract_strided_slice %1 {offsets = [0, 0, 0], sizes = [9, 9, 128], strides = [1, 1, 1]} : vector<9x9x512xf32> to vector<9x9x128xf32>
    %9 = vector.broadcast %3 : vector<1x1x128xf32> to vector<9x9x128xf32>
    %10 = arith.mulf %8, %9 : vector<9x9x128xf32>
    %11 = vector.broadcast %5 : vector<1x1x128xf32> to vector<9x9x128xf32>
    %12 = arith.addf %10, %11 : vector<9x9x128xf32>
    %cst = arith.constant 0.000000e+00 : f32
    %13 = vector.broadcast %cst : f32 to vector<9x9x128xf32>
    %14 = arith.cmpf oge, %12, %13 : vector<9x9x128xf32>
    %cst_7 = arith.constant 1.000000e-01 : f32
    %15 = vector.broadcast %cst_7 : f32 to vector<9x9x128xf32>
    %16 = arith.mulf %15, %12 : vector<9x9x128xf32>
    %17 = arith.select %14, %12, %16 : vector<9x9x128xi1>, vector<9x9x128xf32>
    %c1_i32 = arith.constant 1 : i32
    %18 = vector.broadcast %c1_i32 : i32 to vector<9x9x128xi32>
    %19 = arith.cmpi sge, %6, %18 : vector<9x9x128xi32>
    %c8_i32 = arith.constant 8 : i32
    %20 = vector.broadcast %c8_i32 : i32 to vector<9x9x128xi32>
    %21 = arith.cmpi sle, %6, %20 : vector<9x9x128xi32>
    %22 = arith.andi %19, %21 : vector<9x9x128xi1>
    %c1_i32_8 = arith.constant 1 : i32
    %23 = vector.broadcast %c1_i32_8 : i32 to vector<9x9x128xi32>
    %24 = arith.cmpi sge, %7, %23 : vector<9x9x128xi32>
    %25 = arith.andi %22, %24 : vector<9x9x128xi1>
    %c8_i32_9 = arith.constant 8 : i32
    %26 = vector.broadcast %c8_i32_9 : i32 to vector<9x9x128xi32>
    %27 = arith.cmpi sle, %7, %26 : vector<9x9x128xi32>
    %28 = arith.andi %25, %27 : vector<9x9x128xi1>
    %cst_10 = arith.constant 0.000000e+00 : f32
    %29 = vector.broadcast %cst_10 : f32 to vector<9x9x128xf32>
    %30 = arith.select %28, %17, %29 : vector<9x9x128xi1>, vector<9x9x128xf32>
    %31 = vector.extract_strided_slice %1 {offsets = [0, 0, 128], sizes = [9, 9, 128], strides = [1, 1, 1]} : vector<9x9x512xf32> to vector<9x9x128xf32>
    %32 = vector.broadcast %3 : vector<1x1x128xf32> to vector<9x9x128xf32>
    %33 = arith.mulf %31, %32 : vector<9x9x128xf32>
    %34 = vector.broadcast %5 : vector<1x1x128xf32> to vector<9x9x128xf32>
    %35 = arith.addf %33, %34 : vector<9x9x128xf32>
    %cst_11 = arith.constant 0.000000e+00 : f32
    %36 = vector.broadcast %cst_11 : f32 to vector<9x9x128xf32>
    %37 = arith.cmpf oge, %35, %36 : vector<9x9x128xf32>
    %cst_12 = arith.constant 1.000000e-01 : f32
    %38 = vector.broadcast %cst_12 : f32 to vector<9x9x128xf32>
    %39 = arith.mulf %38, %35 : vector<9x9x128xf32>
    %40 = arith.select %37, %35, %39 : vector<9x9x128xi1>, vector<9x9x128xf32>
    %c1_i32_13 = arith.constant 1 : i32
    %41 = vector.broadcast %c1_i32_13 : i32 to vector<9x9x128xi32>
    %42 = arith.cmpi sge, %6, %41 : vector<9x9x128xi32>
    %c8_i32_14 = arith.constant 8 : i32
    %43 = vector.broadcast %c8_i32_14 : i32 to vector<9x9x128xi32>
    %44 = arith.cmpi sle, %6, %43 : vector<9x9x128xi32>
    %45 = arith.andi %42, %44 : vector<9x9x128xi1>
    %c0_i32 = arith.constant 0 : i32
    %46 = vector.broadcast %c0_i32 : i32 to vector<9x9x128xi32>
    %47 = arith.cmpi sge, %7, %46 : vector<9x9x128xi32>
    %48 = arith.andi %45, %47 : vector<9x9x128xi1>
    %c7_i32 = arith.constant 7 : i32
    %49 = vector.broadcast %c7_i32 : i32 to vector<9x9x128xi32>
    %50 = arith.cmpi sle, %7, %49 : vector<9x9x128xi32>
    %51 = arith.andi %48, %50 : vector<9x9x128xi1>
    %cst_15 = arith.constant 0.000000e+00 : f32
    %52 = vector.broadcast %cst_15 : f32 to vector<9x9x128xf32>
    %53 = arith.select %51, %40, %52 : vector<9x9x128xi1>, vector<9x9x128xf32>
    %54 = vector.extract_strided_slice %1 {offsets = [0, 0, 256], sizes = [9, 9, 128], strides = [1, 1, 1]} : vector<9x9x512xf32> to vector<9x9x128xf32>
    %55 = vector.broadcast %3 : vector<1x1x128xf32> to vector<9x9x128xf32>
    %56 = arith.mulf %54, %55 : vector<9x9x128xf32>
    %57 = vector.broadcast %5 : vector<1x1x128xf32> to vector<9x9x128xf32>
    %58 = arith.addf %56, %57 : vector<9x9x128xf32>
    %cst_16 = arith.constant 0.000000e+00 : f32
    %59 = vector.broadcast %cst_16 : f32 to vector<9x9x128xf32>
    %60 = arith.cmpf oge, %58, %59 : vector<9x9x128xf32>
    %cst_17 = arith.constant 1.000000e-01 : f32
    %61 = vector.broadcast %cst_17 : f32 to vector<9x9x128xf32>
    %62 = arith.mulf %61, %58 : vector<9x9x128xf32>
    %63 = arith.select %60, %58, %62 : vector<9x9x128xi1>, vector<9x9x128xf32>
    %c0_i32_18 = arith.constant 0 : i32
    %64 = vector.broadcast %c0_i32_18 : i32 to vector<9x9x128xi32>
    %65 = arith.cmpi sge, %6, %64 : vector<9x9x128xi32>
    %c7_i32_19 = arith.constant 7 : i32
    %66 = vector.broadcast %c7_i32_19 : i32 to vector<9x9x128xi32>
    %67 = arith.cmpi sle, %6, %66 : vector<9x9x128xi32>
    %68 = arith.andi %65, %67 : vector<9x9x128xi1>
    %c1_i32_20 = arith.constant 1 : i32
    %69 = vector.broadcast %c1_i32_20 : i32 to vector<9x9x128xi32>
    %70 = arith.cmpi sge, %7, %69 : vector<9x9x128xi32>
    %71 = arith.andi %68, %70 : vector<9x9x128xi1>
    %c8_i32_21 = arith.constant 8 : i32
    %72 = vector.broadcast %c8_i32_21 : i32 to vector<9x9x128xi32>
    %73 = arith.cmpi sle, %7, %72 : vector<9x9x128xi32>
    %74 = arith.andi %71, %73 : vector<9x9x128xi1>
    %cst_22 = arith.constant 0.000000e+00 : f32
    %75 = vector.broadcast %cst_22 : f32 to vector<9x9x128xf32>
    %76 = arith.select %74, %63, %75 : vector<9x9x128xi1>, vector<9x9x128xf32>
    %77 = vector.extract_strided_slice %1 {offsets = [0, 0, 384], sizes = [9, 9, 128], strides = [1, 1, 1]} : vector<9x9x512xf32> to vector<9x9x128xf32>
    %78 = vector.broadcast %3 : vector<1x1x128xf32> to vector<9x9x128xf32>
    %79 = arith.mulf %77, %78 : vector<9x9x128xf32>
    %80 = vector.broadcast %5 : vector<1x1x128xf32> to vector<9x9x128xf32>
    %81 = arith.addf %79, %80 : vector<9x9x128xf32>
    %cst_23 = arith.constant 0.000000e+00 : f32
    %82 = vector.broadcast %cst_23 : f32 to vector<9x9x128xf32>
    %83 = arith.cmpf oge, %81, %82 : vector<9x9x128xf32>
    %cst_24 = arith.constant 1.000000e-01 : f32
    %84 = vector.broadcast %cst_24 : f32 to vector<9x9x128xf32>
    %85 = arith.mulf %84, %81 : vector<9x9x128xf32>
    %86 = arith.select %83, %81, %85 : vector<9x9x128xi1>, vector<9x9x128xf32>
    %c0_i32_25 = arith.constant 0 : i32
    %87 = vector.broadcast %c0_i32_25 : i32 to vector<9x9x128xi32>
    %88 = arith.cmpi sge, %6, %87 : vector<9x9x128xi32>
    %c7_i32_26 = arith.constant 7 : i32
    %89 = vector.broadcast %c7_i32_26 : i32 to vector<9x9x128xi32>
    %90 = arith.cmpi sle, %6, %89 : vector<9x9x128xi32>
    %91 = arith.andi %88, %90 : vector<9x9x128xi1>
    %c0_i32_27 = arith.constant 0 : i32
    %92 = vector.broadcast %c0_i32_27 : i32 to vector<9x9x128xi32>
    %93 = arith.cmpi sge, %7, %92 : vector<9x9x128xi32>
    %94 = arith.andi %91, %93 : vector<9x9x128xi1>
    %c7_i32_28 = arith.constant 7 : i32
    %95 = vector.broadcast %c7_i32_28 : i32 to vector<9x9x128xi32>
    %96 = arith.cmpi sle, %7, %95 : vector<9x9x128xi32>
    %97 = arith.andi %94, %96 : vector<9x9x128xi1>
    %cst_29 = arith.constant 0.000000e+00 : f32
    %98 = vector.broadcast %cst_29 : f32 to vector<9x9x128xf32>
    %99 = arith.select %97, %86, %98 : vector<9x9x128xi1>, vector<9x9x128xf32>
    %cst_30 = arith.constant 0.000000e+00 : f32
    %100 = vector.broadcast %cst_30 : f32 to vector<64x128xf32>
    %101 = vector.extract_strided_slice %30 {offsets = [0, 0, 0], sizes = [8, 8, 128], strides = [1, 1, 1]} : vector<9x9x128xf32> to vector<8x8x128xf32>
    %102 = vector.shape_cast %101 : vector<8x8x128xf32> to vector<64x128xf32>
    %103 = arith.truncf %102 : vector<64x128xf32> to vector<64x128xbf16>
    %c0_31 = arith.constant 0 : index
    %c0_32 = arith.constant 0 : index
    %c0_33 = arith.constant 0 : index
    %104 = vector.load %arg5[%c0_31, %c0_32, %c0_33] : memref<9x128x128xbf16, #tpu.memory_space<vmem>>, vector<1x128x128xbf16>
    %105 = vector.shape_cast %104 : vector<1x128x128xbf16> to vector<128x128xbf16>
    %cst_34 = arith.constant dense<0.000000e+00> : vector<64x128xf32>
    %106 = tpu.matmul %103, %105, %cst_34 {dimension_numbers = #tpu.dot_dimension_numbers<[1], [0], [0], [1], [0, 0, 1, 1], [], []>} : vector<64x128xbf16>, vector<128x128xbf16>, vector<64x128xf32> -> vector<64x128xf32>
    %107 = arith.addf %100, %106 : vector<64x128xf32>
    %108 = vector.extract_strided_slice %53 {offsets = [0, 0, 0], sizes = [8, 8, 128], strides = [1, 1, 1]} : vector<9x9x128xf32> to vector<8x8x128xf32>
    %109 = vector.shape_cast %108 : vector<8x8x128xf32> to vector<64x128xf32>
    %110 = arith.truncf %109 : vector<64x128xf32> to vector<64x128xbf16>
    %c1 = arith.constant 1 : index
    %c0_35 = arith.constant 0 : index
    %c0_36 = arith.constant 0 : index
    %111 = vector.load %arg5[%c1, %c0_35, %c0_36] : memref<9x128x128xbf16, #tpu.memory_space<vmem>>, vector<1x128x128xbf16>
    %112 = vector.shape_cast %111 : vector<1x128x128xbf16> to vector<128x128xbf16>
    %cst_37 = arith.constant dense<0.000000e+00> : vector<64x128xf32>
    %113 = tpu.matmul %110, %112, %cst_37 {dimension_numbers = #tpu.dot_dimension_numbers<[1], [0], [0], [1], [0, 0, 1, 1], [], []>} : vector<64x128xbf16>, vector<128x128xbf16>, vector<64x128xf32> -> vector<64x128xf32>
    %114 = arith.addf %107, %113 : vector<64x128xf32>
    %115 = vector.extract_strided_slice %30 {offsets = [0, 1, 0], sizes = [8, 8, 128], strides = [1, 1, 1]} : vector<9x9x128xf32> to vector<8x8x128xf32>
    %116 = vector.shape_cast %115 : vector<8x8x128xf32> to vector<64x128xf32>
    %117 = arith.truncf %116 : vector<64x128xf32> to vector<64x128xbf16>
    %c2 = arith.constant 2 : index
    %c0_38 = arith.constant 0 : index
    %c0_39 = arith.constant 0 : index
    %118 = vector.load %arg5[%c2, %c0_38, %c0_39] : memref<9x128x128xbf16, #tpu.memory_space<vmem>>, vector<1x128x128xbf16>
    %119 = vector.shape_cast %118 : vector<1x128x128xbf16> to vector<128x128xbf16>
    %cst_40 = arith.constant dense<0.000000e+00> : vector<64x128xf32>
    %120 = tpu.matmul %117, %119, %cst_40 {dimension_numbers = #tpu.dot_dimension_numbers<[1], [0], [0], [1], [0, 0, 1, 1], [], []>} : vector<64x128xbf16>, vector<128x128xbf16>, vector<64x128xf32> -> vector<64x128xf32>
    %121 = arith.addf %114, %120 : vector<64x128xf32>
    %122 = vector.extract_strided_slice %76 {offsets = [0, 0, 0], sizes = [8, 8, 128], strides = [1, 1, 1]} : vector<9x9x128xf32> to vector<8x8x128xf32>
    %123 = vector.shape_cast %122 : vector<8x8x128xf32> to vector<64x128xf32>
    %124 = arith.truncf %123 : vector<64x128xf32> to vector<64x128xbf16>
    %c3 = arith.constant 3 : index
    %c0_41 = arith.constant 0 : index
    %c0_42 = arith.constant 0 : index
    %125 = vector.load %arg5[%c3, %c0_41, %c0_42] : memref<9x128x128xbf16, #tpu.memory_space<vmem>>, vector<1x128x128xbf16>
    %126 = vector.shape_cast %125 : vector<1x128x128xbf16> to vector<128x128xbf16>
    %cst_43 = arith.constant dense<0.000000e+00> : vector<64x128xf32>
    %127 = tpu.matmul %124, %126, %cst_43 {dimension_numbers = #tpu.dot_dimension_numbers<[1], [0], [0], [1], [0, 0, 1, 1], [], []>} : vector<64x128xbf16>, vector<128x128xbf16>, vector<64x128xf32> -> vector<64x128xf32>
    %128 = arith.addf %121, %127 : vector<64x128xf32>
    %129 = vector.extract_strided_slice %99 {offsets = [0, 0, 0], sizes = [8, 8, 128], strides = [1, 1, 1]} : vector<9x9x128xf32> to vector<8x8x128xf32>
    %130 = vector.shape_cast %129 : vector<8x8x128xf32> to vector<64x128xf32>
    %131 = arith.truncf %130 : vector<64x128xf32> to vector<64x128xbf16>
    %c4 = arith.constant 4 : index
    %c0_44 = arith.constant 0 : index
    %c0_45 = arith.constant 0 : index
    %132 = vector.load %arg5[%c4, %c0_44, %c0_45] : memref<9x128x128xbf16, #tpu.memory_space<vmem>>, vector<1x128x128xbf16>
    %133 = vector.shape_cast %132 : vector<1x128x128xbf16> to vector<128x128xbf16>
    %cst_46 = arith.constant dense<0.000000e+00> : vector<64x128xf32>
    %134 = tpu.matmul %131, %133, %cst_46 {dimension_numbers = #tpu.dot_dimension_numbers<[1], [0], [0], [1], [0, 0, 1, 1], [], []>} : vector<64x128xbf16>, vector<128x128xbf16>, vector<64x128xf32> -> vector<64x128xf32>
    %135 = arith.addf %128, %134 : vector<64x128xf32>
    %136 = vector.extract_strided_slice %76 {offsets = [0, 1, 0], sizes = [8, 8, 128], strides = [1, 1, 1]} : vector<9x9x128xf32> to vector<8x8x128xf32>
    %137 = vector.shape_cast %136 : vector<8x8x128xf32> to vector<64x128xf32>
    %138 = arith.truncf %137 : vector<64x128xf32> to vector<64x128xbf16>
    %c5 = arith.constant 5 : index
    %c0_47 = arith.constant 0 : index
    %c0_48 = arith.constant 0 : index
    %139 = vector.load %arg5[%c5, %c0_47, %c0_48] : memref<9x128x128xbf16, #tpu.memory_space<vmem>>, vector<1x128x128xbf16>
    %140 = vector.shape_cast %139 : vector<1x128x128xbf16> to vector<128x128xbf16>
    %cst_49 = arith.constant dense<0.000000e+00> : vector<64x128xf32>
    %141 = tpu.matmul %138, %140, %cst_49 {dimension_numbers = #tpu.dot_dimension_numbers<[1], [0], [0], [1], [0, 0, 1, 1], [], []>} : vector<64x128xbf16>, vector<128x128xbf16>, vector<64x128xf32> -> vector<64x128xf32>
    %142 = arith.addf %135, %141 : vector<64x128xf32>
    %143 = vector.extract_strided_slice %30 {offsets = [1, 0, 0], sizes = [8, 8, 128], strides = [1, 1, 1]} : vector<9x9x128xf32> to vector<8x8x128xf32>
    %144 = vector.shape_cast %143 : vector<8x8x128xf32> to vector<64x128xf32>
    %145 = arith.truncf %144 : vector<64x128xf32> to vector<64x128xbf16>
    %c6 = arith.constant 6 : index
    %c0_50 = arith.constant 0 : index
    %c0_51 = arith.constant 0 : index
    %146 = vector.load %arg5[%c6, %c0_50, %c0_51] : memref<9x128x128xbf16, #tpu.memory_space<vmem>>, vector<1x128x128xbf16>
    %147 = vector.shape_cast %146 : vector<1x128x128xbf16> to vector<128x128xbf16>
    %cst_52 = arith.constant dense<0.000000e+00> : vector<64x128xf32>
    %148 = tpu.matmul %145, %147, %cst_52 {dimension_numbers = #tpu.dot_dimension_numbers<[1], [0], [0], [1], [0, 0, 1, 1], [], []>} : vector<64x128xbf16>, vector<128x128xbf16>, vector<64x128xf32> -> vector<64x128xf32>
    %149 = arith.addf %142, %148 : vector<64x128xf32>
    %150 = vector.extract_strided_slice %53 {offsets = [1, 0, 0], sizes = [8, 8, 128], strides = [1, 1, 1]} : vector<9x9x128xf32> to vector<8x8x128xf32>
    %151 = vector.shape_cast %150 : vector<8x8x128xf32> to vector<64x128xf32>
    %152 = arith.truncf %151 : vector<64x128xf32> to vector<64x128xbf16>
    %c7 = arith.constant 7 : index
    %c0_53 = arith.constant 0 : index
    %c0_54 = arith.constant 0 : index
    %153 = vector.load %arg5[%c7, %c0_53, %c0_54] : memref<9x128x128xbf16, #tpu.memory_space<vmem>>, vector<1x128x128xbf16>
    %154 = vector.shape_cast %153 : vector<1x128x128xbf16> to vector<128x128xbf16>
    %cst_55 = arith.constant dense<0.000000e+00> : vector<64x128xf32>
    %155 = tpu.matmul %152, %154, %cst_55 {dimension_numbers = #tpu.dot_dimension_numbers<[1], [0], [0], [1], [0, 0, 1, 1], [], []>} : vector<64x128xbf16>, vector<128x128xbf16>, vector<64x128xf32> -> vector<64x128xf32>
    %156 = arith.addf %149, %155 : vector<64x128xf32>
    %157 = vector.extract_strided_slice %30 {offsets = [1, 1, 0], sizes = [8, 8, 128], strides = [1, 1, 1]} : vector<9x9x128xf32> to vector<8x8x128xf32>
    %158 = vector.shape_cast %157 : vector<8x8x128xf32> to vector<64x128xf32>
    %159 = arith.truncf %158 : vector<64x128xf32> to vector<64x128xbf16>
    %c8 = arith.constant 8 : index
    %c0_56 = arith.constant 0 : index
    %c0_57 = arith.constant 0 : index
    %160 = vector.load %arg5[%c8, %c0_56, %c0_57] : memref<9x128x128xbf16, #tpu.memory_space<vmem>>, vector<1x128x128xbf16>
    %161 = vector.shape_cast %160 : vector<1x128x128xbf16> to vector<128x128xbf16>
    %cst_58 = arith.constant dense<0.000000e+00> : vector<64x128xf32>
    %162 = tpu.matmul %159, %161, %cst_58 {dimension_numbers = #tpu.dot_dimension_numbers<[1], [0], [0], [1], [0, 0, 1, 1], [], []>} : vector<64x128xbf16>, vector<128x128xbf16>, vector<64x128xf32> -> vector<64x128xf32>
    %163 = arith.addf %156, %162 : vector<64x128xf32>
    %cst_59 = arith.constant dense<0.000000e+00> : vector<128xf32>
    %164 = vector.multi_reduction <add>, %163, %cst_59 [0] : vector<64x128xf32> to vector<128xf32>
    %165 = vector.shape_cast %164 : vector<128xf32> to vector<1x128xf32>
    %cst_60 = arith.constant 6.400000e+01 : f32
    %166 = vector.broadcast %cst_60 : f32 to vector<1x128xf32>
    %167 = arith.divf %165, %166 : vector<1x128xf32>
    %168 = arith.mulf %163, %163 : vector<64x128xf32>
    %cst_61 = arith.constant dense<0.000000e+00> : vector<128xf32>
    %169 = vector.multi_reduction <add>, %168, %cst_61 [0] : vector<64x128xf32> to vector<128xf32>
    %170 = vector.shape_cast %169 : vector<128xf32> to vector<1x128xf32>
    %cst_62 = arith.constant 6.400000e+01 : f32
    %171 = vector.broadcast %cst_62 : f32 to vector<1x128xf32>
    %172 = arith.divf %170, %171 : vector<1x128xf32>
    %173 = arith.mulf %167, %167 : vector<1x128xf32>
    %174 = arith.subf %172, %173 : vector<1x128xf32>
    %cst_63 = arith.constant 0.000000e+00 : f32
    %175 = vector.broadcast %cst_63 : f32 to vector<1x128xf32>
    %176 = arith.maximumf %174, %175 : vector<1x128xf32>
    %177 = vector.broadcast %167 : vector<1x128xf32> to vector<64x128xf32>
    %178 = arith.subf %163, %177 : vector<64x128xf32>
    %cst_64 = arith.constant 9.99999974E-6 : f32
    %179 = vector.broadcast %cst_64 : f32 to vector<1x128xf32>
    %180 = arith.addf %176, %179 : vector<1x128xf32>
    %181 = math.rsqrt %180 : vector<1x128xf32>
    %182 = vector.broadcast %181 : vector<1x128xf32> to vector<64x128xf32>
    %183 = arith.mulf %178, %182 : vector<64x128xf32>
    %c0_65 = arith.constant 0 : index
    %c0_66 = arith.constant 0 : index
    %184 = vector.load %arg6[%c0_65, %c0_66] : memref<1x128xf32, #tpu.memory_space<vmem>>, vector<1x128xf32>
    %185 = vector.broadcast %184 : vector<1x128xf32> to vector<64x128xf32>
    %186 = arith.mulf %183, %185 : vector<64x128xf32>
    %c0_67 = arith.constant 0 : index
    %c0_68 = arith.constant 0 : index
    %187 = vector.load %arg7[%c0_67, %c0_68] : memref<1x128xf32, #tpu.memory_space<vmem>>, vector<1x128xf32>
    %188 = vector.broadcast %187 : vector<1x128xf32> to vector<64x128xf32>
    %189 = arith.addf %186, %188 : vector<64x128xf32>
    %c0_69 = arith.constant 0 : index
    %c0_70 = arith.constant 0 : index
    %190 = vector.load %arg8[%c0_69, %c0_70] : memref<1x128xf32, #tpu.memory_space<vmem>>, vector<1x128xf32>
    %191 = vector.broadcast %190 : vector<1x128xf32> to vector<64x128xf32>
    %192 = arith.mulf %163, %191 : vector<64x128xf32>
    %193 = arith.addf %189, %192 : vector<64x128xf32>
    %c0_71 = arith.constant 0 : index
    %c0_72 = arith.constant 0 : index
    %194 = vector.load %arg9[%c0_71, %c0_72] : memref<1x128xf32, #tpu.memory_space<vmem>>, vector<1x128xf32>
    %195 = vector.broadcast %194 : vector<1x128xf32> to vector<64x128xf32>
    %196 = arith.addf %193, %195 : vector<64x128xf32>
    %cst_73 = arith.constant 0.000000e+00 : f32
    %197 = vector.broadcast %cst_73 : f32 to vector<64x128xf32>
    %198 = arith.cmpf oge, %196, %197 : vector<64x128xf32>
    %cst_74 = arith.constant 1.000000e-01 : f32
    %199 = vector.broadcast %cst_74 : f32 to vector<64x128xf32>
    %200 = arith.mulf %199, %196 : vector<64x128xf32>
    %201 = arith.select %198, %196, %200 : vector<64x128xi1>, vector<64x128xf32>
    %202 = arith.truncf %201 : vector<64x128xf32> to vector<64x128xbf16>
    %c0_75 = arith.constant 0 : index
    %c0_76 = arith.constant 0 : index
    %c0_77 = arith.constant 0 : index
    %203 = vector.load %arg10[%c0_75, %c0_76, %c0_77] : memref<1x64x128xbf16, #tpu.memory_space<vmem>>, vector<1x64x128xbf16>
    %204 = vector.shape_cast %203 : vector<1x64x128xbf16> to vector<64x128xbf16>
    %205 = vector.shape_cast %202 : vector<64x128xbf16> to vector<1x64x128xbf16>
    tpu.vector_store %arg10[%c0_75, %c0_76, %c0_77], %205 {strides = array<i32>} : memref<1x64x128xbf16, #tpu.memory_space<vmem>>, vector<1x64x128xbf16>,
    return
  }
  func.func @transform_0(%arg0: i32, %arg1: i32) -> (i32, i32, i32, i32) {
    %c0_i32 = arith.constant 0 : i32
    %c0_i32_0 = arith.constant 0 : i32
    %c0_i32_1 = arith.constant 0 : i32
    %c0_i32_2 = arith.constant 0 : i32
    return %arg0, %c0_i32, %c0_i32_0, %c0_i32_1 : i32, i32, i32, i32
  }
  func.func @transform_1(%arg0: i32, %arg1: i32) -> (i32, i32) {
    %c0_i32 = arith.constant 0 : i32
    %c0_i32_0 = arith.constant 0 : i32
    %c0_i32_1 = arith.constant 0 : i32
    return %c0_i32, %c0_i32_0 : i32, i32
  }
  func.func @transform_2(%arg0: i32, %arg1: i32) -> (i32, i32) {
    %c0_i32 = arith.constant 0 : i32
    %c0_i32_0 = arith.constant 0 : i32
    %c0_i32_1 = arith.constant 0 : i32
    return %c0_i32, %c0_i32_0 : i32, i32
  }
  func.func @transform_3(%arg0: i32, %arg1: i32) -> (i32, i32, i32) {
    %c0_i32 = arith.constant 0 : i32
    %c0_i32_0 = arith.constant 0 : i32
    %c0_i32_1 = arith.constant 0 : i32
    return %c0_i32, %c0_i32_0, %arg1 : i32, i32, i32
  }
  func.func @transform_4(%arg0: i32, %arg1: i32) -> (i32, i32) {
    %c0_i32 = arith.constant 0 : i32
    %c0_i32_0 = arith.constant 0 : i32
    return %c0_i32, %arg1 : i32, i32
  }
  func.func @transform_5(%arg0: i32, %arg1: i32) -> (i32, i32) {
    %c0_i32 = arith.constant 0 : i32
    %c0_i32_0 = arith.constant 0 : i32
    return %c0_i32, %arg1 : i32, i32
  }
  func.func @transform_6(%arg0: i32, %arg1: i32) -> (i32, i32) {
    %c0_i32 = arith.constant 0 : i32
    %c0_i32_0 = arith.constant 0 : i32
    return %c0_i32, %arg1 : i32, i32
  }
  func.func @transform_7(%arg0: i32, %arg1: i32) -> (i32, i32) {
    %c0_i32 = arith.constant 0 : i32
    %c0_i32_0 = arith.constant 0 : i32
    return %c0_i32, %arg1 : i32, i32
  }
  func.func @transform_8(%arg0: i32, %arg1: i32) -> (i32, i32, i32) {
    %c0_i32 = arith.constant 0 : i32
    %c0_i32_0 = arith.constant 0 : i32
    return %arg0, %c0_i32, %arg1 : i32, i32, i32
  }
}

module attributes {stable_mosaic.version = 11 : i64} {
  func.func @kernel(%arg0: i32, %arg1: i32, %arg2: memref<1x10x10x128xbf16, #tpu.memory_space<vmem>>, %arg3: memref<9x128x128xbf16, #tpu.memory_space<vmem>>, %arg4: memref<1x64x128xf32, #tpu.memory_space<vmem>>, %arg5: memref<128x128xbf16, #tpu.memory_space<vmem>>, %arg6: memref<1x128xf32, #tpu.memory_space<vmem>>, %arg7: memref<1x128xf32, #tpu.memory_space<vmem>>, %arg8: memref<1x64x128xf32, #tpu.memory_space<vmem>>) attributes {dimension_semantics = [#tpu.dimension_semantics<parallel>, #tpu.dimension_semantics<parallel>], iteration_bounds = array<i64: 2, 1>, scalar_prefetch = 0 : i64, scratch_operands = 0 : i64, tpu.core_type = #tpu.core_type<tc>, window_params = [{transform_indices = @transform_0, window_bounds = array<i64: 1, 10, 10, 128>}, {transform_indices = @transform_1, window_bounds = array<i64: 9, 128, 128>}, {transform_indices = @transform_2, window_bounds = array<i64: 1, 64, 128>}, {transform_indices = @transform_3, window_bounds = array<i64: 128, 128>}, {pipeline_mode = #tpu.pipeline_mode<synchronous>, transform_indices = @transform_4, window_bounds = array<i64: 1, 128>}, {pipeline_mode = #tpu.pipeline_mode<synchronous>, transform_indices = @transform_5, window_bounds = array<i64: 1, 128>}, {transform_indices = @transform_6, window_bounds = array<i64: 1, 64, 128>}]} {
    %c0 = arith.constant 0 : index
    %c0_0 = arith.constant 0 : index
    %c0_1 = arith.constant 0 : index
    %c0_2 = arith.constant 0 : index
    %0 = vector.load %arg2[%c0, %c0_0, %c0_1, %c0_2] : memref<1x10x10x128xbf16, #tpu.memory_space<vmem>>, vector<1x10x10x128xbf16>
    %1 = vector.shape_cast %0 : vector<1x10x10x128xbf16> to vector<10x10x128xbf16>
    %2 = arith.extf %1 : vector<10x10x128xbf16> to vector<10x10x128xf32>
    %cst = arith.constant 0.000000e+00 : f32
    %3 = vector.broadcast %cst : f32 to vector<64x128xf32>
    %4 = vector.extract_strided_slice %2 {offsets = [0, 0, 0], sizes = [8, 8, 128], strides = [1, 1, 1]} : vector<10x10x128xf32> to vector<8x8x128xf32>
    %5 = vector.shape_cast %4 : vector<8x8x128xf32> to vector<64x128xf32>
    %6 = arith.truncf %5 : vector<64x128xf32> to vector<64x128xbf16>
    %c0_3 = arith.constant 0 : index
    %c0_4 = arith.constant 0 : index
    %c0_5 = arith.constant 0 : index
    %7 = vector.load %arg3[%c0_3, %c0_4, %c0_5] : memref<9x128x128xbf16, #tpu.memory_space<vmem>>, vector<1x128x128xbf16>
    %8 = vector.shape_cast %7 : vector<1x128x128xbf16> to vector<128x128xbf16>
    %cst_6 = arith.constant dense<0.000000e+00> : vector<64x128xf32>
    %9 = tpu.matmul %6, %8, %cst_6 {dimension_numbers = #tpu.dot_dimension_numbers<[1], [0], [0], [1], [0, 0, 1, 1], [], []>} : vector<64x128xbf16>, vector<128x128xbf16>, vector<64x128xf32> -> vector<64x128xf32>
    %10 = arith.addf %3, %9 : vector<64x128xf32>
    %11 = vector.extract_strided_slice %2 {offsets = [0, 1, 0], sizes = [8, 8, 128], strides = [1, 1, 1]} : vector<10x10x128xf32> to vector<8x8x128xf32>
    %12 = vector.shape_cast %11 : vector<8x8x128xf32> to vector<64x128xf32>
    %13 = arith.truncf %12 : vector<64x128xf32> to vector<64x128xbf16>
    %c1 = arith.constant 1 : index
    %c0_7 = arith.constant 0 : index
    %c0_8 = arith.constant 0 : index
    %14 = vector.load %arg3[%c1, %c0_7, %c0_8] : memref<9x128x128xbf16, #tpu.memory_space<vmem>>, vector<1x128x128xbf16>
    %15 = vector.shape_cast %14 : vector<1x128x128xbf16> to vector<128x128xbf16>
    %cst_9 = arith.constant dense<0.000000e+00> : vector<64x128xf32>
    %16 = tpu.matmul %13, %15, %cst_9 {dimension_numbers = #tpu.dot_dimension_numbers<[1], [0], [0], [1], [0, 0, 1, 1], [], []>} : vector<64x128xbf16>, vector<128x128xbf16>, vector<64x128xf32> -> vector<64x128xf32>
    %17 = arith.addf %10, %16 : vector<64x128xf32>
    %18 = vector.extract_strided_slice %2 {offsets = [0, 2, 0], sizes = [8, 8, 128], strides = [1, 1, 1]} : vector<10x10x128xf32> to vector<8x8x128xf32>
    %19 = vector.shape_cast %18 : vector<8x8x128xf32> to vector<64x128xf32>
    %20 = arith.truncf %19 : vector<64x128xf32> to vector<64x128xbf16>
    %c2 = arith.constant 2 : index
    %c0_10 = arith.constant 0 : index
    %c0_11 = arith.constant 0 : index
    %21 = vector.load %arg3[%c2, %c0_10, %c0_11] : memref<9x128x128xbf16, #tpu.memory_space<vmem>>, vector<1x128x128xbf16>
    %22 = vector.shape_cast %21 : vector<1x128x128xbf16> to vector<128x128xbf16>
    %cst_12 = arith.constant dense<0.000000e+00> : vector<64x128xf32>
    %23 = tpu.matmul %20, %22, %cst_12 {dimension_numbers = #tpu.dot_dimension_numbers<[1], [0], [0], [1], [0, 0, 1, 1], [], []>} : vector<64x128xbf16>, vector<128x128xbf16>, vector<64x128xf32> -> vector<64x128xf32>
    %24 = arith.addf %17, %23 : vector<64x128xf32>
    %25 = vector.extract_strided_slice %2 {offsets = [1, 0, 0], sizes = [8, 8, 128], strides = [1, 1, 1]} : vector<10x10x128xf32> to vector<8x8x128xf32>
    %26 = vector.shape_cast %25 : vector<8x8x128xf32> to vector<64x128xf32>
    %27 = arith.truncf %26 : vector<64x128xf32> to vector<64x128xbf16>
    %c3 = arith.constant 3 : index
    %c0_13 = arith.constant 0 : index
    %c0_14 = arith.constant 0 : index
    %28 = vector.load %arg3[%c3, %c0_13, %c0_14] : memref<9x128x128xbf16, #tpu.memory_space<vmem>>, vector<1x128x128xbf16>
    %29 = vector.shape_cast %28 : vector<1x128x128xbf16> to vector<128x128xbf16>
    %cst_15 = arith.constant dense<0.000000e+00> : vector<64x128xf32>
    %30 = tpu.matmul %27, %29, %cst_15 {dimension_numbers = #tpu.dot_dimension_numbers<[1], [0], [0], [1], [0, 0, 1, 1], [], []>} : vector<64x128xbf16>, vector<128x128xbf16>, vector<64x128xf32> -> vector<64x128xf32>
    %31 = arith.addf %24, %30 : vector<64x128xf32>
    %32 = vector.extract_strided_slice %2 {offsets = [1, 1, 0], sizes = [8, 8, 128], strides = [1, 1, 1]} : vector<10x10x128xf32> to vector<8x8x128xf32>
    %33 = vector.shape_cast %32 : vector<8x8x128xf32> to vector<64x128xf32>
    %34 = arith.truncf %33 : vector<64x128xf32> to vector<64x128xbf16>
    %c4 = arith.constant 4 : index
    %c0_16 = arith.constant 0 : index
    %c0_17 = arith.constant 0 : index
    %35 = vector.load %arg3[%c4, %c0_16, %c0_17] : memref<9x128x128xbf16, #tpu.memory_space<vmem>>, vector<1x128x128xbf16>
    %36 = vector.shape_cast %35 : vector<1x128x128xbf16> to vector<128x128xbf16>
    %cst_18 = arith.constant dense<0.000000e+00> : vector<64x128xf32>
    %37 = tpu.matmul %34, %36, %cst_18 {dimension_numbers = #tpu.dot_dimension_numbers<[1], [0], [0], [1], [0, 0, 1, 1], [], []>} : vector<64x128xbf16>, vector<128x128xbf16>, vector<64x128xf32> -> vector<64x128xf32>
    %38 = arith.addf %31, %37 : vector<64x128xf32>
    %39 = vector.extract_strided_slice %2 {offsets = [1, 2, 0], sizes = [8, 8, 128], strides = [1, 1, 1]} : vector<10x10x128xf32> to vector<8x8x128xf32>
    %40 = vector.shape_cast %39 : vector<8x8x128xf32> to vector<64x128xf32>
    %41 = arith.truncf %40 : vector<64x128xf32> to vector<64x128xbf16>
    %c5 = arith.constant 5 : index
    %c0_19 = arith.constant 0 : index
    %c0_20 = arith.constant 0 : index
    %42 = vector.load %arg3[%c5, %c0_19, %c0_20] : memref<9x128x128xbf16, #tpu.memory_space<vmem>>, vector<1x128x128xbf16>
    %43 = vector.shape_cast %42 : vector<1x128x128xbf16> to vector<128x128xbf16>
    %cst_21 = arith.constant dense<0.000000e+00> : vector<64x128xf32>
    %44 = tpu.matmul %41, %43, %cst_21 {dimension_numbers = #tpu.dot_dimension_numbers<[1], [0], [0], [1], [0, 0, 1, 1], [], []>} : vector<64x128xbf16>, vector<128x128xbf16>, vector<64x128xf32> -> vector<64x128xf32>
    %45 = arith.addf %38, %44 : vector<64x128xf32>
    %46 = vector.extract_strided_slice %2 {offsets = [2, 0, 0], sizes = [8, 8, 128], strides = [1, 1, 1]} : vector<10x10x128xf32> to vector<8x8x128xf32>
    %47 = vector.shape_cast %46 : vector<8x8x128xf32> to vector<64x128xf32>
    %48 = arith.truncf %47 : vector<64x128xf32> to vector<64x128xbf16>
    %c6 = arith.constant 6 : index
    %c0_22 = arith.constant 0 : index
    %c0_23 = arith.constant 0 : index
    %49 = vector.load %arg3[%c6, %c0_22, %c0_23] : memref<9x128x128xbf16, #tpu.memory_space<vmem>>, vector<1x128x128xbf16>
    %50 = vector.shape_cast %49 : vector<1x128x128xbf16> to vector<128x128xbf16>
    %cst_24 = arith.constant dense<0.000000e+00> : vector<64x128xf32>
    %51 = tpu.matmul %48, %50, %cst_24 {dimension_numbers = #tpu.dot_dimension_numbers<[1], [0], [0], [1], [0, 0, 1, 1], [], []>} : vector<64x128xbf16>, vector<128x128xbf16>, vector<64x128xf32> -> vector<64x128xf32>
    %52 = arith.addf %45, %51 : vector<64x128xf32>
    %53 = vector.extract_strided_slice %2 {offsets = [2, 1, 0], sizes = [8, 8, 128], strides = [1, 1, 1]} : vector<10x10x128xf32> to vector<8x8x128xf32>
    %54 = vector.shape_cast %53 : vector<8x8x128xf32> to vector<64x128xf32>
    %55 = arith.truncf %54 : vector<64x128xf32> to vector<64x128xbf16>
    %c7 = arith.constant 7 : index
    %c0_25 = arith.constant 0 : index
    %c0_26 = arith.constant 0 : index
    %56 = vector.load %arg3[%c7, %c0_25, %c0_26] : memref<9x128x128xbf16, #tpu.memory_space<vmem>>, vector<1x128x128xbf16>
    %57 = vector.shape_cast %56 : vector<1x128x128xbf16> to vector<128x128xbf16>
    %cst_27 = arith.constant dense<0.000000e+00> : vector<64x128xf32>
    %58 = tpu.matmul %55, %57, %cst_27 {dimension_numbers = #tpu.dot_dimension_numbers<[1], [0], [0], [1], [0, 0, 1, 1], [], []>} : vector<64x128xbf16>, vector<128x128xbf16>, vector<64x128xf32> -> vector<64x128xf32>
    %59 = arith.addf %52, %58 : vector<64x128xf32>
    %60 = vector.extract_strided_slice %2 {offsets = [2, 2, 0], sizes = [8, 8, 128], strides = [1, 1, 1]} : vector<10x10x128xf32> to vector<8x8x128xf32>
    %61 = vector.shape_cast %60 : vector<8x8x128xf32> to vector<64x128xf32>
    %62 = arith.truncf %61 : vector<64x128xf32> to vector<64x128xbf16>
    %c8 = arith.constant 8 : index
    %c0_28 = arith.constant 0 : index
    %c0_29 = arith.constant 0 : index
    %63 = vector.load %arg3[%c8, %c0_28, %c0_29] : memref<9x128x128xbf16, #tpu.memory_space<vmem>>, vector<1x128x128xbf16>
    %64 = vector.shape_cast %63 : vector<1x128x128xbf16> to vector<128x128xbf16>
    %cst_30 = arith.constant dense<0.000000e+00> : vector<64x128xf32>
    %65 = tpu.matmul %62, %64, %cst_30 {dimension_numbers = #tpu.dot_dimension_numbers<[1], [0], [0], [1], [0, 0, 1, 1], [], []>} : vector<64x128xbf16>, vector<128x128xbf16>, vector<64x128xf32> -> vector<64x128xf32>
    %66 = arith.addf %59, %65 : vector<64x128xf32>
    %c0_31 = arith.constant 0 : index
    %c0_32 = arith.constant 0 : index
    %c0_33 = arith.constant 0 : index
    %67 = vector.load %arg4[%c0_31, %c0_32, %c0_33] : memref<1x64x128xf32, #tpu.memory_space<vmem>>, vector<1x64x128xf32>
    %68 = vector.shape_cast %67 : vector<1x64x128xf32> to vector<64x128xf32>
    %c0_34 = arith.constant 0 : index
    %c0_35 = arith.constant 0 : index
    %69 = vector.load %arg6[%c0_34, %c0_35] : memref<1x128xf32, #tpu.memory_space<vmem>>, vector<1x128xf32>
    %70 = vector.broadcast %69 : vector<1x128xf32> to vector<64x128xf32>
    %71 = arith.mulf %68, %70 : vector<64x128xf32>
    %c0_36 = arith.constant 0 : index
    %c0_37 = arith.constant 0 : index
    %72 = vector.load %arg7[%c0_36, %c0_37] : memref<1x128xf32, #tpu.memory_space<vmem>>, vector<1x128xf32>
    %73 = vector.broadcast %72 : vector<1x128xf32> to vector<64x128xf32>
    %74 = arith.addf %71, %73 : vector<64x128xf32>
    %cst_38 = arith.constant 0.000000e+00 : f32
    %75 = vector.broadcast %cst_38 : f32 to vector<64x128xf32>
    %76 = arith.cmpf oge, %74, %75 : vector<64x128xf32>
    %cst_39 = arith.constant 1.000000e-01 : f32
    %77 = vector.broadcast %cst_39 : f32 to vector<64x128xf32>
    %78 = arith.mulf %77, %74 : vector<64x128xf32>
    %79 = arith.select %76, %74, %78 : vector<64x128xi1>, vector<64x128xf32>
    %80 = arith.truncf %79 : vector<64x128xf32> to vector<64x128xbf16>
    %c0_40 = arith.constant 0 : index
    %c0_41 = arith.constant 0 : index
    %81 = vector.load %arg5[%c0_40, %c0_41] : memref<128x128xbf16, #tpu.memory_space<vmem>>, vector<128x128xbf16>
    %cst_42 = arith.constant dense<0.000000e+00> : vector<64x128xf32>
    %82 = tpu.matmul %80, %81, %cst_42 {dimension_numbers = #tpu.dot_dimension_numbers<[1], [0], [0], [1], [0, 0, 1, 1], [], []>} : vector<64x128xbf16>, vector<128x128xbf16>, vector<64x128xf32> -> vector<64x128xf32>
    %83 = arith.addf %66, %82 : vector<64x128xf32>
    %c0_43 = arith.constant 0 : index
    %c0_44 = arith.constant 0 : index
    %c0_45 = arith.constant 0 : index
    %84 = vector.load %arg8[%c0_43, %c0_44, %c0_45] : memref<1x64x128xf32, #tpu.memory_space<vmem>>, vector<1x64x128xf32>
    %85 = vector.shape_cast %84 : vector<1x64x128xf32> to vector<64x128xf32>
    %86 = vector.shape_cast %83 : vector<64x128xf32> to vector<1x64x128xf32>
    tpu.vector_store %arg8[%c0_43, %c0_44, %c0_45], %86 {strides = array<i32>} : memref<1x64x128xf32, #tpu.memory_space<vmem>>, vector<1x64x128xf32>,
    return
  }
  func.func @transform_0(%arg0: i32, %arg1: i32) -> (i32, i32, i32, i32) {
    %c0_i32 = arith.constant 0 : i32
    %c0_i32_0 = arith.constant 0 : i32
    %c0_i32_1 = arith.constant 0 : i32
    %c0_i32_2 = arith.constant 0 : i32
    return %arg0, %c0_i32, %c0_i32_0, %c0_i32_1 : i32, i32, i32, i32
  }
  func.func @transform_1(%arg0: i32, %arg1: i32) -> (i32, i32, i32) {
    %c0_i32 = arith.constant 0 : i32
    %c0_i32_0 = arith.constant 0 : i32
    %c0_i32_1 = arith.constant 0 : i32
    return %c0_i32, %c0_i32_0, %arg1 : i32, i32, i32
  }
  func.func @transform_2(%arg0: i32, %arg1: i32) -> (i32, i32, i32) {
    %c0_i32 = arith.constant 0 : i32
    %c0_i32_0 = arith.constant 0 : i32
    %c0_i32_1 = arith.constant 0 : i32
    return %arg0, %c0_i32, %c0_i32_0 : i32, i32, i32
  }
  func.func @transform_3(%arg0: i32, %arg1: i32) -> (i32, i32) {
    %c0_i32 = arith.constant 0 : i32
    %c0_i32_0 = arith.constant 0 : i32
    return %c0_i32, %arg1 : i32, i32
  }
  func.func @transform_4(%arg0: i32, %arg1: i32) -> (i32, i32) {
    %c0_i32 = arith.constant 0 : i32
    %c0_i32_0 = arith.constant 0 : i32
    %c0_i32_1 = arith.constant 0 : i32
    return %c0_i32, %c0_i32_0 : i32, i32
  }
  func.func @transform_5(%arg0: i32, %arg1: i32) -> (i32, i32) {
    %c0_i32 = arith.constant 0 : i32
    %c0_i32_0 = arith.constant 0 : i32
    %c0_i32_1 = arith.constant 0 : i32
    return %c0_i32, %c0_i32_0 : i32, i32
  }
  func.func @transform_6(%arg0: i32, %arg1: i32) -> (i32, i32, i32) {
    %c0_i32 = arith.constant 0 : i32
    %c0_i32_0 = arith.constant 0 : i32
    return %arg0, %c0_i32, %arg1 : i32, i32, i32
  }
}

</mosaic_0001>

<bundles_post_ra>
// kernel: basic_block_forward.2
= control target key start
LH: loop header
LB: loop body
LE: loop exit
PB: predicated region body
PF: predicated region fallthrough
CT: control target
= control target key end

     0   :  { %s3298_s27 = smov 0   ;;  %s3300_s28 = smov 0   ;;  %s4161_s0 = inlined_call_operand.vmem [shape: f32[2,9,9,512], index: 0, kind: input, shape index: {}]   ;;  %s4162_s1 = inlined_call_operand.vmem [shape: f32[1,128], index: 1, kind: input, shape index: {}]   ;;  %s4163_s2 = inlined_call_operand.vmem [shape: f32[1,128], index: 2, kind: input, shape index: {}]   ;;  %s4164_s3 = inlined_call_operand.vmem [shape: bf16[9,128,128], index: 3, kind: input, shape index: {}]   ;;  %s4165_s4 = inlined_call_operand.vmem [shape: f32[1,128], index: 4, kind: input, shape index: {}]   ;;  %s4166_s5 = inlined_call_operand.vmem [shape: f32[1,128], index: 5, kind: input, shape index: {}]   ;;  %s4167_s6 = inlined_call_operand.vmem [shape: f32[1,128], index: 6, kind: input, shape index: {}]   ;;  %s4168_s7 = inlined_call_operand.vmem [shape: f32[1,128], index: 7, kind: input, shape index: {}]   ;;  %s4169_s8 = inlined_call_operand.vmem [shape: bf16[2,64,128], index: 8, kind: output, shape index: {}]  }
   0x1   :  { %s3302_s29 = smov 0  }
   0x2 LB: > { %s30_s30 = sadd.s32 1, %s3245_s28  ;;  %p2496_p0 = scmp.ge.s32.totalorder %s3249_s29, 1  ;;  %s3249_s29 = sphi %s3302_s29, %s18_s29   ;;  %s3245_s28 = sphi %s3300_s28, %s4193_s28   ;;  %s3241_s27 = sphi %s3298_s27, %s4192_s27  }
   0x3   : > { %p32_p1 = scmp.ge.s32.totalorder %s30_s30, 2  ;;  %p317_p2 = scmp.lt.s32.totalorder %s3249_s29, 3 }
   0x5   : > { %s4195_s30 = smov (%p32_p1, %s30_s30), 0  ;;  %p318_p3 = pnand %p2496_p0, %p317_p2 }
   0x7   : > { %321 = sbr.rel (%p318_p3) target bundleno = 444 (0x1bc), region = 52 }
   0xc   : > { %v3151_v0 = vld [vmem:[%s4164_s3 + $0x78] sm:$0xff]   ;;  %p370_p4 = scmp.lt.s32.totalorder %s3241_s27, 1  ;;  %v3153_v2 = vld [vmem:[%s4164_s3 + $0x70] sm:$0xff]   ;;  %v3155_v4 = vld [vmem:[%s4164_s3 + $0x68] sm:$0xff]   ;;  %v453_v9 = vlaneseq  ;;  %v3251_v43 = vmov 0.0   ;;  %vm3252_vm5 = vmmov 1  }
   0xd   : > { %v3152_v1 = vld [vmem:[%s4164_s3 + $0x38] sm:$0xff]   ;;  %2892 = vmatprep.subr.bf16.mxu0 %v3151_v0  ;;  %v3154_v3 = vld [vmem:[%s4164_s3 + $0x30] sm:$0xff]   ;;  %v3156_v5 = vld [vmem:[%s4164_s3 + $0x28] sm:$0xff]  }
   0xe   : > { %2916 = vmatprep.subr.bf16.mxu1 %v3152_v1  ;;  %2893 = vmatpush3.bf16.msra.mxu0 %v3151_v0  ;;  %s4197_s27 = smov (!%p370_p4, %s3241_s27), 1  ;;  %v3157_v6 = vld [vmem:[%s4164_s3 + $0x60] sm:$0xff]   ;;  %v3159_v8 = vld [vmem:[%s4164_s3 + $0x58] sm:$0xff]   ;;  %v3161_v11 = vld [vmem:[%s4164_s3 + $0x50] sm:$0xff]   ;;  %v3367_v16 = vshrl.u32 %v453_v9, 7 }
   0xf   : > { %2917 = vmatpush3.bf16.msra.mxu1 %v3152_v1  ;;  %2894 = vmatprep.subr.bf16.mxu0 %v3153_v2  ;;  %v3158_v7 = vld [vmem:[%s4164_s3 + $0x20] sm:$0xff]   ;;  %s3124_s25 = smul.u32 576, %s4197_s27  ;;  %v3160_v10 = vld [vmem:[%s4164_s3 + $0x18] sm:$0xff]   ;;  %v3162_v12 = vld [vmem:[%s4164_s3 + $0x10] sm:$0xff]   ;;  %v3458_v1 = vrot.slane %v3251_v43, 1  ;;  %s2752_s17 = sshll.u32 %s4197_s27, 5 }
  0x10   : > { %2918 = vmatprep.subr.bf16.mxu1 %v3154_v3  ;;  %v3365_v15 = vld [vmem:[%s4162_s1] ss:$0 sm:$0xff]  ;;  %v3163_v26 = vld [vmem:[%s4164_s3 + $0x48] sm:$0xff]   ;;  %vm558_vm0 = vcmp.ge.s32.totalorder %v3367_v16, 1  ;;  %v3167_v54 = vld [vmem:[%s4164_s3 + $0xb8] sm:$0xff]   ;;  %s398_s27 = scalar_lea.vmem %s4169_s8, %s2752_s17 }
  0x11   : > { %s3352_s14 = scalar_lea.vmem %s4161_s0, %s3124_s25  ;;  %v3372_v17 = vld [vmem:[%s4163_s2] ss:$0 sm:$0xff]  ;;  %v3164_v31 = vld [vmem:[%s4164_s3 + $0x8] sm:$0xff]   ;;  %vm2534_vm6 = vmpackc.low %vm558_vm0, %vm3252_vm5 }
  0x12   : > { %2895 = vmatpush3.bf16.msra.mxu0 %v3153_v2  ;;  %v407_v13 = vld [vmem:[%s3352_s14 + $0x48] sm:$0xff]  ;;  %v406_v20 = vld [vmem:[%s3352_s14 + $0x40] sm:$0xff]  ;;  %v3168_v56 = vld [vmem:[%s4164_s3 + $0xf8] sm:$0xff]  }
  0x13   : > { %2919 = vmatpush3.bf16.msra.mxu1 %v3154_v3  ;;  %2896 = vmatprep.subr.bf16.mxu0 %v3155_v4  ;;  %v413_v14 = vld [vmem:[%s3352_s14 + $0x88] sm:$0xff]  ;;  %v589_v18 = vmul.f32 %v3365_v15, %v407_v13  ;;  %v412_v21 = vld [vmem:[%s3352_s14 + $0x80] sm:$0xff]  ;;  %v464_v22 = vmul.f32 %v3365_v15, %v406_v20  ;;  %vm3435_vm9 = vmpackc.low %vm558_vm0, %vm558_vm0 }
  0x14   : > { %2920 = vmatprep.subr.bf16.mxu1 %v3156_v5  ;;  %v590_v19 = vmul.f32 %v3365_v15, %v413_v14  ;;  %v466_v23 = vmul.f32 %v3365_v15, %v412_v21  ;;  %v419_v24 = vld [vmem:[%s3352_s14 + $0xc8] sm:$0xff]  ;;  %v418_v25 = vld [vmem:[%s3352_s14 + $0xc0] sm:$0xff]  ;;  %v3169_v61 = vld [vmem:[%s4164_s3 + $0xb0] sm:$0xff]  }
  0x15   : > { %v598_v27 = vadd.f32 %v3372_v17, %v589_v18  ;;  %v591_v29 = vmul.f32 %v3365_v15, %v419_v24  ;;  %v468_v30 = vmul.f32 %v3365_v15, %v418_v25  ;;  %v488_v32 = vadd.f32 %v3372_v17, %v464_v22  ;;  %v3165_v38 = vld [vmem:[%s4164_s3 + $0x40] sm:$0xff]   ;;  %v3170_v63 = vld [vmem:[%s4164_s3 + $0xf0] sm:$0xff]   ;;  %v425_v0 = vld [vmem:[%s3352_s14 + $0x108] sm:$0xff] }
  0x16   : > { %2897 = vmatpush3.bf16.msra.mxu0 %v3155_v4  ;;  %v599_v28 = vadd.f32 %v3372_v17, %v590_v19  ;;  %v490_v33 = vadd.f32 %v3372_v17, %v466_v23  ;;  %v3166_v47 = vld [vmem:[%s4164_s3] sm:$0xff]   ;;  %v431_v2 = vld [vmem:[%s3352_s14 + $0x148] sm:$0xff]  ;;  %v592_v3 = vmul.f32 %v3365_v15, %v425_v0  ;;  %v3220_v58 = vld [vmem:[%s4164_s3 + $0x210] sm:$0xff]  }
  0x17   : > { %2921 = vmatpush3.bf16.msra.mxu1 %v3156_v5  ;;  %2898 = vmatprep.subr.bf16.mxu0 %v3157_v6  ;;  %vm607_vm1 = vcmp.ge.f32.partialorder %v598_v27, 0.0  ;;  %v616_v34 = vmul.f32 0.1, %v598_v27  ;;  %vm506_vm3 = vcmp.ge.f32.partialorder %v488_v32, 0.0  ;;  %v524_v36 = vmul.f32 0.1, %v488_v32 }
  0x18   : > { %2922 = vmatprep.subr.bf16.mxu1 %v3158_v7  ;;  %vm608_vm2 = vcmp.ge.f32.partialorder %v599_v28, 0.0  ;;  %v617_v35 = vmul.f32 0.1, %v599_v28  ;;  %vm508_vm4 = vcmp.ge.f32.partialorder %v490_v33, 0.0  ;;  %v526_v37 = vmul.f32 0.1, %v490_v33 }
  0x19   : > { %v3398_v39 = vsel %vm607_vm1, %v598_v27, %v616_v34  ;;  %v600_v41 = vadd.f32 %v3372_v17, %v591_v29  ;;  %v492_v42 = vadd.f32 %v3372_v17, %v468_v30  ;;  %v3407_v46 = vsel %vm506_vm3, %v488_v32, %v524_v36  ;;  %v424_v4 = vld [vmem:[%s3352_s14 + $0x100] sm:$0xff]  ;;  %v3171_v21 = vld [vmem:[%s4164_s3 + $0xa8] sm:$0xff]  }
  0x1a   : > { %2899 = vmatpush3.bf16.msra.mxu0 %v3157_v6  ;;  %v3400_v40 = vsel %vm608_vm2, %v599_v28, %v617_v35  ;;  %v812_v44 = vpack.c.bf16 %v3398_v39, %v3251_v43  ;;  %v3415_v48 = vsel %vm508_vm4, %v490_v33, %v526_v37  ;;  %v2535_v49 = vpack.c.bf16 %v3407_v46, %v3251_v43  ;;  %v430_v5 = vld [vmem:[%s3352_s14 + $0x140] sm:$0xff]  ;;  %v3172_v25 = vld [vmem:[%s4164_s3 + $0xe8] sm:$0xff]  }
  0x1b   : > { %2923 = vmatpush3.bf16.msra.mxu1 %v3158_v7  ;;  %2900 = vmatprep.subr.bf16.mxu0 %v3159_v8  ;;  %v1866_v45 = vpack.c.bf16 %v3400_v40, %v3398_v39  ;;  %vm609_vm7 = vcmp.ge.f32.partialorder %v600_v41, 0.0  ;;  %v2679_v50 = vpack.c.bf16 %v3415_v48, %v3407_v46  ;;  %v618_v51 = vmul.f32 0.1, %v600_v41  ;;  %v3173_v29 = vld [vmem:[%s4164_s3 + $0xa0] sm:$0xff]  }
  0x1c   : > { %2924 = vmatprep.subr.bf16.mxu1 %v3160_v10  ;;  %2908 = vmatprep.mubr.bf16.mxu0 %v812_v44  ;;  %vm510_vm8 = vcmp.ge.f32.partialorder %v492_v42, 0.0  ;;  %v528_v52 = vmul.f32 0.1, %v492_v42  ;;  %v3442_v59 = vsel %vm558_vm0, %v3407_v46, 0.0  ;;  %v3452_v62 = vsel %vm558_vm0, %v3415_v48, 0.0  ;;  %v436_v35 = vld [vmem:[%s3352_s14 + $0x180] sm:$0xff] }
  0x1d   : > { %2932 = vmatprep.mubr.msk.bf16.mxu1 %vm2534_vm6, %v2535_v49  ;;  %v3420_v53 = vsel %vm609_vm7, %v600_v41, %v618_v51  ;;  %v3465_v6 = vadd.s32 8, %v3367_v16  ;;  %v1079_v7 = vrot.slane %v3442_v59, 1  ;;  %v470_v9 = vmul.f32 %v3365_v15, %v424_v4  ;;  %v442_v41 = vld [vmem:[%s3352_s14 + $0x1c0] sm:$0xff]  ;;  %v3175_v49 = vld [vmem:[%s4164_s3 + $0x98] sm:$0xff]  }
  0x1e   : > { %2901 = vmatpush3.bf16.msra.mxu0 %v3159_v8  ;;  %v3425_v55 = vsel %vm510_vm8, %v492_v42, %v528_v52  ;;  %v813_v57 = vpack.c.bf16 %v3420_v53, %v3400_v40  ;;  %v593_v8 = vmul.f32 %v3365_v15, %v431_v2  ;;  %v1082_v13 = vrot.slane %v3452_v62, 1  ;;  %v410_v0 = vld [vmem:[%s3352_s14 + $0x60] sm:$0x1]  ;;  %v3215_v40 = vld [vmem:[%s4164_s3 + $0x238] sm:$0xff]  }
  0x1f   : > { %2925 = vmatpush3.bf16.msra.mxu1 %v3160_v10  ;;  %2902 = vmatprep.subr.bf16.mxu0 %v3161_v11  ;;  %v2538_v60 = vpack.c.bf16 %v3425_v55, %v3415_v48  ;;  %v472_v10 = vmul.f32 %v3365_v15, %v430_v5  ;;  %v601_v14 = vadd.f32 %v3372_v17, %v592_v3  ;;  %v3482_v20 = vsel %vm558_vm0, %v3425_v55, 0.0  ;;  %v3214_v39 = vld [vmem:[%s4164_s3 + $0x1c0] sm:$0xff]  }
  0x20   : > { %2926 = vmatprep.subr.bf16.mxu1 %v3162_v12  ;;  %v602_v22 = vadd.f32 %v3372_v17, %v593_v8  ;;  %v494_v23 = vadd.f32 %v3372_v17, %v470_v9  ;;  %vm565_vm1 = vcmp.le.s32.totalorder %v3465_v6, 8  ;;  %vm1075_vm2 = vcmask 1046528   ;;  %v416_v8 = vld [vmem:[%s3352_s14 + $0xa0] sm:$0x1] }
  0x21   : > { %v496_v24 = vadd.f32 %v3372_v17, %v472_v10  ;;  %vm610_vm10 = vcmp.ge.f32.partialorder %v601_v14, 0.0  ;;  %v465_v5 = vmul.f32 %v3365_v15, %v410_v0  ;;  %v422_v9 = vld [vmem:[%s3352_s14 + $0xe0] sm:$0x1]  ;;  %v402_v10 = vld [vmem:[%s3352_s14 + $0x10] sm:$0xff] }
  0x22   : > { %2903 = vmatpush3.bf16.msra.mxu0 %v3161_v11  ;;  %v437_v11 = vld [vmem:[%s3352_s14 + $0x188] sm:$0xff]  ;;  %vm611_vm11 = vcmp.ge.f32.partialorder %v602_v22, 0.0  ;;  %v620_v30 = vmul.f32 0.1, %v602_v22  ;;  %vm512_vm12 = vcmp.ge.f32.partialorder %v494_v23, 0.0 }
  0x23   : > { %2927 = vmatpush3.bf16.msra.mxu1 %v3162_v12  ;;  %2904 = vmatprep.subr.bf16.mxu0 %v3163_v26  ;;  %v443_v12 = vld [vmem:[%s3352_s14 + $0x1c8] sm:$0xff]  ;;  %v594_v18 = vmul.f32 %v3365_v15, %v437_v11  ;;  %vm514_vm13 = vcmp.ge.f32.partialorder %v496_v24, 0.0  ;;  %v530_v33 = vmul.f32 0.1, %v494_v23  ;;  %v532_v34 = vmul.f32 0.1, %v496_v24 }
  0x24   : > { %2928 = vmatprep.subr.bf16.mxu1 %v3164_v31  ;;  %v595_v19 = vmul.f32 %v3365_v15, %v443_v12  ;;  %v3504_v36 = vsel %vm611_vm11, %v602_v22, %v620_v30  ;;  %v3177_v30 = vld [vmem:[%s4164_s3 + $0x90] sm:$0xff]  }
  0x25   : > { %v603_v27 = vadd.f32 %v3372_v17, %v594_v18  ;;  %v3513_v43 = vsel %vm512_vm12, %v494_v23, %v530_v33  ;;  %v3516_v44 = vsel %vm514_vm13, %v496_v24, %v532_v34  ;;  %v469_v18 = vmul.f32 %v3365_v15, %v422_v9  ;;  %v3178_v33 = vld [vmem:[%s4164_s3 + $0xd0] sm:$0xff]  }
  0x26   : > { %2905 = vmatpush3.bf16.msra.mxu0 %v3163_v26  ;;  %v619_v26 = vmul.f32 0.1, %v601_v14  ;;  %v604_v28 = vadd.f32 %v3372_v17, %v595_v19  ;;  %v2541_v51 = vpack.c.bf16 %v3516_v44, %v3513_v43  ;;  %v2682_v52 = vpack.c.bf16 %v3513_v43, %v3425_v55  ;;  %v408_v19 = vld [vmem:[%s3352_s14 + $0x50] sm:$0xff] }
  0x27   : > { %2929 = vmatpush3.bf16.msra.mxu1 %v3164_v31  ;;  %2906 = vmatprep.subr.bf16.mxu0 %v3165_v38  ;;  %v3174_v31 = vld [vmem:[%s4164_s3 + $0xe0] sm:$0xff]   ;;  %vm612_vm14 = vcmp.ge.f32.partialorder %v603_v27, 0.0  ;;  %v3550_v11 = vsel %vm558_vm0, %v3513_v43, 0.0  ;;  %v489_v23 = vadd.f32 %v3372_v17, %v465_v5  ;;  %v648_v24 = vmul.f32 %v3365_v15, %v402_v10  ;;  %v3179_v5 = vld [vmem:[%s4164_s3 + $0x88] sm:$0xff]  }
  0x28   : > { %2930 = vmatprep.subr.bf16.mxu1 %v3166_v47  ;;  %v3501_v32 = vsel %vm610_vm10, %v601_v14, %v619_v26  ;;  %vm613_vm15 = vcmp.ge.f32.partialorder %v604_v28, 0.0  ;;  %v467_v14 = vmul.f32 %v3365_v15, %v416_v8  ;;  %v650_v34 = vmul.f32 %v3365_v15, %v408_v19 }
  0x29   : > { %v1867_v37 = vpack.c.bf16 %v3501_v32, %v3420_v53  ;;  %v814_v42 = vpack.c.bf16 %v3504_v36, %v3501_v32  ;;  %vm507_vm5 = vcmp.ge.f32.partialorder %v489_v23, 0.0  ;;  %v3219_v53 = vld [vmem:[%s4164_s3 + $0x218] sm:$0xff]   ;;  %v3221_v32 = vld [vmem:[%s4164_s3 + $0x208] sm:$0xff]  }
  0x2a   : > { %2907 = vmatpush3.bf16.msra.mxu0 %v3165_v38  ;;  %v621_v38 = vmul.f32 0.1, %v603_v27  ;;  %v491_v26 = vadd.f32 %v3372_v17, %v467_v14  ;;  %v666_v0 = vadd.f32 %v3372_v17, %v650_v34  ;;  %v434_v34 = vld [vmem:[%s3352_s14 + $0x160] sm:$0x1] }
  0x2b   : > { %2931 = vmatpush3.bf16.msra.mxu1 %v3166_v47  ;;  %2940 = vmatprep.subr.bf16.mxu0 %v3167_v54  ;;  %v622_v47 = vmul.f32 0.1, %v604_v28 }
  0x2c   : > { %2964 = vmatprep.subr.bf16.mxu1 %v3168_v56  ;;  %vm509_vm6 = vcmp.ge.f32.partialorder %v491_v26, 0.0  ;;  %vm682_vm10 = vcmp.ge.f32.partialorder %v666_v0, 0.0 }
  0x2d   : > { %2909 = vmatmul.mubr.bf16.vlgmr.msra.gmra.mxu0 %v813_v57  ;;  %v1085_v57 = vrot.slane %v3482_v20, 1  ;;  %v1088_v20 = vrot.slane %v3550_v11, 1 }
  0x2e   : > { %2933 = vmatmul.mubr.msk.bf16.vlgmr.msra.gmra.mxu1 %vm3435_vm9, %v2538_v60  ;;  %2941 = vmatpush3.bf16.msra.mxu0 %v3167_v54  ;;  %v3526_v54 = vsel %vm612_vm14, %v603_v27, %v621_v38  ;;  %v3176_v60 = vld [vmem:[%s4164_s3 + $0xd8] sm:$0xff]   ;;  %v493_v27 = vadd.f32 %v3372_v17, %v469_v18  ;;  %v3181_v18 = vld [vmem:[%s4164_s3 + $0x80] sm:$0xff]  }
  0x2f   : > { %2965 = vmatpush3.bf16.msra.mxu1 %v3168_v56  ;;  %2942 = vmatprep.subr.bf16.mxu0 %v3169_v61  ;;  %v474_v56 = vmul.f32 %v3365_v15, %v436_v35  ;;  %v1868_v2 = vpack.c.bf16 %v3526_v54, %v3504_v36  ;;  %v414_v35 = vld [vmem:[%s3352_s14 + $0x90] sm:$0xff]  ;;  %v3222_v36 = vld [vmem:[%s4164_s3 + $0x200] sm:$0xff]  }
  0x30   : > { %2966 = vmatprep.subr.bf16.mxu1 %v3170_v63  ;;  %2912 = vmatprep.mubr.bf16.mxu0 %v814_v42  ;;  %vm511_vm7 = vcmp.ge.f32.partialorder %v493_v27, 0.0 }
  0x31   : > { %v498_v4 = vadd.f32 %v3372_v17, %v474_v56  ;;  %2936 = vmatprep.mubr.msk.bf16.mxu1 %vm3435_vm9, %v2541_v51  ;;  %v664_v51 = vadd.f32 %v3372_v17, %v648_v24 }
  0x32   : > { %2943 = vmatpush3.bf16.msra.mxu0 %v3169_v61  ;;  %v3534_v61 = vsel %vm613_vm15, %v604_v28, %v622_v47  ;;  %v529_v47 = vmul.f32 0.1, %v493_v27 }
  0x33   : > { %2967 = vmatpush3.bf16.msra.mxu1 %v3170_v63  ;;  %2944 = vmatprep.subr.bf16.mxu0 %v3171_v21  ;;  %v476_v63 = vmul.f32 %v3365_v15, %v442_v41  ;;  %v815_v3 = vpack.c.bf16 %v3534_v61, %v3526_v54  ;;  %vm516_vm3 = vcmp.ge.f32.partialorder %v498_v4, 0.0  ;;  %v534_v22 = vmul.f32 0.1, %v498_v4 }
  0x34   : > { %2968 = vmatprep.subr.bf16.mxu1 %v3172_v25  ;;  %v547_v9 = vsel %vm511_vm7, %v493_v27, %v529_v47  ;;  %vm680_vm8 = vcmp.ge.f32.partialorder %v664_v51, 0.0  ;;  %v696_v14 = vmul.f32 0.1, %v664_v51 }
  0x35   : > { %v500_v12 = vadd.f32 %v3372_v17, %v476_v63  ;;  %2913 = vmatmul.mubr.bf16.gmra.mxu0 %v815_v3  ;;  %v3567_v28 = vsel %vm516_vm3, %v498_v4, %v534_v22  ;;  %v420_v3 = vld [vmem:[%s3352_s14 + $0xd0] sm:$0xff]  ;;  %v652_v4 = vmul.f32 %v3365_v15, %v414_v35  ;;  %v577_v10 = vsel %vm565_vm1, %v547_v9, 0.0  ;;  %v446_v35 = vld [vmem:[%s3352_s14 + $0x1e0] sm:$0x1] }
  0x36   : > { %2945 = vmatpush3.bf16.msra.mxu0 %v3171_v21  ;;  %v3561_v21 = vsel %vm558_vm0, %v3516_v44, 0.0  ;;  %v1086_v22 = vrot.slane %v577_v10, 1  ;;  %v654_v24 = vmul.f32 %v3365_v15, %v420_v3  ;;  %v477_v3 = vmul.f32 %v3365_v15, %v446_v35 }
  0x37   : > { %2969 = vmatpush3.bf16.msra.mxu1 %v3172_v25  ;;  %2946 = vmatprep.subr.bf16.mxu0 %v3173_v29  ;;  %vm518_vm4 = vcmp.ge.f32.partialorder %v500_v12, 0.0  ;;  %v536_v25 = vmul.f32 0.1, %v500_v12 }
  0x38   : > { %2970 = vmatprep.subr.bf16.mxu1 %v3174_v31 }
  0x39   : > { %v3577_v38 = vsel %vm518_vm4, %v500_v12, %v536_v25  ;;  %v428_v25 = vld [vmem:[%s3352_s14 + $0x120] sm:$0x1] }
  0x3a   : > { %2947 = vmatpush3.bf16.msra.mxu0 %v3173_v29  ;;  %v525_v29 = vmul.f32 0.1, %v489_v23  ;;  %v2544_v41 = vpack.c.bf16 %v3577_v38, %v3567_v28  ;;  %v471_v47 = vmul.f32 %v3365_v15, %v428_v25  ;;  %v3185_v25 = vld [vmem:[%s4164_s3 + $0x130] sm:$0xff]  }
  0x3b   : > { %2971 = vmatpush3.bf16.msra.mxu1 %v3174_v31  ;;  %2948 = vmatprep.subr.bf16.mxu0 %v3175_v49  ;;  %v527_v31 = vmul.f32 0.1, %v491_v26 }
  0x3c   : > { %2972 = vmatprep.subr.bf16.mxu1 %v3176_v60  ;;  %v543_v42 = vsel %vm507_vm5, %v489_v23, %v525_v29  ;;  %2937 = vmatmul.mubr.msk.bf16.gmra.mxu1 %vm3435_vm9, %v2544_v41  ;;  %v698_v23 = vmul.f32 0.1, %v666_v0  ;;  %v668_v29 = vadd.f32 %v3372_v17, %v652_v4  ;;  %v450_v41 = vld [vmem:[%s3352_s14 + $0x220] sm:$0x1]  ;;  %v3183_v4 = vld [vmem:[%s4164_s3 + $0x138] sm:$0xff]   ;;  %v495_v9 = vadd.f32 %v3372_v17, %v471_v47 }
  0x3d   : > { %v573_v56 = vsel %vm565_vm1, %v543_v42, 0.0  ;;  %v545_v63 = vsel %vm509_vm6, %v491_v26, %v527_v31  ;;  %v3182_v26 = vld [vmem:[%s4164_s3 + $0xc0] sm:$0xff]  }
  0x3e   : > { %2949 = vmatpush3.bf16.msra.mxu0 %v3175_v49  ;;  %v1080_v8 = vrot.slane %v573_v56, 1  ;;  %v575_v49 = vsel %vm565_vm1, %v545_v63, 0.0  ;;  %v3632_v62 = vsel %vm682_vm10, %v666_v0, %v698_v23  ;;  %vm684_vm11 = vcmp.ge.f32.partialorder %v668_v29, 0.0 }
  0x3f   : > { %2973 = vmatpush3.bf16.msra.mxu1 %v3176_v60  ;;  %2950 = vmatprep.subr.bf16.mxu0 %v3177_v30  ;;  %v3180_v60 = vld [vmem:[%s4164_s3 + $0xc8] sm:$0xff]   ;;  %v1083_v12 = vrot.slane %v575_v49, 1  ;;  %v473_v56 = vmul.f32 %v3365_v15, %v434_v34  ;;  %v1091_v63 = vrot.slane %v3561_v21, 1  ;;  %v3662_v21 = vsel %vm558_vm0, %v3567_v28, 0.0  ;;  %v3184_v49 = vld [vmem:[%s4164_s3 + $0x178] sm:$0xff]  }
  0x40   : > { %2974 = vmatprep.subr.bf16.mxu1 %v3178_v33  ;;  %v3606_v19 = vsel %vm1075_vm2, %v1079_v7, %v1080_v8  ;;  %v3621_v7 = vsel %vm680_vm8, %v664_v51, %v696_v14  ;;  %v448_v51 = vld [vmem:[%s3352_s14 + $0x200] sm:$0xff]  ;;  %v479_v14 = vmul.f32 %v3365_v15, %v450_v41  ;;  %vm513_vm13 = vcmp.ge.f32.partialorder %v495_v9, 0.0 }
  0x41   : > { %v1108_v27 = vpack.c.bf16 %v3606_v19, %v3458_v1  ;;  %v3618_v59 = vsel %vm1075_vm2, %v1082_v13, %v1083_v12  ;;  %v3629_v1 = vsel %vm1075_vm2, %v1085_v57, %v1086_v22  ;;  %v670_v13 = vadd.f32 %v3372_v17, %v654_v24 }
  0x42   : > { %2951 = vmatpush3.bf16.msra.mxu0 %v3177_v30  ;;  %v440_v30 = vld [vmem:[%s3352_s14 + $0x1a0] sm:$0x1]  ;;  %v1109_v31 = vpack.c.bf16 %v3629_v1, %v3618_v59  ;;  %v700_v57 = vmul.f32 0.1, %v668_v29  ;;  %v497_v10 = vadd.f32 %v3372_v17, %v473_v56  ;;  %v478_v12 = vmul.f32 %v3365_v15, %v448_v51 }
  0x43   : > { %2975 = vmatpush3.bf16.msra.mxu1 %v3178_v33  ;;  %2952 = vmatprep.subr.bf16.mxu0 %v3179_v5  ;;  %v2595_v33 = vpack.c.bf16 %v3632_v62, %v3621_v7  ;;  %vm686_vm12 = vcmp.ge.f32.partialorder %v670_v13, 0.0  ;;  %v702_v42 = vmul.f32 0.1, %v670_v13  ;;  %v475_v0 = vmul.f32 %v3365_v15, %v440_v30 }
  0x44   : > { %2976 = vmatprep.subr.bf16.mxu1 %v3180_v60  ;;  %2956 = vmatprep.mubr.bf16.mxu0 %v1108_v27  ;;  %v3654_v8 = vsel %vm684_vm11, %v668_v29, %v700_v57  ;;  %v531_v22 = vmul.f32 0.1, %v495_v9  ;;  %v501_v24 = vadd.f32 %v3372_v17, %v477_v3  ;;  %vm515_vm14 = vcmp.ge.f32.partialorder %v497_v10, 0.0  ;;  %v3188_v3 = vld [vmem:[%s4164_s3 + $0x168] sm:$0xff]  }
  0x45   : > { %2980 = vmatprep.mubr.msk.bf16.mxu1 %vm3435_vm9, %v2595_v33  ;;  %v499_v23 = vadd.f32 %v3372_v17, %v475_v0  ;;  %v533_v27 = vmul.f32 0.1, %v497_v10  ;;  %v502_v29 = vadd.f32 %v3372_v17, %v478_v12  ;;  %v503_v34 = vadd.f32 %v3372_v17, %v479_v14  ;;  %v432_v14 = vld [vmem:[%s3352_s14 + $0x150] sm:$0xff] }
  0x46   : > { %2953 = vmatpush3.bf16.msra.mxu0 %v3179_v5  ;;  %v3656_v5 = vsel %vm686_vm12, %v670_v13, %v702_v42  ;;  %v549_v30 = vsel %vm513_vm13, %v495_v9, %v531_v22  ;;  %vm519_vm3 = vcmp.ge.f32.partialorder %v501_v24, 0.0  ;;  %v537_v57 = vmul.f32 0.1, %v501_v24  ;;  %v426_v9 = vld [vmem:[%s3352_s14 + $0x110] sm:$0xff] }
  0x47   : > { %2977 = vmatpush3.bf16.msra.mxu1 %v3180_v60  ;;  %2954 = vmatprep.subr.bf16.mxu0 %v3181_v18  ;;  %v2598_v60 = vpack.c.bf16 %v3656_v5, %v3654_v8  ;;  %vm517_vm15 = vcmp.ge.f32.partialorder %v499_v23, 0.0  ;;  %v535_v13 = vmul.f32 0.1, %v499_v23  ;;  %v551_v35 = vsel %vm515_vm14, %v497_v10, %v533_v27 }
  0x48   : > { %2978 = vmatprep.subr.bf16.mxu1 %v3182_v26  ;;  %v579_v33 = vsel %vm565_vm1, %v549_v30, 0.0  ;;  %vm520_vm4 = vcmp.ge.f32.partialorder %v502_v29, 0.0  ;;  %vm521_vm5 = vcmp.ge.f32.partialorder %v503_v34, 0.0  ;;  %v538_v42 = vmul.f32 0.1, %v502_v29  ;;  %v444_v30 = vld [vmem:[%s3352_s14 + $0x1d0] sm:$0xff] }
  0x49   : > { %v1089_v41 = vrot.slane %v579_v33, 1  ;;  %v539_v51 = vmul.f32 0.1, %v503_v34  ;;  %v553_v56 = vsel %vm517_vm15, %v499_v23, %v535_v13  ;;  %v584_v0 = vsel %vm558_vm0, %v3577_v38, 0.0  ;;  %v438_v23 = vld [vmem:[%s3352_s14 + $0x190] sm:$0xff] }
  0x4a   : > { %2955 = vmatpush3.bf16.msra.mxu0 %v3181_v18  ;;  %v3186_v18 = vld [vmem:[%s4164_s3 + $0x170] sm:$0xff]   ;;  %v3706_v10 = vsel %vm520_vm4, %v502_v29, %v538_v42  ;;  %v583_v12 = vsel %vm565_vm1, %v553_v56, 0.0  ;;  %v1094_v29 = vrot.slane %v3662_v21, 1  ;;  %v660_v42 = vmul.f32 %v3365_v15, %v438_v23  ;;  %v3189_v21 = vld [vmem:[%s4164_s3 + $0x120] sm:$0xff]  }
  0x4b   : > { %2979 = vmatpush3.bf16.msra.mxu1 %v3182_v26  ;;  %2988 = vmatprep.subr.bf16.mxu0 %v3183_v4  ;;  %v581_v26 = vsel %vm565_vm1, %v551_v35, 0.0  ;;  %v586_v27 = vsel %vm558_vm0, %v3706_v10, 0.0  ;;  %v1095_v13 = vrot.slane %v583_v12, 1  ;;  %v3190_v56 = vld [vmem:[%s4164_s3 + $0x160] sm:$0xff]   ;;  %v2688_v55 = vpack.c.bf16 %v3706_v10, %v3577_v38 }
  0x4c   : > { %3012 = vmatprep.subr.bf16.mxu1 %v3184_v49  ;;  %v1092_v47 = vrot.slane %v581_v26, 1  ;;  %v2010_v33 = vrot.slane %v586_v27, 1  ;;  %v409_v27 = vld [vmem:[%s3352_s14 + $0x58] sm:$0xff] }
  0x4d   : > { %2957 = vmatmul.mubr.bf16.vlgmr.msra.gmra.mxu0 %v1109_v31  ;;  %v3187_v31 = vld [vmem:[%s4164_s3 + $0x128] sm:$0xff]  }
  0x4e   : > { %2981 = vmatmul.mubr.msk.bf16.vlgmr.msra.gmra.mxu1 %vm3435_vm9, %v2598_v60  ;;  %2989 = vmatpush3.bf16.msra.mxu0 %v3183_v4  ;;  %v3702_v4 = vsel %vm1075_vm2, %v1088_v20, %v1089_v41  ;;  %v555_v60 = vsel %vm519_vm3, %v501_v24, %v537_v57  ;;  %v3712_v22 = vsel %vm1075_vm2, %v1091_v63, %v1092_v47 }
  0x4f   : > { %3013 = vmatpush3.bf16.msra.mxu1 %v3184_v49  ;;  %2990 = vmatprep.subr.bf16.mxu0 %v3185_v25  ;;  %v557_v49 = vsel %vm521_vm5, %v503_v34, %v539_v51  ;;  %v585_v20 = vsel %vm565_vm1, %v555_v60, 0.0  ;;  %v1110_v24 = vpack.c.bf16 %v3712_v22, %v3702_v4  ;;  %v1097_v34 = vrot.slane %v584_v0, 1  ;;  %v403_v0 = vld [vmem:[%s3352_s14 + $0x18] sm:$0xff] }
  0x50   : > { %3014 = vmatprep.subr.bf16.mxu1 %v3186_v18  ;;  %v587_v63 = vsel %vm565_vm1, %v557_v49, 0.0  ;;  %v1098_v35 = vrot.slane %v585_v20, 1  ;;  %v656_v41 = vmul.f32 %v3365_v15, %v426_v9  ;;  %v658_v57 = vmul.f32 %v3365_v15, %v432_v14  ;;  %v3191_v14 = vld [vmem:[%s4164_s3 + $0x118] sm:$0xff]  }
  0x51   : > { %2960 = vmatprep.mubr.bf16.mxu0 %v1110_v24  ;;  %v2011_v26 = vrot.slane %v587_v63, 1  ;;  %v3741_v47 = vsel %vm1075_vm2, %v1094_v29, %v1095_v13  ;;  %v662_v51 = vmul.f32 %v3365_v15, %v444_v30  ;;  %v676_v20 = vadd.f32 %v3372_v17, %v660_v42  ;;  %v3192_v24 = vld [vmem:[%s4164_s3 + $0x158] sm:$0xff]  }
  0x52   : > { %2991 = vmatpush3.bf16.msra.mxu0 %v3185_v25  ;;  %v3738_v25 = vsel %vm558_vm0, %v3621_v7, 0.0  ;;  %v672_v60 = vadd.f32 %v3372_v17, %v656_v41  ;;  %v674_v12 = vadd.f32 %v3372_v17, %v658_v57  ;;  %v744_v63 = vmul.f32 %v3365_v15, %v403_v0  ;;  %v415_v41 = vld [vmem:[%s3352_s14 + $0x98] sm:$0xff] }
  0x53   : > { %3015 = vmatpush3.bf16.msra.mxu1 %v3186_v18  ;;  %v3744_v18 = vsel %vm1075_vm2, %v1097_v34, %v1098_v35  ;;  %2992 = vmatprep.subr.bf16.mxu0 %v3187_v31  ;;  %v3754_v9 = vsel %vm1075_vm2, %v2010_v33, %v2011_v26  ;;  %v678_v23 = vadd.f32 %v3372_v17, %v662_v51  ;;  %vm692_vm8 = vcmp.ge.f32.partialorder %v676_v20, 0.0  ;;  %v3193_v51 = vld [vmem:[%s4164_s3 + $0x110] sm:$0xff]   ;;  %v421_v0 = vld [vmem:[%s3352_s14 + $0xd8] sm:$0xff] }
  0x54   : > { %3016 = vmatprep.subr.bf16.mxu1 %v3188_v3  ;;  %v1111_v7 = vpack.c.bf16 %v3744_v18, %v3741_v47  ;;  %vm688_vm6 = vcmp.ge.f32.partialorder %v672_v60, 0.0  ;;  %vm690_vm7 = vcmp.ge.f32.partialorder %v674_v12, 0.0  ;;  %v704_v29 = vmul.f32 0.1, %v672_v60 }
  0x55   : > { %v706_v30 = vmul.f32 0.1, %v674_v12  ;;  %vm694_vm10 = vcmp.ge.f32.partialorder %v678_v23, 0.0  ;;  %v710_v13 = vmul.f32 0.1, %v678_v23  ;;  %v745_v33 = vmul.f32 %v3365_v15, %v409_v27 }
  0x56   : > { %2993 = vmatpush3.bf16.msra.mxu0 %v3187_v31  ;;  %v708_v31 = vmul.f32 0.1, %v676_v20  ;;  %v720_v34 = vsel %vm688_vm6, %v672_v60, %v704_v29  ;;  %v752_v26 = vadd.f32 %v3372_v17, %v744_v63  ;;  %v1550_v60 = vrot.slane %v3738_v25, 1 }
  0x57   : > { %2961 = vmatmul.mubr.bf16.gmra.mxu0 %v1111_v7  ;;  %3017 = vmatpush3.bf16.msra.mxu1 %v3188_v3  ;;  %v722_v35 = vsel %vm690_vm7, %v674_v12, %v706_v30  ;;  %v3776_v3 = vsel %vm558_vm0, %v3632_v62, 0.0  ;;  %v405_v7 = vld [vmem:[%s3352_s14 + $0x30] sm:$0x1]  ;;  %v3788_v12 = vsel %vm558_vm0, %v720_v34, 0.0  ;;  %v3791_v27 = vsel %vm694_vm10, %v678_v23, %v710_v13 }
  0x58   : > { %2994 = vmatprep.subr.bf16.mxu0 %v3189_v21  ;;  %3018 = vmatprep.subr.bf16.mxu1 %v3190_v56  ;;  %v2601_v57 = vpack.c.bf16 %v722_v35, %v720_v34  ;;  %v3778_v42 = vsel %vm692_vm8, %v676_v20, %v708_v31  ;;  %v753_v62 = vadd.f32 %v3372_v17, %v745_v33  ;;  %vm760_vm11 = vcmp.ge.f32.partialorder %v752_v26, 0.0  ;;  %v417_v34 = vld [vmem:[%s3352_s14 + $0xb0] sm:$0x1] }
  0x59   : > { %v3797_v20 = vsel %vm558_vm0, %v722_v35, 0.0  ;;  %v2604_v63 = vpack.c.bf16 %v3791_v27, %v3778_v42  ;;  %v768_v23 = vmul.f32 0.1, %v752_v26  ;;  %v746_v29 = vmul.f32 %v3365_v15, %v415_v41  ;;  %v423_v41 = vld [vmem:[%s3352_s14 + $0xf0] sm:$0x1] }
  0x5a   : > { %2995 = vmatpush3.bf16.msra.mxu0 %v3189_v21  ;;  %v411_v21 = vld [vmem:[%s3352_s14 + $0x70] sm:$0x1]  ;;  %2984 = vmatprep.mubr.msk.bf16.mxu1 %vm3435_vm9, %v2601_v57  ;;  %vm761_vm12 = vcmp.ge.f32.partialorder %v753_v62, 0.0  ;;  %v769_v30 = vmul.f32 0.1, %v753_v62  ;;  %v747_v31 = vmul.f32 %v3365_v15, %v421_v0  ;;  %v649_v13 = vmul.f32 %v3365_v15, %v405_v7  ;;  %v3195_v0 = vld [vmem:[%s4164_s3 + $0x108] sm:$0xff]  }
  0x5b   : > { %3019 = vmatpush3.bf16.msra.mxu1 %v3190_v56  ;;  %2996 = vmatprep.subr.bf16.mxu0 %v3191_v14  ;;  %v3194_v56 = vld [vmem:[%s4164_s3 + $0x150] sm:$0xff]   ;;  %v776_v35 = vsel %vm760_vm11, %v752_v26, %v768_v23  ;;  %v754_v33 = vadd.f32 %v3372_v17, %v746_v29  ;;  %v651_v57 = vmul.f32 %v3365_v15, %v411_v21  ;;  %v1553_v49 = vrot.slane %v3776_v3, 1 }
  0x5c   : > { %3020 = vmatprep.subr.bf16.mxu1 %v3192_v24  ;;  %2985 = vmatmul.mubr.msk.bf16.gmra.mxu1 %vm3435_vm9, %v2604_v63  ;;  %v777_v7 = vsel %vm761_vm12, %v753_v62, %v769_v30  ;;  %v755_v11 = vadd.f32 %v3372_v17, %v747_v31  ;;  %v3825_v26 = vsel %vm558_vm0, %v3654_v8, 0.0  ;;  %v653_v31 = vmul.f32 %v3365_v15, %v417_v34 }
  0x5d   : > { %v1392_v21 = vpack.c.bf16 %v777_v7, %v776_v35  ;;  %vm762_vm13 = vcmp.ge.f32.partialorder %v754_v33, 0.0  ;;  %v770_v63 = vmul.f32 0.1, %v754_v33  ;;  %v667_v23 = vadd.f32 %v3372_v17, %v651_v57 }
  0x5e   : > { %2997 = vmatpush3.bf16.msra.mxu0 %v3191_v14  ;;  %v665_v14 = vadd.f32 %v3372_v17, %v649_v13  ;;  %vm763_vm14 = vcmp.ge.f32.partialorder %v755_v11, 0.0  ;;  %v771_v62 = vmul.f32 0.1, %v755_v11  ;;  %v3197_v13 = vld [vmem:[%s4164_s3 + $0x100] sm:$0xff]   ;;  %v1562_v16 = vrot.slane %v3788_v12, 1 }
  0x5f   : > { %3021 = vmatpush3.bf16.msra.mxu1 %v3192_v24  ;;  %2998 = vmatprep.subr.bf16.mxu0 %v3193_v51  ;;  %v3196_v24 = vld [vmem:[%s4164_s3 + $0x148] sm:$0xff]   ;;  %v3831_v30 = vsel %vm762_vm13, %v754_v33, %v770_v63  ;;  %vm683_vm3 = vcmp.ge.f32.partialorder %v667_v23, 0.0  ;;  %v699_v8 = vmul.f32 0.1, %v667_v23  ;;  %v3843_v33 = vsel %vm558_vm0, %v3656_v5, 0.0 }
  0x60   : > { %3022 = vmatprep.subr.bf16.mxu1 %v3194_v56  ;;  %vm681_vm15 = vcmp.ge.f32.partialorder %v665_v14, 0.0  ;;  %v697_v29 = vmul.f32 0.1, %v665_v14  ;;  %3004 = vmatprep.mubr.bf16.mxu0 %v1392_v21  ;;  %v3837_v35 = vsel %vm763_vm14, %v755_v11, %v771_v62  ;;  %v3860_v63 = vld [vmem:[%s4163_s2] ss:$0 sm:$0xff]  ;;  %v4173_v54 = vpack.c.bf16 %v3754_v9, %v3744_v18 }
  0x61   : > { %v1393_v34 = vpack.c.bf16 %v3837_v35, %v3831_v30  ;;  %v715_v7 = vsel %vm683_vm3, %v667_v23, %v699_v8  ;;  %v1556_v23 = vrot.slane %v3825_v26, 1  ;;  %v3871_v8 = vld [vmem:[%s4164_s3 + $0x1f8] sm:$0xff]   ;;  %v1559_v35 = vrot.slane %v3843_v33, 1 }
  0x62   : > { %2999 = vmatpush3.bf16.msra.mxu0 %v3193_v51  ;;  %v713_v57 = vsel %vm681_vm15, %v665_v14, %v697_v29  ;;  %v655_v51 = vmul.f32 %v3365_v15, %v423_v41  ;;  %v669_v14 = vadd.f32 %v3372_v17, %v653_v31  ;;  %v427_v15 = vld [vmem:[%s3352_s14 + $0x118] sm:$0xff]  ;;  %v731_v5 = vsel %vm565_vm1, %v715_v7, 0.0 }
  0x63   : > { %3023 = vmatpush3.bf16.msra.mxu1 %v3194_v56  ;;  %3000 = vmatprep.subr.bf16.mxu0 %v3195_v0  ;;  %v3198_v56 = vld [vmem:[%s4164_s3 + $0x140] sm:$0xff]   ;;  %v729_v11 = vsel %vm565_vm1, %v713_v57, 0.0  ;;  %v433_v41 = vld [vmem:[%s3352_s14 + $0x158] sm:$0xff]  ;;  %v1554_v30 = vrot.slane %v731_v5, 1 }
  0x64   : > { %3024 = vmatprep.subr.bf16.mxu1 %v3196_v24  ;;  %v1551_v21 = vrot.slane %v729_v11, 1  ;;  %v671_v62 = vadd.f32 %v3860_v63, %v655_v51  ;;  %v439_v29 = vld [vmem:[%s3352_s14 + $0x198] sm:$0xff]  ;;  %vm685_vm4 = vcmp.ge.f32.partialorder %v669_v14, 0.0  ;;  %v701_v31 = vmul.f32 0.1, %v669_v14 }
  0x65   : > { %v3199_v17 = vld [vmem:[%s4164_s3 + $0x1b8] sm:$0xff]   ;;  %v3880_v57 = vld [vmem:[%s4162_s1] ss:$0 sm:$0xff] }
  0x66   : > { %3001 = vmatpush3.bf16.msra.mxu0 %v3195_v0  ;;  %v1552_v0 = vsel %vm1075_vm2, %v1550_v60, %v1551_v21  ;;  %vm687_vm5 = vcmp.ge.f32.partialorder %v671_v62, 0.0  ;;  %v703_v26 = vmul.f32 0.1, %v671_v62  ;;  %v748_v51 = vmul.f32 %v3880_v57, %v427_v15  ;;  %v445_v7 = vld [vmem:[%s3352_s14 + $0x1d8] sm:$0xff]  ;;  %v3201_v15 = vld [vmem:[%s4164_s3 + $0x1b0] sm:$0xff]  }
  0x67   : > { %3025 = vmatpush3.bf16.msra.mxu1 %v3196_v24  ;;  %3002 = vmatprep.subr.bf16.mxu0 %v3197_v13  ;;  %v1555_v24 = vsel %vm1075_vm2, %v1553_v49, %v1554_v30  ;;  %v717_v25 = vsel %vm685_vm4, %v669_v14, %v701_v31  ;;  %v749_v60 = vmul.f32 %v3880_v57, %v433_v41  ;;  %v435_v30 = vld [vmem:[%s3352_s14 + $0x170] sm:$0x1] }
  0x68   : > { %3026 = vmatprep.subr.bf16.mxu1 %v3198_v56  ;;  %v750_v33 = vmul.f32 %v3880_v57, %v439_v29  ;;  %v1582_v11 = vpack.c.bf16 %v1555_v24, %v1552_v0  ;;  %v719_v5 = vsel %vm687_vm5, %v671_v62, %v703_v26  ;;  %v733_v21 = vsel %vm565_vm1, %v717_v25, 0.0  ;;  %v429_v62 = vld [vmem:[%s3352_s14 + $0x130] sm:$0x1] }
  0x69   : > { %v756_v3 = vadd.f32 %v3860_v63, %v748_v51  ;;  %v735_v49 = vsel %vm565_vm1, %v719_v5, 0.0  ;;  %v1557_v14 = vrot.slane %v733_v21, 1  ;;  %v757_v41 = vadd.f32 %v3860_v63, %v749_v60  ;;  %v441_v51 = vld [vmem:[%s3352_s14 + $0x1b0] sm:$0x1] }
  0x6a   : > { %3003 = vmatpush3.bf16.msra.mxu0 %v3197_v13  ;;  %v751_v29 = vmul.f32 %v3880_v57, %v445_v7  ;;  %3028 = vmatprep.mubr.bf16.mxu1 %v1582_v11  ;;  %v1560_v31 = vrot.slane %v735_v49, 1  ;;  %v758_v26 = vadd.f32 %v3860_v63, %v750_v33  ;;  %v3202_v25 = vld [vmem:[%s4164_s3 + $0x1f0] sm:$0xff]   ;;  %v3203_v49 = vld [vmem:[%s4164_s3 + $0x1a8] sm:$0xff]  }
  0x6b   : > { %3027 = vmatpush3.bf16.msra.mxu1 %v3198_v56  ;;  %vm764_vm6 = vcmp.ge.f32.partialorder %v756_v3, 0.0  ;;  %v772_v0 = vmul.f32 0.1, %v756_v3  ;;  %3036 = vmatprep.subr.bf16.mxu0 %v3199_v17  ;;  %v1558_v13 = vsel %vm1075_vm2, %v1556_v23, %v1557_v14  ;;  %vm765_vm7 = vcmp.ge.f32.partialorder %v757_v41, 0.0  ;;  %v447_v11 = vld [vmem:[%s3352_s14 + $0x1f0] sm:$0x1] }
  0x6c   : > { %3060 = vmatprep.subr.bf16.mxu1 %v3871_v8  ;;  %v773_v24 = vmul.f32 0.1, %v757_v41  ;;  %v759_v7 = vadd.f32 %v3860_v63, %v751_v29  ;;  %v1561_v56 = vsel %vm1075_vm2, %v1559_v35, %v1560_v31  ;;  %vm766_vm8 = vcmp.ge.f32.partialorder %v758_v26, 0.0 }
  0x6d   : > { %3005 = vmatmul.mubr.bf16.vlgmr.msra.gmra.mxu0 %v1393_v34  ;;  %v780_v60 = vsel %vm764_vm6, %v756_v3, %v772_v0  ;;  %v774_v33 = vmul.f32 0.1, %v758_v26  ;;  %v1583_v5 = vpack.c.bf16 %v1561_v56, %v1558_v13  ;;  %v657_v14 = vmul.f32 %v3880_v57, %v429_v62  ;;  %v3204_v62 = vld [vmem:[%s4164_s3 + $0x1e8] sm:$0xff]  }
  0x6e   : > { %3037 = vmatpush3.bf16.msra.mxu0 %v3199_v17  ;;  %v781_v21 = vsel %vm765_vm7, %v757_v41, %v773_v24  ;;  %vm767_vm10 = vcmp.ge.f32.partialorder %v759_v7, 0.0  ;;  %v775_v23 = vmul.f32 0.1, %v759_v7  ;;  %v659_v29 = vmul.f32 %v3880_v57, %v435_v30 }
  0x6f   : > { %3038 = vmatprep.subr.bf16.mxu0 %v3201_v15  ;;  %v1394_v34 = vpack.c.bf16 %v781_v21, %v780_v60  ;;  %v782_v35 = vsel %vm766_vm8, %v758_v26, %v774_v33  ;;  %v740_v3 = vsel %vm558_vm0, %v3778_v42, 0.0  ;;  %v3922_v17 = vsel %vm558_vm0, %v3791_v27, 0.0  ;;  %3029 = vmatmul.mubr.bf16.vlgmr.msra.gmra.mxu1 %v1583_v5 }
  0x70   : > { %v783_v41 = vsel %vm767_vm10, %v759_v7, %v775_v23  ;;  %v661_v31 = vmul.f32 %v3880_v57, %v441_v51  ;;  %3061 = vmatpush3.bf16.msra.mxu1 %v3871_v8  ;;  %v673_v30 = vadd.f32 %v3860_v63, %v657_v14  ;;  %v675_v42 = vadd.f32 %v3860_v63, %v659_v29  ;;  %v3205_v51 = vld [vmem:[%s4164_s3 + $0x1a0] sm:$0xff]   ;;  %v3207_v14 = vld [vmem:[%s4164_s3 + $0x198] sm:$0xff]  }
  0x71   : > { %3008 = vmatprep.mubr.bf16.mxu0 %v1394_v34  ;;  %v1395_v0 = vpack.c.bf16 %v783_v41, %v782_v35  ;;  %3062 = vmatprep.subr.bf16.mxu1 %v3202_v25  ;;  %v1565_v27 = vrot.slane %v3797_v20, 1  ;;  %v663_v26 = vmul.f32 %v3880_v57, %v447_v11  ;;  %v2685_v13 = vpack.c.bf16 %v3567_v28, %v3516_v44  ;;  %v3218_v44 = vld [vmem:[%s4164_s3 + $0x220] sm:$0xff]  }
  0x72   : > { %3039 = vmatpush3.bf16.msra.mxu0 %v3201_v15  ;;  %v677_v8 = vadd.f32 %v3860_v63, %v661_v31  ;;  %vm689_vm0 = vcmp.ge.f32.partialorder %v673_v30, 0.0  ;;  %vm691_vm11 = vcmp.ge.f32.partialorder %v675_v42, 0.0  ;;  %v705_v24 = vmul.f32 0.1, %v673_v30 }
  0x73   : > { %3040 = vmatprep.subr.bf16.mxu0 %v3203_v49  ;;  %v707_v12 = vmul.f32 0.1, %v675_v42  ;;  %v679_v15 = vadd.f32 %v3860_v63, %v663_v26  ;;  %v1568_v7 = vrot.slane %v740_v3, 1  ;;  %v2014_v33 = vpack.c.bf16 %v3618_v59, %v3606_v19 }
  0x74   : > { %vm693_vm12 = vcmp.ge.f32.partialorder %v677_v8, 0.0  ;;  %v709_v20 = vmul.f32 0.1, %v677_v8  ;;  %3063 = vmatpush3.bf16.msra.mxu1 %v3202_v25  ;;  %v721_v56 = vsel %vm689_vm0, %v673_v30, %v705_v24  ;;  %v3206_v25 = vld [vmem:[%s4164_s3 + $0x1e0] sm:$0xff]   ;;  %v1571_v41 = vrot.slane %v3922_v17, 1  ;;  %v3209_v17 = vld [vmem:[%s4164_s3 + $0x190] sm:$0xff]  }
  0x75   : > { %3009 = vmatmul.mubr.bf16.gmra.mxu0 %v1395_v0  ;;  %v723_v60 = vsel %vm691_vm11, %v675_v42, %v707_v12  ;;  %3064 = vmatprep.subr.bf16.mxu1 %v3204_v62  ;;  %v737_v11 = vsel %vm565_vm1, %v721_v56, 0.0  ;;  %vm695_vm13 = vcmp.ge.f32.partialorder %v679_v15, 0.0  ;;  %v711_v21 = vmul.f32 0.1, %v679_v15  ;;  %v3208_v42 = vld [vmem:[%s4164_s3 + $0x1d8] sm:$0xff]   ;;  %v3213_v24 = vld [vmem:[%s4164_s3 + $0x180] sm:$0xff]  }
  0x76   : > { %v739_v5 = vsel %vm565_vm1, %v723_v60, 0.0  ;;  %3041 = vmatpush3.bf16.msra.mxu0 %v3203_v49  ;;  %v1563_v23 = vrot.slane %v737_v11, 1  ;;  %v725_v35 = vsel %vm693_vm12, %v677_v8, %v709_v20  ;;  %3052 = vmatprep.mubr.msk.bf16.mxu0 %vm3435_vm9, %v2679_v50  ;;  %v2016_v49 = vpack.c.bf16 %v3741_v47, %v3712_v22  ;;  %v3212_v8 = vld [vmem:[%s4164_s3 + $0x1c8] sm:$0xff]  }
  0x77   : > { %v1566_v34 = vrot.slane %v739_v5, 1  ;;  %3042 = vmatprep.subr.bf16.mxu0 %v3205_v51  ;;  %v727_v29 = vsel %vm695_vm13, %v679_v15, %v711_v21  ;;  %v741_v3 = vsel %vm565_vm1, %v725_v35, 0.0 }
  0x78   : > { %v1564_v31 = vsel %vm1075_vm2, %v1562_v16, %v1563_v23  ;;  %3065 = vmatpush3.bf16.msra.mxu1 %v3204_v62  ;;  %v743_v46 = vsel %vm565_vm1, %v727_v29, 0.0  ;;  %v1569_v48 = vrot.slane %v741_v3, 1  ;;  %v3210_v16 = vld [vmem:[%s4164_s3 + $0x1d0] sm:$0xff]  }
  0x79   : > { %v1567_v0 = vsel %vm1075_vm2, %v1565_v27, %v1566_v34  ;;  %v1572_v50 = vrot.slane %v743_v46, 1  ;;  %3066 = vmatprep.subr.bf16.mxu1 %v3206_v25  ;;  %v3211_v27 = vld [vmem:[%s4164_s3 + $0x188] sm:$0xff]  }
  0x7a   : > { %v1584_v30 = vpack.c.bf16 %v1567_v0, %v1564_v31  ;;  %3043 = vmatpush3.bf16.msra.mxu0 %v3205_v51  ;;  %v1570_v26 = vsel %vm1075_vm2, %v1568_v7, %v1569_v48  ;;  %v449_v51 = vld [vmem:[%s3352_s14 + $0x208] sm:$0xff] }
  0x7b   : > { %3044 = vmatprep.subr.bf16.mxu0 %v3207_v14  ;;  %v1573_v6 = vsel %vm1075_vm2, %v1571_v41, %v1572_v50  ;;  %v596_v12 = vmul.f32 %v3880_v57, %v449_v51  ;;  %v3216_v57 = vld [vmem:[%s4164_s3 + $0x230] sm:$0xff]  }
  0x7c   : > { %3032 = vmatprep.mubr.bf16.mxu1 %v1584_v30  ;;  %v1585_v62 = vpack.c.bf16 %v1573_v6, %v1570_v26  ;;  %3067 = vmatpush3.bf16.msra.mxu1 %v3206_v25 }
  0x7d   : > { %3068 = vmatprep.subr.bf16.mxu1 %v3208_v42 }
  0x7e   : > { %3045 = vmatpush3.bf16.msra.mxu0 %v3207_v14  ;;  %3033 = vmatmul.mubr.bf16.gmra.mxu1 %v1585_v62 }
  0x7f   : > { %3046 = vmatprep.subr.bf16.mxu0 %v3209_v17  ;;  %3076 = vmatprep.mubr.bf16.mxu1 %v1866_v45  ;;  %v605_v45 = vadd.f32 %v3860_v63, %v596_v12  ;;  %v3217_v63 = vld [vmem:[%s4164_s3 + $0x228] sm:$0xff]  }
  0x80   : > { %3069 = vmatpush3.bf16.msra.mxu1 %v3208_v42 }
  0x81   : > { %3070 = vmatprep.subr.bf16.mxu1 %v3210_v16  ;;  %v623_v15 = vmul.f32 0.1, %v605_v45  ;;  %vm614_vm1 = vcmp.ge.f32.partialorder %v605_v45, 0.0 }
  0x82   : > { %3047 = vmatpush3.bf16.msra.mxu0 %v3209_v17 }
  0x83   : > { %3048 = vmatprep.subr.bf16.mxu0 %v3211_v27  ;;  %v632_v43 = vsel %vm614_vm1, %v605_v45, %v623_v15 }
  0x84   : > { %3071 = vmatpush3.bf16.msra.mxu1 %v3210_v16 }
  0x85   : > { %3072 = vmatprep.subr.bf16.mxu1 %v3212_v8 }
  0x86   : > { %3049 = vmatpush3.bf16.msra.mxu0 %v3211_v27 }
  0x87   : > { %3050 = vmatprep.subr.bf16.mxu0 %v3213_v24 }
  0x88   : > { %3073 = vmatpush3.bf16.msra.mxu1 %v3212_v8 }
  0x89   : > { %3074 = vmatprep.subr.bf16.mxu1 %v3214_v39 }
  0x8a   : > { %3051 = vmatpush3.bf16.msra.mxu0 %v3213_v24 }
  0x8b   : > { %3084 = vmatprep.subr.bf16.mxu0 %v3215_v40 }
  0x8c   : > { %3075 = vmatpush3.bf16.msra.mxu1 %v3214_v39 }
  0x8d   : > { %3053 = vmatmul.mubr.msk.bf16.vlgmr.msra.gmra.mxu0 %vm3435_vm9, %v2682_v52  ;;  %3108 = vmatprep.subr.bf16.mxu1 %v3215_v40  ;;  %v1869_v52 = vpack.c.bf16 %v632_v43, %v3534_v61 }
  0x8e   : > { %3085 = vmatpush3.bf16.msra.mxu0 %v3215_v40  ;;  %3056 = vmatprep.mubr.msk.bf16.mxu0 %vm3435_vm9, %v2685_v13 }
  0x8f   : > { %3086 = vmatprep.subr.bf16.mxu0 %v3216_v57  ;;  %3077 = vmatmul.mubr.bf16.vlgmr.msra.gmra.mxu1 %v1867_v37  ;;  %v4172_v37 = vpack.c.bf16 %v3702_v4, %v3629_v1 }
  0x90   : > { %3116 = vmatpush3.bf16.msra.mxu1 %v3215_v40  ;;  %3080 = vmatprep.mubr.bf16.mxu1 %v1868_v2 }
  0x91   : > { %3109 = vmatprep.subr.bf16.mxu1 %v3216_v57 }
  0x92   : > { %3087 = vmatpush3.bf16.msra.mxu0 %v3216_v57 }
  0x93   : > { %3088 = vmatprep.subr.bf16.mxu0 %v3217_v63 }
  0x94   : > { %3117 = vmatpush3.bf16.msra.mxu1 %v3216_v57 }
  0x95   : > { %3057 = vmatmul.mubr.msk.bf16.gmra.mxu0 %vm3435_vm9, %v2688_v55  ;;  %3110 = vmatprep.subr.bf16.mxu1 %v3217_v63 }
  0x96   : > { %3089 = vmatpush3.bf16.msra.mxu0 %v3217_v63  ;;  %3100 = vmatprep.mubr.bf16.mxu0 %v2014_v33 }
  0x97   : > { %3090 = vmatprep.subr.bf16.mxu0 %v3218_v44  ;;  %3081 = vmatmul.mubr.bf16.gmra.mxu1 %v1869_v52 }
  0x98   : > { %3118 = vmatpush3.bf16.msra.mxu1 %v3217_v63  ;;  %3104 = vmatprep.mubr.bf16.mxu1 %v2016_v49 }
  0x99   : > { %3111 = vmatprep.subr.bf16.mxu1 %v3218_v44 }
  0x9a   : > { %3091 = vmatpush3.bf16.msra.mxu0 %v3218_v44 }
  0x9b   : > { %3092 = vmatprep.subr.bf16.mxu0 %v3219_v53 }
  0x9c   : > { %3119 = vmatpush3.bf16.msra.mxu1 %v3218_v44 }
  0x9d   : > { %3112 = vmatprep.subr.bf16.mxu1 %v3219_v53 }
  0x9e   : > { %3093 = vmatpush3.bf16.msra.mxu0 %v3219_v53 }
  0x9f   : > { %3094 = vmatprep.subr.bf16.mxu0 %v3220_v58 }
  0xa0   : > { %3120 = vmatpush3.bf16.msra.mxu1 %v3219_v53 }
  0xa1   : > { %3113 = vmatprep.subr.bf16.mxu1 %v3220_v58 }
  0xa2   : > { %3095 = vmatpush3.bf16.msra.mxu0 %v3220_v58 }
  0xa3   : > { %3096 = vmatprep.subr.bf16.mxu0 %v3221_v32 }
  0xa4   : > { %3121 = vmatpush3.bf16.msra.mxu1 %v3220_v58 }
  0xa5   : > { %3114 = vmatprep.subr.bf16.mxu1 %v3221_v32 }
  0xa6   : > { %3097 = vmatpush3.bf16.msra.mxu0 %v3221_v32 }
  0xa7   : > { %3098 = vmatprep.subr.bf16.mxu0 %v3222_v36 }
  0xa8   : > { %3122 = vmatpush3.bf16.msra.mxu1 %v3221_v32 }
  0xa9   : > { %3115 = vmatprep.subr.bf16.mxu1 %v3222_v36 }
  0xaa   : > { %3099 = vmatpush3.bf16.msra.mxu0 %v3222_v36 }
  0xac   : > { %3123 = vmatpush3.bf16.msra.mxu1 %v3222_v36 }
  0xad   : > { %3101 = vmatmul.mubr.bf16.vlgmr.msra.gmra.mxu0 %v4172_v37 }
  0xaf   : > { %3105 = vmatmul.mubr.bf16.vlgmr.msra.gmra.mxu1 %v4173_v54 }
  0xed   : > { %v2910_v61 = vpop.f32.mrf.mxu0 }
  0xee   : > { %v2934_v2 = vpop.f32.mrf.mxu1 }
  0xef   : > { %v915_v28 = vpop.f32.mrf.mxu0  ;;  %v1037_v53 = vadd.f32 %v2934_v2, %v2910_v61 }
  0xf0   : > { %v1028_v38 = vpop.f32.mrf.mxu1 }
  0xf1   : > { %v2911_v19 = vpop.f32.mrf.mxu0  ;;  %v1029_v43 = vadd.f32 %v1028_v38, %v915_v28 }
  0xf2   : > { %v2935_v59 = vpop.f32.mrf.mxu1 }
  0xf3   : > { %v918_v10 = vpop.f32.mrf.mxu0  ;;  %v1040_v36 = vadd.f32 %v2935_v59, %v2911_v19 }
  0xf4   : > { %v1031_v47 = vpop.f32.mrf.mxu1 }
  0xf5   : > { %v4054_v22 = vpop.f32.mrf.mxu0  ;;  %v1032_v58 = vadd.f32 %v1031_v47, %v918_v10 }
  0xf7   : > { %v931_v20 = vpop.f32.mrf.mxu0 }
  0xf9   : > { %v4058_v1 = vpop.f32.mrf.mxu0 }
  0xfa   : > { %4174 = vst [vmem:[#allocation2_spill] sm:$0xff] %v4058_v1 }
  0xfb   : > { %v934_v18 = vpop.f32.mrf.mxu0 }
  0xfc   : > { %v4056_v13 = vpop.f32.mrf.mxu1 }
  0xfd   : > { %v1053_v61 = vadd.f32 %v4056_v13, %v4054_v22 }
  0xfe   : > { %v1044_v7 = vpop.f32.mrf.mxu1 }
 0x100   : > { %v4060_v4 = vpop.f32.mrf.mxu1 }
 0x101   : > { %4175 = vst [vmem:[#allocation3_spill] sm:$0xff] %v4060_v4 }
 0x102   : > { %v1047_v56 = vpop.f32.mrf.mxu1 }
 0x10d   : > { %v2958_v9 = vpop.f32.mrf.mxu0 }
 0x10e   : > { %v2982_v60 = vpop.f32.mrf.mxu1  ;;  %v1244_v37 = vadd.f32 %v2958_v9, %v1037_v53  ;;  %v4183_v9 = vld [vmem:[#allocation2_spill] sm:$0xff] }
 0x10f   : > { %v1211_v33 = vpop.f32.mrf.mxu0 }
 0x110   : > { %v1353_v11 = vpop.f32.mrf.mxu1  ;;  %v1242_v32 = vadd.f32 %v1211_v33, %v1029_v43  ;;  %v4184_v33 = vld [vmem:[#allocation3_spill] sm:$0xff] }
 0x111   : > { %v2959_v5 = vpop.f32.mrf.mxu0 }
 0x112   : > { %v2983_v21 = vpop.f32.mrf.mxu1 }
 0x113   : > { %v1214_v25 = vpop.f32.mrf.mxu0 }
 0x114   : > { %v1356_v23 = vpop.f32.mrf.mxu1  ;;  %v1243_v54 = vadd.f32 %v1214_v25, %v1032_v58 }
 0x116   : > { %v1385_v1 = vadd.f32 %v1356_v23, %v1243_v54 }
 0x117   : > { %v2962_v34 = vpop.f32.mrf.mxu0 }
 0x119   : > { %v1227_v14 = vpop.f32.mrf.mxu0 }
 0x11b   : > { %v2963_v29 = vpop.f32.mrf.mxu0 }
 0x11c   : > { %v4062_v35 = vpop.f32.mrf.mxu1 }
 0x11d   : > { %4176 = vst [vmem:[#allocation4_spill] sm:$0xff] %v4062_v35  ;;  %v1230_v41 = vpop.f32.mrf.mxu0  ;;  %v1048_v35 = vadd.f32 %v1047_v56, %v934_v18 }
 0x11e   : > { %v1369_v49 = vpop.f32.mrf.mxu1 }
 0x11f   : > { %v1247_v2 = vadd.f32 %v1230_v41, %v1048_v35 }
 0x120   : > { %v4064_v3 = vpop.f32.mrf.mxu1 }
 0x121   : > { %4177 = vst [vmem:[#allocation5_spill] sm:$0xff] %v4064_v3  ;;  %v1384_v3 = vadd.f32 %v1353_v11, %v1242_v32 }
 0x122   : > { %v1372_v0 = vpop.f32.mrf.mxu1 }
 0x123   : > { %v1389_v25 = vadd.f32 %v1372_v0, %v1247_v2 }
 0x124   : > { %v4185_v13 = vld [vmem:[#allocation4_spill] sm:$0xff] }
 0x12d   : > { %v3006_v31 = vpop.f32.mrf.mxu0 }
 0x12f   : > { %v3030_v46 = vpop.f32.mrf.mxu1  ;;  %v1495_v48 = vpop.f32.mrf.mxu0 }
 0x130   : > { %v1526_v28 = vadd.f32 %v1495_v48, %v1384_v3 }
 0x131   : > { %v1685_v30 = vpop.f32.mrf.mxu1  ;;  %v3007_v50 = vpop.f32.mrf.mxu0 }
 0x132   : > { %v1716_v18 = vadd.f32 %v1685_v30, %v1526_v28 }
 0x133   : > { %v3031_v42 = vpop.f32.mrf.mxu1  ;;  %v1498_v26 = vpop.f32.mrf.mxu0 }
 0x134   : > { %v1527_v47 = vadd.f32 %v1498_v26, %v1385_v1 }
 0x135   : > { %v1688_v17 = vpop.f32.mrf.mxu1  ;;  %v3010_v6 = vpop.f32.mrf.mxu0 }
 0x136   : > { %v1717_v48 = vadd.f32 %v1688_v17, %v1527_v47 }
 0x137   : > { %v1511_v16 = vpop.f32.mrf.mxu0 }
 0x139   : > { %v4068_v8 = vpop.f32.mrf.mxu0 }
 0x13a   : > { %4179 = vst [vmem:[#allocation7_spill] sm:$0xff] %v4068_v8  ;;  %v1245_v8 = vadd.f32 %v2959_v5, %v1040_v36 }
 0x13b   : > { %v1514_v24 = vpop.f32.mrf.mxu0 }
 0x13c   : > { %v1387_v19 = vadd.f32 %v2983_v21, %v1245_v8  ;;  %v1531_v21 = vadd.f32 %v1514_v24, %v1389_v25 }
 0x13e   : > { %v4066_v62 = vpop.f32.mrf.mxu1  ;;  %v1529_v11 = vadd.f32 %v3007_v50, %v1387_v19 }
 0x13f   : > { %4178 = vst [vmem:[#allocation6_spill] sm:$0xff] %v4066_v62  ;;  %v1045_v62 = vadd.f32 %v1044_v7, %v931_v20  ;;  %v1056_v20 = vadd.f32 %v4184_v33, %v4183_v9  ;;  %v1248_v7 = vadd.f32 %v2962_v34, %v1053_v61  ;;  %v4186_v34 = vld [vmem:[#allocation5_spill] sm:$0xff] }
 0x140   : > { %v1701_v27 = vpop.f32.mrf.mxu1  ;;  %v1719_v1 = vadd.f32 %v3031_v42, %v1529_v11 }
 0x141   : > { %v1246_v4 = vadd.f32 %v1227_v14, %v1045_v62  ;;  %v1390_v35 = vadd.f32 %v4185_v13, %v1248_v7  ;;  %v4187_v8 = vld [vmem:[#allocation7_spill] sm:$0xff] }
 0x142   : > { %v4070_v51 = vpop.f32.mrf.mxu1 }
 0x143   : > { %4180 = vst [vmem:[#allocation8_spill] sm:$0xff] %v4070_v51  ;;  %v1388_v5 = vadd.f32 %v1369_v49, %v1246_v4  ;;  %v1532_v49 = vadd.f32 %v3010_v6, %v1390_v35 }
 0x144   : > { %v1704_v39 = vpop.f32.mrf.mxu1 }
 0x145   : > { %v1530_v23 = vadd.f32 %v1511_v16, %v1388_v5  ;;  %v1721_v17 = vadd.f32 %v1704_v39, %v1531_v21 }
 0x147   : > { %v1720_v30 = vadd.f32 %v1701_v27, %v1530_v23 }
 0x14a   : > { %v4191_v39 = vld [vmem:[#allocation8_spill] sm:$0xff] }
 0x14d   : > { %v3054_v12 = vpop.f32.mrf.mxu0 }
 0x14f   : > { %v4072_v40 = vpop.f32.mrf.mxu1  ;;  %v1827_v45 = vpop.f32.mrf.mxu0 }
 0x150   : > { %4181 = vst [vmem:[#allocation9_spill] sm:$0xff] %v4072_v40  ;;  %v1858_v22 = vadd.f32 %v1827_v45, %v1716_v18 }
 0x151   : > { %v1969_v57 = vpop.f32.mrf.mxu1  ;;  %v3055_v15 = vpop.f32.mrf.mxu0 }
 0x152   : > { %v2000_v0 = vadd.f32 %v1969_v57, %v1858_v22 }
 0x153   : > { %v4074_v63 = vpop.f32.mrf.mxu1  ;;  %v1830_v55 = vpop.f32.mrf.mxu0 }
 0x154   : > { %4182 = vst [vmem:[#allocation10_spill] sm:$0xff] %v4074_v63  ;;  %v1386_v63 = vadd.f32 %v2982_v60, %v1244_v37  ;;  %v1249_v60 = vadd.f32 %v2963_v29, %v1056_v20  ;;  %v1859_v26 = vadd.f32 %v1830_v55, %v1717_v48  ;;  %v1861_v29 = vadd.f32 %v3055_v15, %v1719_v1  ;;  %v4189_v55 = vld [vmem:[#allocation6_spill] sm:$0xff] }
 0x155   : > { %v1972_v44 = vpop.f32.mrf.mxu1  ;;  %v4076_v52 = vpop.f32.mrf.mxu0  ;;  %v1722_v58 = vadd.f32 %v4189_v55, %v1532_v49  ;;  %v2740_v55 = vld [vmem:[%s4167_s6] ss:$0 sm:$0xff] }
 0x156   : > { %v1528_v59 = vadd.f32 %v3006_v31, %v1386_v63  ;;  %v1391_v4 = vadd.f32 %v4186_v34, %v1249_v60  ;;  %v2001_v53 = vadd.f32 %v1972_v44, %v1859_v26 }
 0x157   : > { %v4078_v51 = vpop.f32.mrf.mxu1  ;;  %v1843_v40 = vpop.f32.mrf.mxu0  ;;  %v4188_v43 = vld [vmem:[#allocation9_spill] sm:$0xff]  ;;  %v1864_v54 = vadd.f32 %v4076_v52, %v1722_v58 }
 0x158   : > { %v1718_v3 = vadd.f32 %v3030_v46, %v1528_v59  ;;  %v1533_v46 = vadd.f32 %v4187_v8, %v1391_v4  ;;  %v1862_v45 = vadd.f32 %v1843_v40, %v1720_v30 }
 0x159   : > { %v1985_v38 = vpop.f32.mrf.mxu1  ;;  %v3059_v10 = vpop.f32.mrf.mxu0  ;;  %v2006_v7 = vadd.f32 %v4078_v51, %v1864_v54 }
 0x15a   : > { %v1860_v31 = vadd.f32 %v3054_v12, %v1718_v3  ;;  %v1723_v40 = vadd.f32 %v4191_v39, %v1533_v46  ;;  %v2004_v28 = vadd.f32 %v1985_v38, %v1862_v45 }
 0x15b   : > { %v3083_v56 = vpop.f32.mrf.mxu1  ;;  %v1846_v14 = vpop.f32.mrf.mxu0  ;;  %v4190_v27 = vld [vmem:[#allocation10_spill] sm:$0xff] }
 0x15c   : > { %v2002_v24 = vadd.f32 %v4188_v43, %v1860_v31  ;;  %v1863_v32 = vadd.f32 %v1846_v14, %v1721_v17  ;;  %v2003_v36 = vadd.f32 %v4190_v27, %v1861_v29  ;;  %v1865_v59 = vadd.f32 %v3059_v10, %v1723_v40 }
 0x15d   : > { %v1988_v62 = vpop.f32.mrf.mxu1 }
 0x15e   : > { %v2005_v47 = vadd.f32 %v1988_v62, %v1863_v32  ;;  %v2007_v10 = vadd.f32 %v3083_v56, %v1865_v59 }
 0x16d   : > { %v3102_v41 = vpop.f32.mrf.mxu0 }
 0x16e   : > { %v4092_v15 = vadd.f32 %v3102_v41, %v2002_v24 }
 0x16f   : > { %v2117_v50 = vpop.f32.mrf.mxu0  ;;  %v3106_v16 = vpop.f32.mrf.mxu1 }
 0x170   : > { %v4088_v42 = vadd.f32 %v2117_v50, %v2000_v0  ;;  %v2173_v33 = vmul.f32 %v4092_v15, %v4092_v15  ;;  %v2154_v25 = vadd.f32 %v3106_v16, %v2006_v7  ;;  %v2253_v58 = vmul.f32 %v2740_v55, %v4092_v15 }
 0x171   : > { %v3103_v63 = vpop.f32.mrf.mxu0  ;;  %v2133_v12 = vpop.f32.mrf.mxu1 }
 0x172   : > { %v2171_v44 = vmul.f32 %v4088_v42, %v4088_v42  ;;  %v4100_v61 = vadd.f32 %v3103_v63, %v2003_v36  ;;  %v4108_v20 = vadd.f32 %v2133_v12, %v2004_v28  ;;  %v2177_v51 = vmul.f32 %v2154_v25, %v2154_v25 }
 0x173   : > { %v2120_v6 = vpop.f32.mrf.mxu0  ;;  %v3107_v57 = vpop.f32.mrf.mxu1  ;;  %v2257_v32 = vmul.f32 %v2740_v55, %v2154_v25 }
 0x174   : > { %v4094_v37 = vadd.f32 %v2120_v6, %v2001_v53  ;;  %v2174_v5 = vmul.f32 %v4100_v61, %v4100_v61  ;;  %v2175_v23 = vmul.f32 %v4108_v20, %v4108_v20  ;;  %v2155_v48 = vadd.f32 %v3107_v57, %v2007_v10 }
 0x175   : > { %v2136_v9 = vpop.f32.mrf.mxu1  ;;  %v2251_v6 = vmul.f32 %v2740_v55, %v4088_v42  ;;  %v2254_v27 = vmul.f32 %v2740_v55, %v4100_v61  ;;  %v2255_v36 = vmul.f32 %v2740_v55, %v4108_v20 }
 0x176   : > { %v2156_v2 = vadd.f32 %v4094_v37, %v4088_v42  ;;  %v2172_v19 = vmul.f32 %v4094_v37, %v4094_v37  ;;  %v2153_v18 = vadd.f32 %v2136_v9, %v2005_v47  ;;  %v2178_v1 = vmul.f32 %v2155_v48, %v2155_v48 }
 0x177   : > { %v2258_v57 = vmul.f32 %v2740_v55, %v2155_v48  ;;  %v2252_v39 = vmul.f32 %v2740_v55, %v4094_v37 }
 0x178   : > { %v2157_v52 = vadd.f32 %v2156_v2, %v4092_v15  ;;  %v2179_v38 = vadd.f32 %v2172_v19, %v2171_v44  ;;  %v2176_v13 = vmul.f32 %v2153_v18, %v2153_v18  ;;  %v2256_v40 = vmul.f32 %v2740_v55, %v2153_v18 }
 0x17a   : > { %v2180_v11 = vadd.f32 %v2179_v38, %v2173_v33  ;;  %v2158_v60 = vadd.f32 %v2157_v52, %v4100_v61  ;;  %v2738_v52 = vld [vmem:[%s4165_s4] ss:$0 sm:$0xff] }
 0x17c   : > { %v2159_v14 = vadd.f32 %v2158_v60, %v4108_v20  ;;  %v2181_v3 = vadd.f32 %v2180_v11, %v2174_v5 }
 0x17e   : > { %v2160_v22 = vadd.f32 %v2159_v14, %v2153_v18  ;;  %v2182_v35 = vadd.f32 %v2181_v3, %v2175_v23 }
 0x180   : > { %v2161_v21 = vadd.f32 %v2160_v22, %v2154_v25  ;;  %v2183_v41 = vadd.f32 %v2182_v35, %v2176_v13 }
 0x182   : > { %v2162_v31 = vadd.f32 %v2161_v21, %v2155_v48  ;;  %v2184_v26 = vadd.f32 %v2183_v41, %v2177_v51 }
 0x184   : > { %v2163_v62 = vrot.slane %v2162_v31, 4  ;;  %v2185_v34 = vadd.f32 %v2184_v26, %v2178_v1  ;;  %v2741_v26 = vld [vmem:[%s4168_s7] ss:$0 sm:$0xff] }
 0x186   : > { %v2164_v56 = vadd.f32 %v2163_v62, %v2162_v31  ;;  %v2186_v4 = vrot.slane %v2185_v34, 4 }
 0x188   : > { %v2165_v49 = vrot.slane %v2164_v56, 2  ;;  %v2187_v30 = vadd.f32 %v2186_v4, %v2185_v34 }
 0x18a   : > { %v2166_v50 = vadd.f32 %v2165_v49, %v2164_v56  ;;  %v2188_v29 = vrot.slane %v2187_v30, 2 }
 0x18c   : > { %v2167_v0 = vrot.slane %v2166_v50, 1  ;;  %v2189_v16 = vadd.f32 %v2188_v29, %v2187_v30 }
 0x18e   : > { %v2168_v8 = vadd.f32 %v2167_v0, %v2166_v50  ;;  %v2190_v46 = vrot.slane %v2189_v16, 1 }
 0x190   : > { %v2170_v17 = vmul.f32 0.015625, %v2168_v8  ;;  %v2191_v45 = vadd.f32 %v2190_v46, %v2189_v16 }
 0x192   : > { %v2192_v63 = vmul.f32 0.015625, %v2191_v45  ;;  %v2193_v43 = vmul.f32 %v2170_v17, %v2170_v17  ;;  %v2196_v54 = vsub.f32 %v4088_v42, %v2170_v17  ;;  %v2197_v28 = vsub.f32 %v4094_v37, %v2170_v17 }
 0x193   : > { %v2198_v44 = vsub.f32 %v4092_v15, %v2170_v17  ;;  %v2199_v2 = vsub.f32 %v4100_v61, %v2170_v17  ;;  %v2200_v59 = vsub.f32 %v4108_v20, %v2170_v17  ;;  %v2201_v47 = vsub.f32 %v2153_v18, %v2170_v17  ;;  %v2739_v61 = vld [vmem:[%s4166_s5] ss:$0 sm:$0xff] }
 0x194   : > { %v2194_v24 = vsub.f32 %v2192_v63, %v2193_v43  ;;  %v2202_v9 = vsub.f32 %v2154_v25, %v2170_v17  ;;  %v2203_v33 = vsub.f32 %v2155_v48, %v2170_v17 }
 0x196   : > { %v2195_v53 = vmax.f32 %v2194_v24, 0.0 }
 0x198   : > { %v2204_v12 = vadd.f32 1e-05, %v2195_v53 }
 0x19a   : > { %3223 = vrsqrt.f32 %v2204_v12 }
 0x1a7   : > { %v3224_v19 = vpop.eup %3223 }
 0x1a8   : > { %v2206_v38 = vmul.f32 %v3224_v19, %v2196_v54  ;;  %v2207_v7 = vmul.f32 %v3224_v19, %v2197_v28  ;;  %v2208_v5 = vmul.f32 %v3224_v19, %v2198_v44  ;;  %v2209_v42 = vmul.f32 %v3224_v19, %v2199_v2 }
 0x1a9   : > { %v2210_v11 = vmul.f32 %v3224_v19, %v2200_v59  ;;  %v2211_v37 = vmul.f32 %v3224_v19, %v2201_v47  ;;  %v2212_v60 = vmul.f32 %v3224_v19, %v2202_v9  ;;  %v2213_v15 = vmul.f32 %v3224_v19, %v2203_v33 }
 0x1aa   : > { %v2221_v20 = vmul.f32 %v2738_v52, %v2206_v38  ;;  %v2222_v18 = vmul.f32 %v2738_v52, %v2207_v7  ;;  %v2223_v10 = vmul.f32 %v2738_v52, %v2208_v5  ;;  %v2224_v25 = vmul.f32 %v2738_v52, %v2209_v42 }
 0x1ab   : > { %v2225_v23 = vmul.f32 %v2738_v52, %v2210_v11  ;;  %v2226_v14 = vmul.f32 %v2738_v52, %v2211_v37  ;;  %v2227_v3 = vmul.f32 %v2738_v52, %v2212_v60  ;;  %v2228_v48 = vmul.f32 %v2738_v52, %v2213_v15 }
 0x1ac   : > { %v2236_v22 = vadd.f32 %v2739_v61, %v2221_v20  ;;  %v2237_v13 = vadd.f32 %v2739_v61, %v2222_v18  ;;  %v2238_v35 = vadd.f32 %v2739_v61, %v2223_v10  ;;  %v2239_v51 = vadd.f32 %v2739_v61, %v2224_v25 }
 0x1ad   : > { %v2240_v21 = vadd.f32 %v2739_v61, %v2225_v23  ;;  %v2241_v41 = vadd.f32 %v2739_v61, %v2226_v14  ;;  %v2242_v1 = vadd.f32 %v2739_v61, %v2227_v3  ;;  %v2243_v31 = vadd.f32 %v2739_v61, %v2228_v48 }
 0x1ae   : > { %v2259_v62 = vadd.f32 %v2251_v6, %v2236_v22  ;;  %v2260_v34 = vadd.f32 %v2252_v39, %v2237_v13  ;;  %v2261_v56 = vadd.f32 %v2253_v58, %v2238_v35  ;;  %v2262_v4 = vadd.f32 %v2254_v27, %v2239_v51 }
 0x1af   : > { %v2263_v49 = vadd.f32 %v2255_v36, %v2240_v21  ;;  %v2264_v30 = vadd.f32 %v2256_v40, %v2241_v41  ;;  %v2265_v50 = vadd.f32 %v2257_v32, %v2242_v1  ;;  %v2266_v29 = vadd.f32 %v2258_v57, %v2243_v31 }
 0x1b0   : > { %v2274_v0 = vadd.f32 %v2741_v26, %v2259_v62  ;;  %v2275_v16 = vadd.f32 %v2741_v26, %v2260_v34  ;;  %v2276_v8 = vadd.f32 %v2741_v26, %v2261_v56  ;;  %v2277_v46 = vadd.f32 %v2741_v26, %v2262_v4 }
 0x1b1   : > { %v2278_v17 = vadd.f32 %v2741_v26, %v2263_v49  ;;  %v2279_v45 = vadd.f32 %v2741_v26, %v2264_v30  ;;  %v2280_v63 = vadd.f32 %v2741_v26, %v2265_v50  ;;  %v2281_v43 = vadd.f32 %v2741_v26, %v2266_v29 }
 0x1b2   : > { %vm2282_vm9 = vcmp.ge.f32.partialorder %v2274_v0, 0.0  ;;  %vm2283_vm2 = vcmp.ge.f32.partialorder %v2275_v16, 0.0  ;;  %vm2284_vm14 = vcmp.ge.f32.partialorder %v2276_v8, 0.0  ;;  %vm2285_vm15 = vcmp.ge.f32.partialorder %v2277_v46, 0.0 }
 0x1b3   : > { %vm2286_vm3 = vcmp.ge.f32.partialorder %v2278_v17, 0.0  ;;  %vm2287_vm4 = vcmp.ge.f32.partialorder %v2279_v45, 0.0  ;;  %vm2288_vm5 = vcmp.ge.f32.partialorder %v2280_v63, 0.0  ;;  %vm2289_vm6 = vcmp.ge.f32.partialorder %v2281_v43, 0.0 }
 0x1b4   : > { %v2290_v24 = vmul.f32 0.1, %v2274_v0  ;;  %v2291_v53 = vmul.f32 0.1, %v2275_v16  ;;  %v2292_v12 = vmul.f32 0.1, %v2276_v8 }
 0x1b5   : > { %v2293_v55 = vmul.f32 0.1, %v2277_v46  ;;  %v2294_v58 = vmul.f32 0.1, %v2278_v17  ;;  %v2295_v32 = vmul.f32 0.1, %v2279_v45 }
 0x1b6   : > { %v2296_v6 = vmul.f32 0.1, %v2280_v63  ;;  %v2297_v27 = vmul.f32 0.1, %v2281_v43  ;;  %v2298_v36 = vsel %vm2282_vm9, %v2274_v0, %v2290_v24  ;;  %v2299_v57 = vsel %vm2283_vm2, %v2275_v16, %v2291_v53 }
 0x1b7   : > { %v2300_v39 = vsel %vm2284_vm14, %v2276_v8, %v2292_v12  ;;  %v2301_v40 = vsel %vm2285_vm15, %v2277_v46, %v2293_v55  ;;  %v2302_v54 = vsel %vm2286_vm3, %v2278_v17, %v2294_v58  ;;  %v2303_v28 = vsel %vm2287_vm4, %v2279_v45, %v2295_v32 }
 0x1b8   : > { %v2304_v44 = vsel %vm2288_vm5, %v2280_v63, %v2296_v6  ;;  %v2305_v2 = vsel %vm2289_vm6, %v2281_v43, %v2297_v27  ;;  %v2764_v19 = vpack.c.bf16 %v2299_v57, %v2298_v36  ;;  %v2769_v59 = vpack.c.bf16 %v2301_v40, %v2300_v39 }
 0x1b9   : > { %v2774_v47 = vpack.c.bf16 %v2303_v28, %v2302_v54  ;;  %v2779_v9 = vpack.c.bf16 %v2305_v2, %v2304_v44 }
 0x1ba   : > { %2765 = vst [vmem:[%s398_s27] sm:$0xff] %v2764_v19   ;;  %2781 = vst [vmem:[%s398_s27 + $0x8] sm:$0xff] %v2769_v59  }
 0x1bb   : > { %2782 = vst [vmem:[%s398_s27 + $0x10] sm:$0xff] %v2774_v47   ;;  %2783 = vst [vmem:[%s398_s27 + $0x18] sm:$0xff] %v2779_v9  }
 0x1bc PF: > { %s18_s29 = sadd.s32 1, %s3249_s29   ;;  %s4192_s27 = smov %s3245_s28 }
 0x1bd   : > { %p15_p5 = scmp.ge.s32.totalorder %s18_s29, 4   ;;  %s4193_s28 = smov %s4195_s30 }
 0x1bf   :  { %17 = sbr.rel (!%p15_p5) target bundleno = 2 (0x2), region = 105 }

// kernel: basic_block_forward.3
= control target key start
LH: loop header
LB: loop body
LE: loop exit
PB: predicated region body
PF: predicated region fallthrough
CT: control target
= control target key end

     0   :  { %s2820_s21 = smov 0   ;;  %s2822_s22 = smov 0   ;;  %s3457_s0 = inlined_call_operand.vmem [shape: bf16[2,10,10,128], index: 0, kind: input, shape index: {}]   ;;  %s3458_s1 = inlined_call_operand.vmem [shape: bf16[9,128,128], index: 1, kind: input, shape index: {}]   ;;  %s3459_s2 = inlined_call_operand.vmem [shape: f32[2,64,128], index: 2, kind: input, shape index: {}]   ;;  %s3460_s3 = inlined_call_operand.vmem [shape: bf16[128,128], index: 3, kind: input, shape index: {}]   ;;  %s3461_s4 = inlined_call_operand.vmem [shape: f32[1,128], index: 4, kind: input, shape index: {}]   ;;  %s3462_s5 = inlined_call_operand.vmem [shape: f32[1,128], index: 5, kind: input, shape index: {}]   ;;  %s3463_s6 = inlined_call_operand.vmem [shape: f32[2,64,128], index: 6, kind: output, shape index: {}]  }
   0x1   :  { %s2824_s23 = smov 0  }
   0x2 LB: > { %s28_s24 = sadd.s32 1, %s2779_s22  ;;  %p2058_p0 = scmp.ge.s32.totalorder %s2783_s23, 1  ;;  %s2783_s23 = sphi %s2824_s23, %s16_s23   ;;  %s2779_s22 = sphi %s2822_s22, %s3483_s22   ;;  %s2775_s21 = sphi %s2820_s21, %s3482_s21  }
   0x3   : > { %p30_p1 = scmp.ge.s32.totalorder %s28_s24, 2  ;;  %p254_p2 = scmp.lt.s32.totalorder %s2783_s23, 3 }
   0x5   : > { %s3485_s24 = smov (%p30_p1, %s28_s24), 0  ;;  %p255_p3 = pnand %p2058_p0, %p254_p2 }
   0x7   : > { %258 = sbr.rel (%p255_p3) target bundleno = 385 (0x181), region = 44 }
   0xc   : > { %v2672_v0 = vld [vmem:[%s3458_s1 + $0x78] sm:$0xff]   ;;  %p300_p4 = scmp.lt.s32.totalorder %s2775_s21, 1  ;;  %v2674_v2 = vld [vmem:[%s3458_s1 + $0x70] sm:$0xff]   ;;  %v2676_v4 = vld [vmem:[%s3458_s1 + $0x68] sm:$0xff]   ;;  %vm403_vm0 = vcmask 1046528   ;;  %vm683_vm1 = vcmask 1045504  }
   0xd   : > { %v2673_v1 = vld [vmem:[%s3458_s1 + $0x38] sm:$0xff]   ;;  %2407 = vmatprep.subr.bf16.mxu0 %v2672_v0  ;;  %v2675_v3 = vld [vmem:[%s3458_s1 + $0x30] sm:$0xff]   ;;  %v2677_v5 = vld [vmem:[%s3458_s1 + $0x28] sm:$0xff]  }
   0xe   : > { %2431 = vmatprep.subr.bf16.mxu1 %v2673_v1  ;;  %2408 = vmatpush3.bf16.msra.mxu0 %v2672_v0  ;;  %s3487_s21 = smov (!%p300_p4, %s2775_s21), 1  ;;  %v2678_v6 = vld [vmem:[%s3458_s1 + $0x60] sm:$0xff]   ;;  %v2680_v8 = vld [vmem:[%s3458_s1 + $0x58] sm:$0xff]   ;;  %v2682_v10 = vld [vmem:[%s3458_s1 + $0x50] sm:$0xff]  }
   0xf   : > { %2432 = vmatpush3.bf16.msra.mxu1 %v2673_v1  ;;  %2409 = vmatprep.subr.bf16.mxu0 %v2674_v2  ;;  %v2679_v7 = vld [vmem:[%s3458_s1 + $0x20] sm:$0xff]   ;;  %s2647_s17 = smul.u32 80, %s3487_s21  ;;  %v2681_v9 = vld [vmem:[%s3458_s1 + $0x18] sm:$0xff]   ;;  %v2683_v11 = vld [vmem:[%s3458_s1 + $0x10] sm:$0xff]   ;;  %s2285_s8 = sshll.u32 %s3487_s21, 6 }
  0x10   : > { %2433 = vmatprep.subr.bf16.mxu1 %v2675_v3  ;;  %v2684_v31 = vld [vmem:[%s3458_s1 + $0x48] sm:$0xff]   ;;  %v2686_v42 = vld [vmem:[%s3458_s1 + $0x40] sm:$0xff]   ;;  %v2690_v44 = vld [vmem:[%s3458_s1 + $0xb8] sm:$0xff]   ;;  %s3295_s15 = scalar_lea.vmem %s3459_s2, %s2285_s8  ;;  %s3435_s20 = scalar_lea.vmem %s3463_s6, %s2285_s8 }
  0x11   : > { %s2874_s28 = scalar_lea.vmem %s3457_s0, %s2647_s17  ;;  %v2685_v33 = vld [vmem:[%s3458_s1 + $0x8] sm:$0xff]   ;;  %v2687_v43 = vld [vmem:[%s3458_s1] sm:$0xff]   ;;  %v2691_v47 = vld [vmem:[%s3458_s1 + $0xf8] sm:$0xff]  }
  0x12   : > { %2410 = vmatpush3.bf16.msra.mxu0 %v2674_v2  ;;  %v327_v12 = vld [vmem:[%s2874_s28] sm:$0xf]  ;;  %v328_v13 = vld [vmem:[%s2874_s28 + $0x4] sm:$0x1]  ;;  %v2885_v14 = vld [vmem:[%s2874_s28 + $0x8] sm:$0xf] }
  0x13   : > { %2434 = vmatpush3.bf16.msra.mxu1 %v2675_v3  ;;  %2411 = vmatprep.subr.bf16.mxu0 %v2676_v4  ;;  %v330_v15 = vld [vmem:[%s2874_s28 + $0xc] sm:$0x1]  ;;  %v2889_v16 = vld [vmem:[%s2874_s28 + $0x10] sm:$0xf]  ;;  %v2892_v17 = vld [vmem:[%s2874_s28 + $0x14] sm:$0x1]  ;;  %v347_v18 = vunpack.c.l.bf16 %v327_v12  ;;  %v348_v19 = vunpack.c.l.bf16 %v328_v13  ;;  %v349_v20 = vunpack.c.l.bf16 %v2885_v14  ;;  %v2064_v21 = vcombine.low %v327_v12, %v2885_v14 }
  0x14   : > { %2435 = vmatprep.subr.bf16.mxu1 %v2677_v5  ;;  %v350_v22 = vunpack.c.l.bf16 %v330_v15  ;;  %v351_v23 = vunpack.c.l.bf16 %v2889_v16  ;;  %v352_v24 = vunpack.c.l.bf16 %v2892_v17  ;;  %v2899_v25 = vld [vmem:[%s2874_s28 + $0x18] sm:$0xf]  ;;  %v2902_v26 = vld [vmem:[%s2874_s28 + $0x1c] sm:$0x1]  ;;  %v2692_v53 = vld [vmem:[%s3458_s1 + $0xb0] sm:$0xff]  }
  0x15   : > { %v404_v27 = vrot.slane %v347_v18, 1  ;;  %v405_v28 = vrot.slane %v348_v19, 1  ;;  %v407_v29 = vrot.slane %v349_v20, 1  ;;  %2447 = vmatprep.mubr.bf16.mxu1 %v2064_v21  ;;  %v353_v30 = vunpack.c.l.bf16 %v2899_v25  ;;  %v2951_v54 = vld [vmem:[%s2874_s28 + $0x20] sm:$0xf]  ;;  %v2695_v21 = vld [vmem:[%s3458_s1 + $0xe8] sm:$0xff]  }
  0x16   : > { %2412 = vmatpush3.bf16.msra.mxu0 %v2676_v4  ;;  %v408_v32 = vrot.slane %v350_v22, 1  ;;  %v354_v35 = vunpack.c.l.bf16 %v2902_v26  ;;  %v410_v37 = vrot.slane %v351_v23, 1  ;;  %v411_v38 = vrot.slane %v352_v24, 1  ;;  %v2954_v55 = vld [vmem:[%s2874_s28 + $0x24] sm:$0x1] }
  0x17   : > { %2436 = vmatpush3.bf16.msra.mxu1 %v2677_v5  ;;  %2413 = vmatprep.subr.bf16.mxu0 %v2678_v6  ;;  %v406_v34 = vsel %vm403_vm0, %v404_v27, %v405_v28  ;;  %v413_v40 = vrot.slane %v353_v30, 1  ;;  %v684_v48 = vrot.slane %v347_v18, 2  ;;  %v685_v49 = vrot.slane %v348_v19, 2  ;;  %v2957_v56 = vld [vmem:[%s2874_s28 + $0x28] sm:$0xf] }
  0x18   : > { %2437 = vmatprep.subr.bf16.mxu1 %v2679_v7  ;;  %v2914_v36 = vsel %vm403_vm0, %v407_v29, %v408_v32  ;;  %v414_v41 = vrot.slane %v354_v35, 1  ;;  %v2935_v45 = vsel %vm403_vm0, %v410_v37, %v411_v38  ;;  %v687_v50 = vrot.slane %v349_v20, 2  ;;  %v2964_v58 = vld [vmem:[%s2874_s28 + $0x2c] sm:$0x1]  ;;  %v2970_v62 = vld [vmem:[%s2874_s28 + $0x30] sm:$0xf] }
  0x19   : > { %v436_v39 = vpack.c.bf16 %v2914_v36, %v406_v34  ;;  %v688_v51 = vrot.slane %v350_v22, 2  ;;  %v2961_v57 = vcombine.low %v2889_v16, %v2899_v25  ;;  %v355_v59 = vunpack.c.l.bf16 %v2951_v54  ;;  %v2973_v63 = vld [vmem:[%s2874_s28 + $0x34] sm:$0x1]  ;;  %v2981_v2 = vld [vmem:[%s2874_s28 + $0x38] sm:$0xf]  ;;  %v2694_v18 = vld [vmem:[%s3458_s1 + $0xa8] sm:$0xff]  }
  0x1a   : > { %2414 = vmatpush3.bf16.msra.mxu0 %v2678_v6  ;;  %v2938_v46 = vsel %vm403_vm0, %v413_v40, %v414_v41  ;;  %v356_v60 = vunpack.c.l.bf16 %v2954_v55  ;;  %v357_v61 = vunpack.c.l.bf16 %v2957_v56  ;;  %v358_v0 = vunpack.c.l.bf16 %v2964_v58  ;;  %v2984_v3 = vld [vmem:[%s2874_s28 + $0x3c] sm:$0x1]  ;;  %v2693_v6 = vld [vmem:[%s3458_s1 + $0xf0] sm:$0xff]   ;;  %v2696_v38 = vld [vmem:[%s3458_s1 + $0xa0] sm:$0xff]  }
  0x1b   : > { %2438 = vmatpush3.bf16.msra.mxu1 %v2679_v7  ;;  %2415 = vmatprep.subr.bf16.mxu0 %v2680_v8  ;;  %v2945_v52 = vpack.c.bf16 %v2938_v46, %v2935_v45  ;;  %v2978_v1 = vcombine.low %v2951_v54, %v2957_v56  ;;  %v359_v4 = vunpack.c.l.bf16 %v2970_v62  ;;  %v360_v5 = vunpack.c.l.bf16 %v2973_v63  ;;  %v2710_v55 = vld [vmem:[%s3458_s1 + $0x138] sm:$0xff]  }
  0x1c   : > { %2439 = vmatprep.subr.bf16.mxu1 %v2681_v9  ;;  %2423 = vmatprep.mubr.bf16.mxu0 %v436_v39  ;;  %v416_v7 = vrot.slane %v355_v59, 1  ;;  %v362_v12 = vunpack.c.l.bf16 %v2984_v3  ;;  %v686_v32 = vsel %vm683_vm1, %v684_v48, %v685_v49  ;;  %v3045_v37 = vcombine.low %v2970_v62, %v2981_v2  ;;  %v2697_v39 = vld [vmem:[%s3458_s1 + $0xe0] sm:$0xff]   ;;  %v2704_v48 = vld [vmem:[%s3458_s1 + $0x88] sm:$0xff]  }
  0x1d   : > { %v422_v13 = vrot.slane %v359_v4, 1  ;;  %v423_v15 = vrot.slane %v360_v5, 1  ;;  %v2124_v41 = vcombine.low %v2885_v14, %v2889_v16  ;;  %v2702_v14 = vld [vmem:[%s3458_s1 + $0x90] sm:$0xff]   ;;  %v691_v49 = vrot.slane %v352_v24, 2  ;;  %v3090_v24 = vld [vmem:[%s2874_s28 + $0x40] sm:$0xf] }
  0x1e   : > { %2416 = vmatpush3.bf16.msra.mxu0 %v2680_v8  ;;  %v417_v8 = vrot.slane %v356_v60, 1  ;;  %v426_v28 = vrot.slane %v362_v12, 1  ;;  %v694_v16 = vrot.slane %v354_v35, 2  ;;  %v696_v17 = vrot.slane %v355_v59, 2 }
  0x1f   : > { %2440 = vmatpush3.bf16.msra.mxu1 %v2681_v9  ;;  %2417 = vmatprep.subr.bf16.mxu0 %v2682_v10  ;;  %v419_v9 = vrot.slane %v357_v61, 1  ;;  %v3022_v27 = vsel %vm403_vm0, %v422_v13, %v423_v15  ;;  %v697_v26 = vrot.slane %v356_v60, 2  ;;  %v363_v35 = vunpack.c.l.bf16 %v3090_v24  ;;  %v3112_v60 = vld [vmem:[%s2874_s28 + $0x44] sm:$0x1] }
  0x20   : > { %2441 = vmatprep.subr.bf16.mxu1 %v2683_v11  ;;  %v3011_v19 = vsel %vm403_vm0, %v416_v7, %v417_v8  ;;  %v700_v7 = vrot.slane %v358_v0, 2  ;;  %v364_v58 = vunpack.c.l.bf16 %v3112_v60  ;;  %v2126_v3 = vcombine.low %v2957_v56, %v2970_v62  ;;  %v2715_v56 = vld [vmem:[%s3458_s1 + $0x168] sm:$0xff]   ;;  %v2727_v60 = vld [vmem:[%s3458_s1 + $0x140] sm:$0xff]  }
  0x21   : > { %v3130_v13 = vsel %vm683_vm1, %v696_v17, %v697_v26 }
  0x22   : > { %2418 = vmatpush3.bf16.msra.mxu0 %v2682_v10  ;;  %v361_v10 = vunpack.c.l.bf16 %v2981_v2 }
  0x23   : > { %2442 = vmatpush3.bf16.msra.mxu1 %v2683_v11  ;;  %2419 = vmatprep.subr.bf16.mxu0 %v2684_v31  ;;  %v420_v11 = vrot.slane %v358_v0, 1  ;;  %v1002_v0 = vrot.slane %v363_v35, 1 }
  0x24   : > { %2443 = vmatprep.subr.bf16.mxu1 %v2685_v33  ;;  %v425_v20 = vrot.slane %v361_v10, 1 }
  0x25   : > { %v3019_v22 = vsel %vm403_vm0, %v419_v9, %v420_v11  ;;  %v2125_v9 = vcombine.low %v2899_v25, %v2951_v54  ;;  %v2712_v11 = vld [vmem:[%s3458_s1 + $0x130] sm:$0xff]   ;;  %v705_v25 = vrot.slane %v361_v10, 2  ;;  %v706_v54 = vrot.slane %v362_v12, 2 }
  0x26   : > { %2420 = vmatpush3.bf16.msra.mxu0 %v2684_v31  ;;  %v3028_v29 = vpack.c.bf16 %v3019_v22, %v3011_v19  ;;  %v3032_v31 = vsel %vm403_vm0, %v425_v20, %v426_v28  ;;  %v703_v20 = vrot.slane %v360_v5, 2  ;;  %v2713_v28 = vld [vmem:[%s3458_s1 + $0x170] sm:$0xff]  }
  0x27   : > { %2444 = vmatpush3.bf16.msra.mxu1 %v2685_v33  ;;  %2421 = vmatprep.subr.bf16.mxu0 %v2686_v42  ;;  %v3036_v33 = vsel %vm683_vm1, %v687_v50, %v688_v51  ;;  %v3041_v34 = vpack.c.bf16 %v3032_v31, %v3022_v27  ;;  %v2705_v50 = vld [vmem:[%s3458_s1 + $0xc8] sm:$0xff]   ;;  %v693_v51 = vrot.slane %v353_v30, 2  ;;  %v2707_v30 = vld [vmem:[%s3458_s1 + $0xc0] sm:$0xff]   ;;  %v3162_v12 = vsel %vm683_vm1, %v705_v25, %v706_v54  ;;  %v2737_v25 = vld [vmem:[%s3458_s1 + $0x1d8] sm:$0xff]  }
  0x28   : > { %2445 = vmatprep.subr.bf16.mxu1 %v2687_v43  ;;  %v716_v40 = vpack.c.bf16 %v3036_v33, %v686_v32  ;;  %v2714_v32 = vld [vmem:[%s3458_s1 + $0x128] sm:$0xff]   ;;  %v2739_v54 = vld [vmem:[%s3458_s1 + $0x1d0] sm:$0xff]  }
  0x29   : > { %v3102_v59 = vsel %vm683_vm1, %v693_v51, %v694_v16  ;;  %v2723_v51 = vld [vmem:[%s3458_s1 + $0x150] sm:$0xff]  }
  0x2a   : > { %2422 = vmatpush3.bf16.msra.mxu0 %v2686_v42  ;;  %v2698_v42 = vld [vmem:[%s3458_s1 + $0x98] sm:$0xff]  }
  0x2b   : > { %2446 = vmatpush3.bf16.msra.mxu1 %v2687_v43  ;;  %2455 = vmatprep.subr.bf16.mxu0 %v2690_v44  ;;  %v2699_v43 = vld [vmem:[%s3458_s1 + $0xd8] sm:$0xff]  }
  0x2c   : > { %2479 = vmatprep.subr.bf16.mxu1 %v2691_v47 }
  0x2d   : > { %2424 = vmatmul.mubr.bf16.vlgmr.msra.gmra.mxu0 %v2945_v52 }
  0x2e   : > { %2448 = vmatmul.mubr.bf16.vlgmr.msra.gmra.mxu1 %v2961_v57  ;;  %2456 = vmatpush3.bf16.msra.mxu0 %v2690_v44  ;;  %v2703_v44 = vld [vmem:[%s3458_s1 + $0xd0] sm:$0xff]  }
  0x2f   : > { %2480 = vmatpush3.bf16.msra.mxu1 %v2691_v47  ;;  %2457 = vmatprep.subr.bf16.mxu0 %v2692_v53  ;;  %v690_v47 = vrot.slane %v351_v23, 2  ;;  %v2706_v23 = vld [vmem:[%s3458_s1 + $0x80] sm:$0xff]  }
  0x30   : > { %2481 = vmatprep.subr.bf16.mxu1 %v2693_v6  ;;  %2451 = vmatprep.mubr.bf16.mxu1 %v2978_v1 }
  0x31   : > { %2427 = vmatprep.mubr.bf16.mxu0 %v3028_v29 }
  0x32   : > { %2458 = vmatpush3.bf16.msra.mxu0 %v2692_v53  ;;  %v3099_v53 = vsel %vm683_vm1, %v690_v47, %v691_v49  ;;  %v1149_v49 = vrot.slane %v364_v58, 2 }
  0x33   : > { %2482 = vmatpush3.bf16.msra.mxu1 %v2693_v6  ;;  %2459 = vmatprep.subr.bf16.mxu0 %v2694_v18  ;;  %v699_v6 = vrot.slane %v357_v61, 2  ;;  %v3116_v8 = vpack.c.bf16 %v3102_v59, %v3099_v53  ;;  %v2711_v61 = vld [vmem:[%s3458_s1 + $0x178] sm:$0xff]  }
  0x34   : > { %2483 = vmatprep.subr.bf16.mxu1 %v2695_v21 }
  0x35   : > { %2428 = vmatmul.mubr.bf16.gmra.mxu0 %v3041_v34  ;;  %v3133_v15 = vsel %vm683_vm1, %v699_v6, %v700_v7  ;;  %v2725_v6 = vld [vmem:[%s3458_s1 + $0x148] sm:$0xff]  }
  0x36   : > { %2460 = vmatpush3.bf16.msra.mxu0 %v2694_v18  ;;  %2452 = vmatmul.mubr.bf16.gmra.mxu1 %v3045_v37  ;;  %v702_v18 = vrot.slane %v359_v4, 2  ;;  %v3148_v4 = vpack.c.bf16 %v3133_v15, %v3130_v13 }
  0x37   : > { %2484 = vmatpush3.bf16.msra.mxu1 %v2695_v21  ;;  %2461 = vmatprep.subr.bf16.mxu0 %v2696_v38  ;;  %v1003_v21 = vrot.slane %v364_v58, 1  ;;  %v2729_v58 = vld [vmem:[%s3458_s1 + $0x1f8] sm:$0xff]  }
  0x38   : > { %2485 = vmatprep.subr.bf16.mxu1 %v2697_v39  ;;  %2471 = vmatprep.mubr.bf16.mxu0 %v716_v40  ;;  %v3159_v10 = vsel %vm683_vm1, %v702_v18, %v703_v20  ;;  %v1006_v40 = vpack.c.bf16 %v2935_v45, %v2914_v36  ;;  %v3192_v36 = vld [vmem:[%s2874_s28 + $0x48] sm:$0xf]  ;;  %v2721_v45 = vld [vmem:[%s3458_s1 + $0x158] sm:$0xff]   ;;  %v2731_v18 = vld [vmem:[%s3458_s1 + $0x1f0] sm:$0xff]   ;;  %v1008_v20 = vpack.c.bf16 %v3022_v27, %v3019_v22 }
  0x39   : > { %2495 = vmatprep.mubr.bf16.mxu1 %v2124_v41  ;;  %v3151_v63 = vsel %vm403_vm0, %v1002_v0, %v1003_v21  ;;  %v3173_v62 = vpack.c.bf16 %v3162_v12, %v3159_v10  ;;  %v2719_v41 = vld [vmem:[%s3458_s1 + $0x160] sm:$0xff]   ;;  %v1007_v0 = vpack.c.bf16 %v3011_v19, %v2938_v46  ;;  %v1154_v46 = vpack.c.bf16 %v3159_v10, %v3133_v15  ;;  %v2732_v19 = vld [vmem:[%s3458_s1 + $0x1a8] sm:$0xff]   ;;  %v2736_v15 = vld [vmem:[%s3458_s1 + $0x198] sm:$0xff]  }
  0x3a   : > { %2462 = vmatpush3.bf16.msra.mxu0 %v2696_v38  ;;  %v1009_v5 = vpack.c.bf16 %v3151_v63, %v3032_v31  ;;  %v2127_v38 = vcombine.low %v2981_v2, %v3090_v24  ;;  %v1152_v2 = vpack.c.bf16 %v3099_v53, %v3036_v33  ;;  %v1148_v33 = vrot.slane %v363_v35, 2  ;;  %v2734_v27 = vld [vmem:[%s3458_s1 + $0x1a0] sm:$0xff]   ;;  %v2738_v31 = vld [vmem:[%s3458_s1 + $0x190] sm:$0xff]  }
  0x3b   : > { %2486 = vmatpush3.bf16.msra.mxu1 %v2697_v39  ;;  %2463 = vmatprep.subr.bf16.mxu0 %v2698_v42  ;;  %v2718_v39 = vld [vmem:[%s3458_s1 + $0x120] sm:$0xff]  }
  0x3c   : > { %2487 = vmatprep.subr.bf16.mxu1 %v2699_v43  ;;  %v3214_v26 = vsel %vm683_vm1, %v1148_v33, %v1149_v49  ;;  %v2742_v21 = vld [vmem:[%s3458_s1 + $0x180] sm:$0xff]   ;;  %v2749_v33 = vld [vmem:[%s3458_s1 + $0x228] sm:$0xff]   ;;  %v1724_v49 = vld [vmem:[%s3295_s15 + $0x18] sm:$0xff] }
  0x3d   : > { %v1155_v22 = vpack.c.bf16 %v3214_v26, %v3162_v12  ;;  %v2743_v10 = vld [vmem:[%s3458_s1 + $0x1c0] sm:$0xff]  }
  0x3e   : > { %2464 = vmatpush3.bf16.msra.mxu0 %v2698_v42  ;;  %v2720_v42 = vld [vmem:[%s3458_s1 + $0x118] sm:$0xff]  }
  0x3f   : > { %2488 = vmatpush3.bf16.msra.mxu1 %v2699_v43  ;;  %2465 = vmatprep.subr.bf16.mxu0 %v2702_v14  ;;  %v365_v43 = vunpack.c.l.bf16 %v3192_v36 }
  0x40   : > { %2489 = vmatprep.subr.bf16.mxu1 %v2703_v44 }
  0x41   : > { %v1435_v47 = vrot.slane %v365_v43, 1 }
  0x42   : > { %2466 = vmatpush3.bf16.msra.mxu0 %v2702_v14  ;;  %v346_v14 = vld [vmem:[%s2874_s28 + $0x4c] sm:$0x1] }
  0x43   : > { %2490 = vmatpush3.bf16.msra.mxu1 %v2703_v44  ;;  %2467 = vmatprep.subr.bf16.mxu0 %v2704_v48  ;;  %v2722_v44 = vld [vmem:[%s3458_s1 + $0x110] sm:$0xff]  }
  0x44   : > { %2491 = vmatprep.subr.bf16.mxu1 %v2705_v50 }
  0x46   : > { %2468 = vmatpush3.bf16.msra.mxu0 %v2704_v48  ;;  %v366_v48 = vunpack.c.l.bf16 %v346_v14 }
  0x47   : > { %2492 = vmatpush3.bf16.msra.mxu1 %v2705_v50  ;;  %2469 = vmatprep.subr.bf16.mxu0 %v2706_v23  ;;  %v1578_v50 = vrot.slane %v365_v43, 2 }
  0x48   : > { %2493 = vmatprep.subr.bf16.mxu1 %v2707_v30  ;;  %v1436_v16 = vrot.slane %v366_v48, 1 }
  0x4a   : > { %2470 = vmatpush3.bf16.msra.mxu0 %v2706_v23  ;;  %v1579_v23 = vrot.slane %v366_v48, 2  ;;  %v3208_v17 = vsel %vm403_vm0, %v1435_v47, %v1436_v16  ;;  %v1723_v47 = vld [vmem:[%s3295_s15 + $0x10] sm:$0xff]  ;;  %v2754_v48 = vld [vmem:[%s3460_s3 + $0x18] sm:$0xff]  }
  0x4b   : > { %2494 = vmatpush3.bf16.msra.mxu1 %v2707_v30  ;;  %2503 = vmatprep.subr.bf16.mxu0 %v2710_v55  ;;  %v2724_v30 = vld [vmem:[%s3458_s1 + $0x108] sm:$0xff]   ;;  %v1439_v35 = vpack.c.bf16 %v3208_v17, %v3151_v63  ;;  %v2755_v16 = vld [vmem:[%s3458_s1 + $0x210] sm:$0xff]  }
  0x4c   : > { %2527 = vmatprep.subr.bf16.mxu1 %v2711_v61  ;;  %v3219_v53 = vsel %vm683_vm1, %v1578_v50, %v1579_v23  ;;  %v1725_v50 = vld [vmem:[%s3295_s15 + $0x20] sm:$0xff] }
  0x4d   : > { %2472 = vmatmul.mubr.bf16.vlgmr.msra.gmra.mxu0 %v3116_v8  ;;  %v1582_v7 = vpack.c.bf16 %v3219_v53, %v3214_v26 }
  0x4e   : > { %2496 = vmatmul.mubr.bf16.vlgmr.msra.gmra.mxu1 %v2125_v9  ;;  %2504 = vmatpush3.bf16.msra.mxu0 %v2710_v55  ;;  %v2726_v55 = vld [vmem:[%s3458_s1 + $0x100] sm:$0xff]   ;;  %v1153_v9 = vpack.c.bf16 %v3130_v13, %v3102_v59  ;;  %v2733_v59 = vld [vmem:[%s3458_s1 + $0x1e8] sm:$0xff]  }
  0x4f   : > { %2528 = vmatpush3.bf16.msra.mxu1 %v2711_v61  ;;  %2505 = vmatprep.subr.bf16.mxu0 %v2712_v11  ;;  %v2728_v61 = vld [vmem:[%s3458_s1 + $0x1b8] sm:$0xff]   ;;  %v2735_v13 = vld [vmem:[%s3458_s1 + $0x1e0] sm:$0xff]  }
  0x50   : > { %2529 = vmatprep.subr.bf16.mxu1 %v2713_v28  ;;  %2475 = vmatprep.mubr.bf16.mxu0 %v3148_v4 }
  0x51   : > { %2499 = vmatprep.mubr.bf16.mxu1 %v2126_v3  ;;  %v1722_v3 = vld [vmem:[%s3295_s15 + $0x8] sm:$0xff] }
  0x52   : > { %2506 = vmatpush3.bf16.msra.mxu0 %v2712_v11  ;;  %v2730_v11 = vld [vmem:[%s3458_s1 + $0x1b0] sm:$0xff]  }
  0x53   : > { %2530 = vmatpush3.bf16.msra.mxu1 %v2713_v28  ;;  %2507 = vmatprep.subr.bf16.mxu0 %v2714_v32  ;;  %v1721_v28 = vld [vmem:[%s3295_s15] sm:$0xff] }
  0x54   : > { %2531 = vmatprep.subr.bf16.mxu1 %v2715_v56 }
  0x55   : > { %2476 = vmatmul.mubr.bf16.gmra.mxu0 %v3173_v62 }
  0x56   : > { %2508 = vmatpush3.bf16.msra.mxu0 %v2714_v32  ;;  %2500 = vmatmul.mubr.bf16.gmra.mxu1 %v2127_v38  ;;  %v3318_v38 = vld [vmem:[%s3462_s5] ss:$0 sm:$0xff] }
  0x57   : > { %2532 = vmatpush3.bf16.msra.mxu1 %v2715_v56  ;;  %2509 = vmatprep.subr.bf16.mxu0 %v2718_v39  ;;  %v2744_v56 = vld [vmem:[%s3458_s1 + $0x238] sm:$0xff]  }
  0x58   : > { %2533 = vmatprep.subr.bf16.mxu1 %v2719_v41  ;;  %2519 = vmatprep.mubr.bf16.mxu0 %v1006_v40 }
  0x59   : > { %2543 = vmatprep.mubr.bf16.mxu1 %v1152_v2  ;;  %v2746_v2 = vld [vmem:[%s3458_s1 + $0x230] sm:$0xff]  }
  0x5a   : > { %2510 = vmatpush3.bf16.msra.mxu0 %v2718_v39  ;;  %v2745_v39 = vld [vmem:[%s3460_s3 + $0x38] sm:$0xff]  }
  0x5b   : > { %2534 = vmatpush3.bf16.msra.mxu1 %v2719_v41  ;;  %2511 = vmatprep.subr.bf16.mxu0 %v2720_v42 }
  0x5c   : > { %2535 = vmatprep.subr.bf16.mxu1 %v2721_v45 }
  0x5e   : > { %2512 = vmatpush3.bf16.msra.mxu0 %v2720_v42  ;;  %v2747_v42 = vld [vmem:[%s3460_s3 + $0x30] sm:$0xff]  }
  0x5f   : > { %2536 = vmatpush3.bf16.msra.mxu1 %v2721_v45  ;;  %2513 = vmatprep.subr.bf16.mxu0 %v2722_v44 }
  0x60   : > { %2537 = vmatprep.subr.bf16.mxu1 %v2723_v51 }
  0x62   : > { %2514 = vmatpush3.bf16.msra.mxu0 %v2722_v44 }
  0x63   : > { %2538 = vmatpush3.bf16.msra.mxu1 %v2723_v51  ;;  %2515 = vmatprep.subr.bf16.mxu0 %v2724_v30  ;;  %v1726_v51 = vld [vmem:[%s3295_s15 + $0x28] sm:$0xff] }
  0x64   : > { %2539 = vmatprep.subr.bf16.mxu1 %v2725_v6 }
  0x66   : > { %2516 = vmatpush3.bf16.msra.mxu0 %v2724_v30 }
  0x67   : > { %2540 = vmatpush3.bf16.msra.mxu1 %v2725_v6  ;;  %2517 = vmatprep.subr.bf16.mxu0 %v2726_v55  ;;  %v2757_v6 = vld [vmem:[%s3458_s1 + $0x208] sm:$0xff]  }
  0x68   : > { %2541 = vmatprep.subr.bf16.mxu1 %v2727_v60 }
  0x6a   : > { %2518 = vmatpush3.bf16.msra.mxu0 %v2726_v55 }
  0x6b   : > { %2542 = vmatpush3.bf16.msra.mxu1 %v2727_v60  ;;  %2551 = vmatprep.subr.bf16.mxu0 %v2728_v61  ;;  %v2758_v60 = vld [vmem:[%s3460_s3 + $0x8] sm:$0xff]  }
  0x6c   : > { %2575 = vmatprep.subr.bf16.mxu1 %v2729_v58 }
  0x6d   : > { %2520 = vmatmul.mubr.bf16.vlgmr.msra.gmra.mxu0 %v1007_v0  ;;  %v1727_v0 = vld [vmem:[%s3295_s15 + $0x30] sm:$0xff] }
  0x6e   : > { %2544 = vmatmul.mubr.bf16.vlgmr.msra.gmra.mxu1 %v1153_v9  ;;  %2552 = vmatpush3.bf16.msra.mxu0 %v2728_v61  ;;  %v1728_v9 = vld [vmem:[%s3295_s15 + $0x38] sm:$0xff] }
  0x6f   : > { %2576 = vmatpush3.bf16.msra.mxu1 %v2729_v58  ;;  %2553 = vmatprep.subr.bf16.mxu0 %v2730_v11 }
  0x70   : > { %2577 = vmatprep.subr.bf16.mxu1 %v2731_v18  ;;  %2523 = vmatprep.mubr.bf16.mxu0 %v1008_v20 }
  0x71   : > { %2547 = vmatprep.mubr.bf16.mxu1 %v1154_v46 }
  0x72   : > { %2554 = vmatpush3.bf16.msra.mxu0 %v2730_v11 }
  0x73   : > { %2578 = vmatpush3.bf16.msra.mxu1 %v2731_v18  ;;  %2555 = vmatprep.subr.bf16.mxu0 %v2732_v19  ;;  %v2759_v18 = vld [vmem:[%s3458_s1 + $0x200] sm:$0xff]  }
  0x74   : > { %2579 = vmatprep.subr.bf16.mxu1 %v2733_v59 }
  0x75   : > { %2524 = vmatmul.mubr.bf16.gmra.mxu0 %v1009_v5  ;;  %v3305_v5 = vld [vmem:[%s3461_s4] ss:$0 sm:$0xff] }
  0x76   : > { %2556 = vmatpush3.bf16.msra.mxu0 %v2732_v19  ;;  %2548 = vmatmul.mubr.bf16.gmra.mxu1 %v1155_v22  ;;  %v1736_v12 = vmul.f32 %v3305_v5, %v1721_v28  ;;  %v1737_v32 = vmul.f32 %v3305_v5, %v1722_v3  ;;  %v1738_v63 = vmul.f32 %v3305_v5, %v1723_v47 }
  0x77   : > { %2580 = vmatpush3.bf16.msra.mxu1 %v2733_v59  ;;  %2557 = vmatprep.subr.bf16.mxu0 %v2734_v27  ;;  %v1739_v23 = vmul.f32 %v3305_v5, %v1724_v49  ;;  %v1740_v17 = vmul.f32 %v3305_v5, %v1725_v50  ;;  %v1741_v30 = vmul.f32 %v3305_v5, %v1726_v51  ;;  %v2760_v59 = vld [vmem:[%s3460_s3] sm:$0xff]  }
  0x78   : > { %2581 = vmatprep.subr.bf16.mxu1 %v2735_v13  ;;  %2567 = vmatprep.mubr.bf16.mxu0 %v2961_v57  ;;  %v2741_v57 = vld [vmem:[%s3458_s1 + $0x1c8] sm:$0xff]   ;;  %v1751_v40 = vadd.f32 %v3318_v38, %v1736_v12  ;;  %v1752_v41 = vadd.f32 %v3318_v38, %v1737_v32  ;;  %v1742_v46 = vmul.f32 %v3305_v5, %v1727_v0 }
  0x79   : > { %2591 = vmatprep.mubr.bf16.mxu1 %v2945_v52  ;;  %v2740_v52 = vld [vmem:[%s3458_s1 + $0x188] sm:$0xff]   ;;  %v1754_v55 = vadd.f32 %v3318_v38, %v1739_v23  ;;  %v1755_v61 = vadd.f32 %v3318_v38, %v1740_v17  ;;  %v1756_v58 = vadd.f32 %v3318_v38, %v1741_v30  ;;  %v1743_v19 = vmul.f32 %v3305_v5, %v1728_v9 }
  0x7a   : > { %2558 = vmatpush3.bf16.msra.mxu0 %v2734_v27  ;;  %v1767_v45 = vmul.f32 0.1, %v1751_v40  ;;  %v1768_v43 = vmul.f32 0.1, %v1752_v41  ;;  %vm1759_vm2 = vcmp.ge.f32.partialorder %v1751_v40, 0.0  ;;  %vm1760_vm3 = vcmp.ge.f32.partialorder %v1752_v41, 0.0 }
  0x7b   : > { %2582 = vmatpush3.bf16.msra.mxu1 %v2735_v13  ;;  %2559 = vmatprep.subr.bf16.mxu0 %v2736_v15  ;;  %v1770_v20 = vmul.f32 0.1, %v1754_v55  ;;  %vm1762_vm5 = vcmp.ge.f32.partialorder %v1754_v55, 0.0  ;;  %v1771_v22 = vmul.f32 0.1, %v1755_v61  ;;  %vm1763_vm6 = vcmp.ge.f32.partialorder %v1755_v61, 0.0 }
  0x7c   : > { %2583 = vmatprep.subr.bf16.mxu1 %v2737_v25  ;;  %v1775_v14 = vsel %vm1759_vm2, %v1751_v40, %v1767_v45  ;;  %v1776_v44 = vsel %vm1760_vm3, %v1752_v41, %v1768_v43  ;;  %v1772_v27 = vmul.f32 0.1, %v1756_v58  ;;  %vm1764_vm7 = vcmp.ge.f32.partialorder %v1756_v58, 0.0 }
  0x7e   : > { %2560 = vmatpush3.bf16.msra.mxu0 %v2736_v15  ;;  %v1778_v15 = vsel %vm1762_vm5, %v1754_v55, %v1770_v20 }
  0x7f   : > { %2584 = vmatpush3.bf16.msra.mxu1 %v2737_v25  ;;  %2561 = vmatprep.subr.bf16.mxu0 %v2738_v31  ;;  %v1757_v25 = vadd.f32 %v3318_v38, %v1742_v46 }
  0x80   : > { %2585 = vmatprep.subr.bf16.mxu1 %v2739_v54 }
  0x81   : > { %v1773_v28 = vmul.f32 0.1, %v1757_v25  ;;  %vm1765_vm8 = vcmp.ge.f32.partialorder %v1757_v25, 0.0 }
  0x82   : > { %2562 = vmatpush3.bf16.msra.mxu0 %v2738_v31  ;;  %v1758_v31 = vadd.f32 %v3318_v38, %v1743_v19 }
  0x83   : > { %2586 = vmatpush3.bf16.msra.mxu1 %v2739_v54  ;;  %2563 = vmatprep.subr.bf16.mxu0 %v2740_v52  ;;  %v1779_v54 = vsel %vm1763_vm6, %v1755_v61, %v1771_v22  ;;  %v1781_v5 = vsel %vm1765_vm8, %v1757_v25, %v1773_v28 }
  0x84   : > { %2587 = vmatprep.subr.bf16.mxu1 %v2741_v57  ;;  %v1774_v3 = vmul.f32 0.1, %v1758_v31  ;;  %vm1766_vm9 = vcmp.ge.f32.partialorder %v1758_v31, 0.0 }
  0x86   : > { %2564 = vmatpush3.bf16.msra.mxu0 %v2740_v52  ;;  %v1780_v52 = vsel %vm1764_vm7, %v1756_v58, %v1772_v27 }
  0x87   : > { %2588 = vmatpush3.bf16.msra.mxu1 %v2741_v57  ;;  %2565 = vmatprep.subr.bf16.mxu0 %v2742_v21 }
  0x88   : > { %2589 = vmatprep.subr.bf16.mxu1 %v2743_v10 }
  0x8a   : > { %2566 = vmatpush3.bf16.msra.mxu0 %v2742_v21  ;;  %v1785_v21 = vpack.c.bf16 %v1780_v52, %v1779_v54 }
  0x8b   : > { %2590 = vmatpush3.bf16.msra.mxu1 %v2743_v10  ;;  %2599 = vmatprep.subr.bf16.mxu0 %v2744_v56  ;;  %v1782_v10 = vsel %vm1766_vm9, %v1758_v31, %v1774_v3 }
  0x8c   : > { %2623 = vmatprep.subr.bf16.mxu1 %v2745_v39  ;;  %v1786_v12 = vpack.c.bf16 %v1782_v10, %v1781_v5 }
  0x8d   : > { %2568 = vmatmul.mubr.bf16.vlgmr.msra.gmra.mxu0 %v2978_v1  ;;  %v2750_v1 = vld [vmem:[%s3460_s3 + $0x28] sm:$0xff]  }
  0x8e   : > { %2592 = vmatmul.mubr.bf16.vlgmr.msra.gmra.mxu1 %v3028_v29  ;;  %2600 = vmatpush3.bf16.msra.mxu0 %v2744_v56  ;;  %v2200_v29 = vcombine.low %v3090_v24, %v3192_v36  ;;  %v2752_v24 = vld [vmem:[%s3460_s3 + $0x20] sm:$0xff]   ;;  %v2753_v36 = vld [vmem:[%s3458_s1 + $0x218] sm:$0xff]  }
  0x8f   : > { %2624 = vmatpush3.bf16.msra.mxu1 %v2745_v39  ;;  %2601 = vmatprep.subr.bf16.mxu0 %v2746_v2 }
  0x90   : > { %2625 = vmatprep.subr.bf16.mxu1 %v2747_v42  ;;  %2571 = vmatprep.mubr.bf16.mxu0 %v3045_v37  ;;  %v2751_v37 = vld [vmem:[%s3458_s1 + $0x220] sm:$0xff]  }
  0x91   : > { %2595 = vmatprep.mubr.bf16.mxu1 %v3041_v34  ;;  %v1783_v34 = vpack.c.bf16 %v1776_v44, %v1775_v14 }
  0x92   : > { %2602 = vmatpush3.bf16.msra.mxu0 %v2746_v2 }
  0x93   : > { %2626 = vmatpush3.bf16.msra.mxu1 %v2747_v42  ;;  %2603 = vmatprep.subr.bf16.mxu0 %v2749_v33 }
  0x94   : > { %2627 = vmatprep.subr.bf16.mxu1 %v2750_v1 }
  0x95   : > { %2572 = vmatmul.mubr.bf16.gmra.mxu0 %v2200_v29 }
  0x96   : > { %2604 = vmatpush3.bf16.msra.mxu0 %v2749_v33  ;;  %2596 = vmatmul.mubr.bf16.gmra.mxu1 %v1439_v35  ;;  %v1753_v35 = vadd.f32 %v3318_v38, %v1738_v63 }
  0x97   : > { %2628 = vmatpush3.bf16.msra.mxu1 %v2750_v1  ;;  %2605 = vmatprep.subr.bf16.mxu0 %v2751_v37 }
  0x98   : > { %2629 = vmatprep.subr.bf16.mxu1 %v2752_v24  ;;  %2615 = vmatprep.mubr.bf16.mxu0 %v3116_v8  ;;  %v2756_v8 = vld [vmem:[%s3460_s3 + $0x10] sm:$0xff]   ;;  %v1769_v11 = vmul.f32 0.1, %v1753_v35  ;;  %vm1761_vm4 = vcmp.ge.f32.partialorder %v1753_v35, 0.0 }
  0x99   : > { %2639 = vmatprep.mubr.bf16.mxu1 %v1783_v34 }
  0x9a   : > { %2606 = vmatpush3.bf16.msra.mxu0 %v2751_v37  ;;  %v1777_v13 = vsel %vm1761_vm4, %v1753_v35, %v1769_v11 }
  0x9b   : > { %2630 = vmatpush3.bf16.msra.mxu1 %v2752_v24  ;;  %2607 = vmatprep.subr.bf16.mxu0 %v2753_v36  ;;  %v1784_v57 = vpack.c.bf16 %v1778_v15, %v1777_v13 }
  0x9c   : > { %2631 = vmatprep.subr.bf16.mxu1 %v2754_v48 }
  0x9e   : > { %2608 = vmatpush3.bf16.msra.mxu0 %v2753_v36 }
  0x9f   : > { %2632 = vmatpush3.bf16.msra.mxu1 %v2754_v48  ;;  %2609 = vmatprep.subr.bf16.mxu0 %v2755_v16 }
  0xa0   : > { %2633 = vmatprep.subr.bf16.mxu1 %v2756_v8 }
  0xa2   : > { %2610 = vmatpush3.bf16.msra.mxu0 %v2755_v16 }
  0xa3   : > { %2634 = vmatpush3.bf16.msra.mxu1 %v2756_v8  ;;  %2611 = vmatprep.subr.bf16.mxu0 %v2757_v6 }
  0xa4   : > { %2635 = vmatprep.subr.bf16.mxu1 %v2758_v60 }
  0xa6   : > { %2612 = vmatpush3.bf16.msra.mxu0 %v2757_v6 }
  0xa7   : > { %2636 = vmatpush3.bf16.msra.mxu1 %v2758_v60  ;;  %2613 = vmatprep.subr.bf16.mxu0 %v2759_v18 }
  0xa8   : > { %2637 = vmatprep.subr.bf16.mxu1 %v2760_v59 }
  0xaa   : > { %2614 = vmatpush3.bf16.msra.mxu0 %v2759_v18 }
  0xab   : > { %2638 = vmatpush3.bf16.msra.mxu1 %v2760_v59 }
  0xad   : > { %2616 = vmatmul.mubr.bf16.vlgmr.msra.gmra.mxu0 %v3148_v4 }
  0xae   : > { %2640 = vmatmul.mubr.bf16.vlgmr.msra.gmra.mxu1 %v1784_v57  ;;  %2619 = vmatprep.mubr.bf16.mxu0 %v3173_v62 }
  0xaf   : > { %2643 = vmatprep.mubr.bf16.mxu1 %v1785_v21 }
  0xb5   : > { %2620 = vmatmul.mubr.bf16.gmra.mxu0 %v1582_v7 }
  0xb6   : > { %2644 = vmatmul.mubr.bf16.gmra.mxu1 %v1786_v12 }
  0xed   : > { %v2425_v32 = vpop.f32.mrf.mxu0 }
  0xee   : > { %v2449_v38 = vpop.f32.mrf.mxu1 }
  0xef   : > { %v539_v56 = vpop.f32.mrf.mxu0  ;;  %v661_v25 = vadd.f32 %v2449_v38, %v2425_v32 }
  0xf0   : > { %v652_v40 = vpop.f32.mrf.mxu1 }
  0xf1   : > { %v2426_v39 = vpop.f32.mrf.mxu0  ;;  %v653_v52 = vadd.f32 %v652_v40, %v539_v56 }
  0xf2   : > { %v2450_v4 = vpop.f32.mrf.mxu1 }
  0xf3   : > { %v542_v41 = vpop.f32.mrf.mxu0  ;;  %v664_v21 = vadd.f32 %v2450_v4, %v2426_v39 }
  0xf4   : > { %v655_v45 = vpop.f32.mrf.mxu1 }
  0xf5   : > { %v2429_v2 = vpop.f32.mrf.mxu0  ;;  %v656_v10 = vadd.f32 %v655_v45, %v542_v41 }
  0xf6   : > { %v2453_v62 = vpop.f32.mrf.mxu1 }
  0xf7   : > { %v555_v42 = vpop.f32.mrf.mxu0 }
  0xf8   : > { %v668_v33 = vpop.f32.mrf.mxu1 }
  0xf9   : > { %v3400_v43 = vpop.f32.mrf.mxu0 }
  0xfa   : > { %v2454_v26 = vpop.f32.mrf.mxu1 }
  0xfb   : > { %v3402_v1 = vpop.f32.mrf.mxu0  ;;  %v680_v39 = vadd.f32 %v2454_v26, %v3400_v43 }
  0xfc   : > { %3464 = vst [vmem:[#allocation2_spill] sm:$0xff] %v3402_v1  ;;  %v3404_v7 = vpop.f32.mrf.mxu1 }
  0xfd   : > { %3465 = vst [vmem:[#allocation3_spill] sm:$0xff] %v3404_v7 }
 0x103   : > { %v3473_v45 = vld [vmem:[#allocation2_spill] sm:$0xff] }
 0x10d   : > { %v2473_v29 = vpop.f32.mrf.mxu0 }
 0x10e   : > { %v2497_v14 = vpop.f32.mrf.mxu1  ;;  %v852_v57 = vadd.f32 %v2473_v29, %v661_v25 }
 0x10f   : > { %v819_v53 = vpop.f32.mrf.mxu0 }
 0x110   : > { %v961_v37 = vpop.f32.mrf.mxu1  ;;  %v850_v28 = vadd.f32 %v819_v53, %v653_v52  ;;  %v994_v12 = vadd.f32 %v2497_v14, %v852_v57  ;;  %v3474_v53 = vld [vmem:[#allocation3_spill] sm:$0xff] }
 0x111   : > { %v2474_v44 = vpop.f32.mrf.mxu0  ;;  %v672_v14 = vadd.f32 %v3474_v53, %v3473_v45 }
 0x112   : > { %v2498_v34 = vpop.f32.mrf.mxu1 }
 0x113   : > { %v822_v24 = vpop.f32.mrf.mxu0 }
 0x114   : > { %v964_v47 = vpop.f32.mrf.mxu1 }
 0x115   : > { %v2477_v36 = vpop.f32.mrf.mxu0 }
 0x116   : > { %v2501_v49 = vpop.f32.mrf.mxu1 }
 0x117   : > { %v835_v48 = vpop.f32.mrf.mxu0 }
 0x118   : > { %v977_v51 = vpop.f32.mrf.mxu1 }
 0x119   : > { %v2478_v50 = vpop.f32.mrf.mxu0 }
 0x11a   : > { %v3406_v16 = vpop.f32.mrf.mxu1 }
 0x11b   : > { %v838_v63 = vpop.f32.mrf.mxu0  ;;  %3466 = vst [vmem:[#allocation4_spill] sm:$0xff] %v3406_v16  ;;  %v669_v16 = vadd.f32 %v668_v33, %v555_v42 }
 0x11c   : > { %v3408_v8 = vpop.f32.mrf.mxu1 }
 0x11d   : > { %3467 = vst [vmem:[#allocation5_spill] sm:$0xff] %v3408_v8  ;;  %v854_v40 = vadd.f32 %v835_v48, %v669_v16 }
 0x122   : > { %v3475_v43 = vld [vmem:[#allocation4_spill] sm:$0xff] }
 0x12d   : > { %v2521_v23 = vpop.f32.mrf.mxu0 }
 0x12e   : > { %v2545_v30 = vpop.f32.mrf.mxu1  ;;  %v1142_v8 = vadd.f32 %v2521_v23, %v994_v12 }
 0x12f   : > { %v1109_v17 = vpop.f32.mrf.mxu0 }
 0x130   : > { %v1255_v6 = vpop.f32.mrf.mxu1  ;;  %v1288_v29 = vadd.f32 %v2545_v30, %v1142_v8 }
 0x131   : > { %v2522_v35 = vpop.f32.mrf.mxu0 }
 0x132   : > { %v2546_v60 = vpop.f32.mrf.mxu1 }
 0x133   : > { %v1112_v55 = vpop.f32.mrf.mxu0 }
 0x134   : > { %v1258_v58 = vpop.f32.mrf.mxu1 }
 0x135   : > { %v2525_v61 = vpop.f32.mrf.mxu0 }
 0x136   : > { %v3410_v0 = vpop.f32.mrf.mxu1 }
 0x137   : > { %3468 = vst [vmem:[#allocation6_spill] sm:$0xff] %v3410_v0  ;;  %v1125_v9 = vpop.f32.mrf.mxu0  ;;  %v851_v0 = vadd.f32 %v822_v24, %v656_v10 }
 0x138   : > { %v3412_v11 = vpop.f32.mrf.mxu1 }
 0x139   : > { %3469 = vst [vmem:[#allocation7_spill] sm:$0xff] %v3412_v11  ;;  %v2526_v18 = vpop.f32.mrf.mxu0  ;;  %v677_v11 = vadd.f32 %v2453_v62, %v2429_v2  ;;  %v993_v4 = vadd.f32 %v964_v47, %v851_v0 }
 0x13a   : > { %v3414_v20 = vpop.f32.mrf.mxu1 }
 0x13b   : > { %3470 = vst [vmem:[#allocation8_spill] sm:$0xff] %v3414_v20  ;;  %v3416_v46 = vpop.f32.mrf.mxu0  ;;  %v853_v20 = vadd.f32 %v2474_v44, %v664_v21  ;;  %v856_v38 = vadd.f32 %v2477_v36, %v677_v11  ;;  %v857_v44 = vadd.f32 %v2478_v50, %v680_v39  ;;  %v1141_v24 = vadd.f32 %v1112_v55, %v993_v4 }
 0x13c   : > { %3471 = vst [vmem:[#allocation9_spill] sm:$0xff] %v3416_v46  ;;  %v3418_v59 = vpop.f32.mrf.mxu1  ;;  %v855_v36 = vadd.f32 %v838_v63, %v672_v14 }
 0x13d   : > { %3472 = vst [vmem:[#allocation10_spill] sm:$0xff] %v3418_v59  ;;  %v992_v59 = vadd.f32 %v961_v37, %v850_v28  ;;  %v995_v32 = vadd.f32 %v2498_v34, %v853_v20  ;;  %v998_v62 = vadd.f32 %v2501_v49, %v856_v38  ;;  %v996_v34 = vadd.f32 %v977_v51, %v854_v40 }
 0x13e   : > { %v999_v26 = vadd.f32 %v3475_v43, %v857_v44  ;;  %v1287_v16 = vadd.f32 %v1258_v58, %v1141_v24  ;;  %v3477_v55 = vld [vmem:[#allocation6_spill] sm:$0xff] }
 0x13f   : > { %v1140_v1 = vadd.f32 %v1109_v17, %v992_v59  ;;  %v1143_v41 = vadd.f32 %v2522_v35, %v995_v32  ;;  %v1146_v17 = vadd.f32 %v2525_v61, %v998_v62  ;;  %v1144_v47 = vadd.f32 %v1125_v9, %v996_v34  ;;  %v3476_v35 = vld [vmem:[#allocation5_spill] sm:$0xff] }
 0x140   : > { %v997_v49 = vadd.f32 %v3476_v35, %v855_v36  ;;  %v3478_v20 = vld [vmem:[#allocation7_spill] sm:$0xff] }
 0x141   : > { %v1286_v37 = vadd.f32 %v1255_v6, %v1140_v1  ;;  %v1289_v23 = vadd.f32 %v2546_v60, %v1143_v41  ;;  %v1147_v1 = vadd.f32 %v2526_v18, %v999_v26  ;;  %v1292_v0 = vadd.f32 %v3477_v55, %v1146_v17 }
 0x142   : > { %v3480_v25 = vld [vmem:[#allocation8_spill] sm:$0xff] }
 0x143   : > { %v3479_v59 = vld [vmem:[#allocation9_spill] sm:$0xff] }
 0x144   : > { %v1145_v9 = vadd.f32 %v3479_v59, %v997_v49  ;;  %v3481_v32 = vld [vmem:[#allocation10_spill] sm:$0xff] }
 0x146   : > { %v1291_v38 = vadd.f32 %v3481_v32, %v1145_v9 }
 0x14d   : > { %v2569_v19 = vpop.f32.mrf.mxu0 }
 0x14e   : > { %v2593_v22 = vpop.f32.mrf.mxu1  ;;  %v1427_v42 = vadd.f32 %v2569_v19, %v1288_v29  ;;  %v1290_v19 = vadd.f32 %v3478_v20, %v1144_v47 }
 0x14f   : > { %v1394_v27 = vpop.f32.mrf.mxu0 }
 0x150   : > { %v1539_v13 = vpop.f32.mrf.mxu1  ;;  %v1425_v11 = vadd.f32 %v1394_v27, %v1286_v37  ;;  %v1572_v8 = vadd.f32 %v2593_v22, %v1427_v42 }
 0x151   : > { %v2570_v15 = vpop.f32.mrf.mxu0 }
 0x152   : > { %v2594_v31 = vpop.f32.mrf.mxu1  ;;  %v1428_v30 = vadd.f32 %v2570_v15, %v1289_v23  ;;  %v1570_v51 = vadd.f32 %v1539_v13, %v1425_v11 }
 0x153   : > { %v1397_v54 = vpop.f32.mrf.mxu0 }
 0x154   : > { %v1542_v3 = vpop.f32.mrf.mxu1  ;;  %v1426_v63 = vadd.f32 %v1397_v54, %v1287_v16  ;;  %v1573_v18 = vadd.f32 %v2594_v31, %v1428_v30  ;;  %v1293_v54 = vadd.f32 %v3480_v25, %v1147_v1 }
 0x155   : > { %v2573_v5 = vpop.f32.mrf.mxu0 }
 0x156   : > { %v3420_v46 = vpop.f32.mrf.mxu1  ;;  %v1431_v22 = vadd.f32 %v2573_v5, %v1292_v0  ;;  %v1571_v57 = vadd.f32 %v1542_v3, %v1426_v63 }
 0x157   : > { %v1410_v7 = vpop.f32.mrf.mxu0 }
 0x158   : > { %v1555_v56 = vpop.f32.mrf.mxu1  ;;  %v1429_v21 = vadd.f32 %v1410_v7, %v1290_v19  ;;  %v1576_v31 = vadd.f32 %v3420_v46, %v1431_v22 }
 0x159   : > { %v2574_v2 = vpop.f32.mrf.mxu0 }
 0x15a   : > { %v2598_v33 = vpop.f32.mrf.mxu1  ;;  %v1432_v5 = vadd.f32 %v2574_v2, %v1293_v54  ;;  %v1574_v3 = vadd.f32 %v1555_v56, %v1429_v21 }
 0x15b   : > { %v1413_v48 = vpop.f32.mrf.mxu0 }
 0x15c   : > { %v1558_v50 = vpop.f32.mrf.mxu1  ;;  %v1430_v7 = vadd.f32 %v1413_v48, %v1291_v38  ;;  %v1577_v62 = vadd.f32 %v2598_v33, %v1432_v5 }
 0x15e   : > { %v1575_v42 = vadd.f32 %v1558_v50, %v1430_v7 }
 0x16d   : > { %v2617_v6 = vpop.f32.mrf.mxu0 }
 0x16e   : > { %v1715_v60 = vadd.f32 %v2617_v6, %v1572_v8  ;;  %v2641_v61 = vpop.f32.mrf.mxu1 }
 0x16f   : > { %v1682_v58 = vpop.f32.mrf.mxu0 }
 0x170   : > { %v1918_v27 = vadd.f32 %v2641_v61, %v1715_v60  ;;  %v1713_v13 = vadd.f32 %v1682_v58, %v1570_v51  ;;  %v1885_v15 = vpop.f32.mrf.mxu1 }
 0x171   : > { %v2618_v52 = vpop.f32.mrf.mxu0 }
 0x172   : > { %1926 = vst [vmem:[%s3435_s20 + $0x10] sm:$0xff] %v1918_v27  ;;  %v1916_v28 = vadd.f32 %v1885_v15, %v1713_v13  ;;  %v1716_v10 = vadd.f32 %v2618_v52, %v1573_v18  ;;  %v2642_v12 = vpop.f32.mrf.mxu1 }
 0x173   : > { %v1685_v39 = vpop.f32.mrf.mxu0 }
 0x174   : > { %1924 = vst [vmem:[%s3435_s20] sm:$0xff] %v1916_v28  ;;  %v1919_v40 = vadd.f32 %v2642_v12, %v1716_v10  ;;  %v1714_v4 = vadd.f32 %v1685_v39, %v1571_v57  ;;  %v1888_v29 = vpop.f32.mrf.mxu1 }
 0x175   : > { %v2621_v41 = vpop.f32.mrf.mxu0 }
 0x176   : > { %1927 = vst [vmem:[%s3435_s20 + $0x18] sm:$0xff] %v1919_v40  ;;  %v1917_v45 = vadd.f32 %v1888_v29, %v1714_v4  ;;  %v1719_v53 = vadd.f32 %v2621_v41, %v1576_v31  ;;  %v2645_v14 = vpop.f32.mrf.mxu1 }
 0x177   : > { %v1698_v44 = vpop.f32.mrf.mxu0 }
 0x178   : > { %1925 = vst [vmem:[%s3435_s20 + $0x8] sm:$0xff] %v1917_v45  ;;  %v1922_v37 = vadd.f32 %v2645_v14, %v1719_v53  ;;  %v1717_v46 = vadd.f32 %v1698_v44, %v1574_v3  ;;  %v1901_v2 = vpop.f32.mrf.mxu1 }
 0x179   : > { %v2622_v24 = vpop.f32.mrf.mxu0 }
 0x17a   : > { %1930 = vst [vmem:[%s3435_s20 + $0x30] sm:$0xff] %v1922_v37  ;;  %v1920_v34 = vadd.f32 %v1901_v2, %v1717_v46  ;;  %v1720_v36 = vadd.f32 %v2622_v24, %v1577_v62  ;;  %v2646_v56 = vpop.f32.mrf.mxu1 }
 0x17b   : > { %v1701_v23 = vpop.f32.mrf.mxu0 }
 0x17c   : > { %1928 = vst [vmem:[%s3435_s20 + $0x20] sm:$0xff] %v1920_v34  ;;  %v1923_v17 = vadd.f32 %v2646_v56, %v1720_v36  ;;  %v1718_v11 = vadd.f32 %v1701_v23, %v1575_v42  ;;  %v1904_v43 = vpop.f32.mrf.mxu1 }
 0x17e   : > { %1931 = vst [vmem:[%s3435_s20 + $0x38] sm:$0xff] %v1923_v17  ;;  %v1921_v26 = vadd.f32 %v1904_v43, %v1718_v11 }
 0x180   : > { %1929 = vst [vmem:[%s3435_s20 + $0x28] sm:$0xff] %v1921_v26 }
 0x181 PF: > { %s16_s23 = sadd.s32 1, %s2783_s23   ;;  %s3482_s21 = smov %s2779_s22 }
 0x182   : > { %p13_p5 = scmp.ge.s32.totalorder %s16_s23, 4   ;;  %s3483_s22 = smov %s3485_s24 }
 0x184   :  { %15 = sbr.rel (!%p13_p5) target bundleno = 2 (0x2), region = 91 }

</bundles_post_ra>
